<compile_context>
chip_gen: v7x
topology: tpu7x:2x2x1
jax: 0.10.0
libtpu: 0.0.40
codegen_flags: <defaults>
</compile_context>

<pallas_src>
import jax
import jax.numpy as jnp
from jax.experimental import pallas as pl
from jax.experimental.pallas import tpu as pltpu

X_DIM = 784          # hard-coded by x.view(-1, 784) in the torch forward
X_PAD = 896          # 7 * 128 -> lane-dense loads/stores for x / recon


def vae_kernel(x_ref, eps_ref,
               w1, b1, w2, b2, w3, b3, w4, b4, w5, b5, w6, b6,
               recon_ref, mu_ref, logvar_ref):
    bf16 = jnp.bfloat16

    def dense(a_bf16, w_ref, b_ref):
        # bf16 x bf16 -> f32 accumulate on the MXU, f32 bias add on the VPU.
        return jnp.dot(a_bf16, w_ref[...],
                       preferred_element_type=jnp.float32) + b_ref[...]

    # ---- encoder ----
    x = x_ref[...]                                            # (tb, 896) bf16
    h = jnp.maximum(dense(x, w1, b1), 0.0)                    # (tb, h1) f32
    h = jnp.maximum(dense(h.astype(bf16), w2, b2), 0.0)       # (tb, h2) f32
    ml = dense(h.astype(bf16), w3, b3)                        # (tb, 2*z) f32
    z_dim = mu_ref.shape[-1]
    mu = ml[:, :z_dim]
    log_var = ml[:, z_dim:]

    # ---- sampling (reparameterization): z = eps * exp(0.5*log_var) + mu ----
    std = jnp.exp(0.5 * log_var)
    z = eps_ref[...] * std + mu                               # f32

    # ---- decoder ----
    d = jnp.maximum(dense(z.astype(bf16), w4, b4), 0.0)
    d = jnp.maximum(dense(d.astype(bf16), w5, b5), 0.0)
    logits = dense(d.astype(bf16), w6, b6)                    # (tb, 896) f32
    # sigmoid via EUP exp + approx EUP reciprocal (keeps it off the VALU slots)
    recon_ref[...] = pl.reciprocal(1.0 + jnp.exp(-logits), approx=True)

    mu_ref[...] = mu
    logvar_ref[...] = log_var


def vae_forward(x_img, eps, params, *, batch_tile=128):
    """x_img: (B, 1, 28, 28) float32 (NCHW).  eps: (B, z_dim) float32."""
    (w1, b1), (w2, b2), (w31, b31), (w32, b32), (w4, b4), (w5, b5), (w6, b6) = params

    x = x_img.reshape(-1, X_DIM)                # torch: x.view(-1, 784)
    B = x.shape[0]
    h1 = w1.shape[1]
    h2 = w2.shape[1]
    z_dim = w31.shape[1]

    # On v7x keep tb <= B/2 so both TensorCores get grid steps.
    tb = min(batch_tile, B)
    assert B % tb == 0 and tb % 8 == 0

    bf16 = jnp.bfloat16
    # One-time layout plumbing (outside the kernel): lane-pad 784 -> 896 and
    # cast MXU operands to bf16.  Padded x columns / w1 rows are zero (inert);
    # padded w6/b6 output columns are zero and sliced off after the call.
    x_p = jnp.pad(x, ((0, 0), (0, X_PAD - X_DIM))).astype(bf16)
    w1_p = jnp.pad(w1, ((0, X_PAD - X_DIM), (0, 0))).astype(bf16)
    w6_p = jnp.pad(w6, ((0, 0), (0, X_PAD - X_DIM))).astype(bf16)
    b6_p = jnp.pad(b6, ((0, 0), (0, X_PAD - X_DIM)))
    # Fuse the mu / log_var projections into one (h2, 2*z) matmul.
    w3 = jnp.concatenate([w31, w32], axis=1).astype(bf16)
    b3 = jnp.concatenate([b31, b32], axis=1)

    weight_args = (w1_p, b1, w2.astype(bf16), b2, w3, b3,
                   w4.astype(bf16), b4, w5.astype(bf16), b5, w6_p, b6_p)

    def batch_spec(feat):
        return pl.BlockSpec((tb, feat), lambda i: (i, 0))

    def full_spec(shape):
        # Constant block index across the grid -> Pallas DMAs the block once.
        return pl.BlockSpec(shape, lambda i: (0,) * len(shape))

    weight_specs = [full_spec(w.shape) for w in weight_args]

    out_shapes = (
        jax.ShapeDtypeStruct((B, X_PAD), jnp.float32),   # reconstruction (padded)
        jax.ShapeDtypeStruct((B, z_dim), jnp.float32),   # mu
        jax.ShapeDtypeStruct((B, z_dim), jnp.float32),   # log_var
    )
    out_specs = (batch_spec(X_PAD), batch_spec(z_dim), batch_spec(z_dim))

    flops = 2 * B * (X_PAD * h1 + h1 * h2 + h2 * (2 * z_dim)
                     + z_dim * h2 + h2 * h1 + h1 * X_PAD)
    transcendentals = B * (z_dim + 2 * X_PAD)
    bytes_accessed = (int(x_p.size) * x_p.dtype.itemsize
                      + int(eps.size) * eps.dtype.itemsize
                      + sum(int(w.size) * w.dtype.itemsize for w in weight_args)
                      + B * X_PAD * 4 + 2 * B * z_dim * 4)

    fn = pl.pallas_call(
        vae_kernel,
        out_shape=out_shapes,
        grid_spec=pltpu.PrefetchScalarGridSpec(
            num_scalar_prefetch=0,
            grid=(B // tb,),
            in_specs=[batch_spec(X_PAD), batch_spec(z_dim)] + weight_specs,
            out_specs=out_specs,
        ),
        compiler_params=pltpu.CompilerParams(
            dimension_semantics=("parallel",)),
        cost_estimate=pl.CostEstimate(flops=flops,
                                      transcendentals=transcendentals,
                                      bytes_accessed=bytes_accessed),
    )
    recon_p, mu, log_var = fn(x_p, eps, *weight_args)
    return recon_p[:, :X_DIM], mu, log_var


def init_linear(key, fan_in, fan_out):
    # Mimics torch.nn.Linear default init: U(-1/sqrt(fan_in), +1/sqrt(fan_in)).
    kw, kb = jax.random.split(key)
    bound = 1.0 / (fan_in ** 0.5)
    w = jax.random.uniform(kw, (fan_in, fan_out), jnp.float32, -bound, bound)  # (in, out)
    b = jax.random.uniform(kb, (1, fan_out), jnp.float32, -bound, bound)       # kept 2-D for TPU
    return w, b


if __name__ == "__main__":
    # x_dim is fixed to 784 by x.view(-1, 784); B=256 gives a 2-step grid at
    # the default batch_tile=128 (both v7x TensorCores get work).
    B, x_dim, h_dim1, h_dim2, z_dim = 256, 784, 256, 128, 32

    root = jax.random.PRNGKey(0)
    keys = jax.random.split(root, 9)

    params = (
        init_linear(keys[0], x_dim, h_dim1),    # fc1
        init_linear(keys[1], h_dim1, h_dim2),   # fc2
        init_linear(keys[2], h_dim2, z_dim),    # fc31 (mu)
        init_linear(keys[3], h_dim2, z_dim),    # fc32 (log_var)
        init_linear(keys[4], z_dim, h_dim2),    # fc4
        init_linear(keys[5], h_dim2, h_dim1),   # fc5
        init_linear(keys[6], h_dim1, x_dim),    # fc6
    )

    x_img = jax.random.uniform(keys[7], (B, 1, 28, 28), jnp.float32)  # NCHW input
    # torch.randn_like(std) drawn outside the kernel so the forward is deterministic.
    eps = jax.random.normal(keys[8], (B, z_dim), jnp.float32)

    recon, mu, log_var = vae_forward(x_img, eps, params, batch_tile=128)
    jax.block_until_ready((recon, mu, log_var))

    # Pure-JAX reference with the same bf16-at-the-MXU / f32-accumulate recipe.
    def ref_forward(x_img, eps, params):
        bf16 = jnp.bfloat16
        (w1, b1), (w2, b2), (w31, b31), (w32, b32), (w4, b4), (w5, b5), (w6, b6) = params

        def lin(a, w, b):
            return jnp.dot(a.astype(bf16), w.astype(bf16),
                           preferred_element_type=jnp.float32) + b

        x = x_img.reshape(-1, 784)
        h = jax.nn.relu(lin(x, w1, b1))
        h = jax.nn.relu(lin(h, w2, b2))
        mu = lin(h, w31, b31)
        lv = lin(h, w32, b32)
        z = eps * jnp.exp(0.5 * lv) + mu
        d = jax.nn.relu(lin(z, w4, b4))
        d = jax.nn.relu(lin(d, w5, b5))
        return jax.nn.sigmoid(lin(d, w6, b6)), mu, lv

    r_ref, mu_r, lv_r = ref_forward(x_img, eps, params)
    assert recon.shape == (B, x_dim)
    # Tolerances account for bf16 re-rounding of intermediates and the in-kernel
    # approx EUP reciprocal used for the final sigmoid.
    assert jnp.allclose(mu, mu_r, atol=2e-3, rtol=2e-3)
    assert jnp.allclose(log_var, lv_r, atol=2e-3, rtol=2e-3)
    assert jnp.allclose(recon, r_ref, atol=1e-2)

    print("KERNEL_OK")
</pallas_src>

<mosaic_0001>
module attributes {stable_mosaic.version = 11 : i64} {
  func.func @vae_kernel(%arg0: i32, %arg1: memref<128x896xbf16, #tpu.memory_space<vmem>>, %arg2: memref<128x32xf32, #tpu.memory_space<vmem>>, %arg3: memref<896x256xbf16, #tpu.memory_space<vmem>>, %arg4: memref<1x256xf32, #tpu.memory_space<vmem>>, %arg5: memref<256x128xbf16, #tpu.memory_space<vmem>>, %arg6: memref<1x128xf32, #tpu.memory_space<vmem>>, %arg7: memref<128x64xbf16, #tpu.memory_space<vmem>>, %arg8: memref<1x64xf32, #tpu.memory_space<vmem>>, %arg9: memref<32x128xbf16, #tpu.memory_space<vmem>>, %arg10: memref<1x128xf32, #tpu.memory_space<vmem>>, %arg11: memref<128x256xbf16, #tpu.memory_space<vmem>>, %arg12: memref<1x256xf32, #tpu.memory_space<vmem>>, %arg13: memref<256x896xbf16, #tpu.memory_space<vmem>>, %arg14: memref<1x896xf32, #tpu.memory_space<vmem>>, %arg15: memref<128x896xf32, #tpu.memory_space<vmem>>, %arg16: memref<128x32xf32, #tpu.memory_space<vmem>>, %arg17: memref<128x32xf32, #tpu.memory_space<vmem>>) attributes {dimension_semantics = [#tpu.dimension_semantics<parallel>], iteration_bounds = array<i64: 2>, scalar_prefetch = 0 : i64, scratch_operands = 0 : i64, tpu.core_type = #tpu.core_type<tc>, window_params = [{transform_indices = @transform_0, window_bounds = array<i64: 128, 896>}, {transform_indices = @transform_1, window_bounds = array<i64: 128, 32>}, {pipeline_mode = #tpu.pipeline_mode<synchronous>, transform_indices = @transform_2, window_bounds = array<i64: 896, 256>}, {pipeline_mode = #tpu.pipeline_mode<synchronous>, transform_indices = @transform_3, window_bounds = array<i64: 1, 256>}, {pipeline_mode = #tpu.pipeline_mode<synchronous>, transform_indices = @transform_4, window_bounds = array<i64: 256, 128>}, {pipeline_mode = #tpu.pipeline_mode<synchronous>, transform_indices = @transform_5, window_bounds = array<i64: 1, 128>}, {pipeline_mode = #tpu.pipeline_mode<synchronous>, transform_indices = @transform_6, window_bounds = array<i64: 128, 64>}, {pipeline_mode = #tpu.pipeline_mode<synchronous>, transform_indices = @transform_7, window_bounds = array<i64: 1, 64>}, {pipeline_mode = #tpu.pipeline_mode<synchronous>, transform_indices = @transform_8, window_bounds = array<i64: 32, 128>}, {pipeline_mode = #tpu.pipeline_mode<synchronous>, transform_indices = @transform_9, window_bounds = array<i64: 1, 128>}, {pipeline_mode = #tpu.pipeline_mode<synchronous>, transform_indices = @transform_10, window_bounds = array<i64: 128, 256>}, {pipeline_mode = #tpu.pipeline_mode<synchronous>, transform_indices = @transform_11, window_bounds = array<i64: 1, 256>}, {pipeline_mode = #tpu.pipeline_mode<synchronous>, transform_indices = @transform_12, window_bounds = array<i64: 256, 896>}, {pipeline_mode = #tpu.pipeline_mode<synchronous>, transform_indices = @transform_13, window_bounds = array<i64: 1, 896>}, {transform_indices = @transform_14, window_bounds = array<i64: 128, 896>}, {transform_indices = @transform_15, window_bounds = array<i64: 128, 32>}, {transform_indices = @transform_16, window_bounds = array<i64: 128, 32>}]} {
    %c0 = arith.constant 0 : index
    %c0_0 = arith.constant 0 : index
    %0 = vector.load %arg1[%c0, %c0_0] : memref<128x896xbf16, #tpu.memory_space<vmem>>, vector<128x896xbf16>
    %c0_1 = arith.constant 0 : index
    %c0_2 = arith.constant 0 : index
    %1 = vector.load %arg3[%c0_1, %c0_2] : memref<896x256xbf16, #tpu.memory_space<vmem>>, vector<896x256xbf16>
    %cst = arith.constant dense<0.000000e+00> : vector<128x256xf32>
    %2 = tpu.matmul %0, %1, %cst {dimension_numbers = #tpu.dot_dimension_numbers<[1], [0], [0], [1], [0, 0, 1, 1], [], []>} : vector<128x896xbf16>, vector<896x256xbf16>, vector<128x256xf32> -> vector<128x256xf32>
    %c0_3 = arith.constant 0 : index
    %c0_4 = arith.constant 0 : index
    %3 = vector.load %arg4[%c0_3, %c0_4] : memref<1x256xf32, #tpu.memory_space<vmem>>, vector<1x256xf32>
    %4 = vector.broadcast %3 : vector<1x256xf32> to vector<128x256xf32>
    %5 = arith.addf %2, %4 : vector<128x256xf32>
    %cst_5 = arith.constant 0.000000e+00 : f32
    %6 = vector.broadcast %cst_5 : f32 to vector<128x256xf32>
    %7 = arith.maximumf %5, %6 : vector<128x256xf32>
    %8 = arith.truncf %7 : vector<128x256xf32> to vector<128x256xbf16>
    %c0_6 = arith.constant 0 : index
    %c0_7 = arith.constant 0 : index
    %9 = vector.load %arg5[%c0_6, %c0_7] : memref<256x128xbf16, #tpu.memory_space<vmem>>, vector<256x128xbf16>
    %cst_8 = arith.constant dense<0.000000e+00> : vector<128x128xf32>
    %10 = tpu.matmul %8, %9, %cst_8 {dimension_numbers = #tpu.dot_dimension_numbers<[1], [0], [0], [1], [0, 0, 1, 1], [], []>} : vector<128x256xbf16>, vector<256x128xbf16>, vector<128x128xf32> -> vector<128x128xf32>
    %c0_9 = arith.constant 0 : index
    %c0_10 = arith.constant 0 : index
    %11 = vector.load %arg6[%c0_9, %c0_10] : memref<1x128xf32, #tpu.memory_space<vmem>>, vector<1x128xf32>
    %12 = vector.broadcast %11 : vector<1x128xf32> to vector<128x128xf32>
    %13 = arith.addf %10, %12 : vector<128x128xf32>
    %cst_11 = arith.constant 0.000000e+00 : f32
    %14 = vector.broadcast %cst_11 : f32 to vector<128x128xf32>
    %15 = arith.maximumf %13, %14 : vector<128x128xf32>
    %16 = arith.truncf %15 : vector<128x128xf32> to vector<128x128xbf16>
    %c0_12 = arith.constant 0 : index
    %c0_13 = arith.constant 0 : index
    %17 = vector.load %arg7[%c0_12, %c0_13] : memref<128x64xbf16, #tpu.memory_space<vmem>>, vector<128x64xbf16>
    %cst_14 = arith.constant dense<0.000000e+00> : vector<128x64xf32>
    %18 = tpu.matmul %16, %17, %cst_14 {dimension_numbers = #tpu.dot_dimension_numbers<[1], [0], [0], [1], [0, 0, 1, 1], [], []>} : vector<128x128xbf16>, vector<128x64xbf16>, vector<128x64xf32> -> vector<128x64xf32>
    %c0_15 = arith.constant 0 : index
    %c0_16 = arith.constant 0 : index
    %19 = vector.load %arg8[%c0_15, %c0_16] : memref<1x64xf32, #tpu.memory_space<vmem>>, vector<1x64xf32>
    %20 = vector.broadcast %19 : vector<1x64xf32> to vector<128x64xf32>
    %21 = arith.addf %18, %20 : vector<128x64xf32>
    %22 = vector.extract_strided_slice %21 {offsets = [0, 0], sizes = [128, 32], strides = [1, 1]} : vector<128x64xf32> to vector<128x32xf32>
    %23 = vector.extract_strided_slice %21 {offsets = [0, 32], sizes = [128, 32], strides = [1, 1]} : vector<128x64xf32> to vector<128x32xf32>
    %cst_17 = arith.constant 5.000000e-01 : f32
    %24 = vector.broadcast %cst_17 : f32 to vector<128x32xf32>
    %25 = arith.mulf %24, %23 : vector<128x32xf32>
    %26 = math.exp %25 : vector<128x32xf32>
    %c0_18 = arith.constant 0 : index
    %c0_19 = arith.constant 0 : index
    %27 = vector.load %arg2[%c0_18, %c0_19] : memref<128x32xf32, #tpu.memory_space<vmem>>, vector<128x32xf32>
    %28 = arith.mulf %27, %26 : vector<128x32xf32>
    %29 = arith.addf %28, %22 : vector<128x32xf32>
    %30 = arith.truncf %29 : vector<128x32xf32> to vector<128x32xbf16>
    %c0_20 = arith.constant 0 : index
    %c0_21 = arith.constant 0 : index
    %31 = vector.load %arg9[%c0_20, %c0_21] : memref<32x128xbf16, #tpu.memory_space<vmem>>, vector<32x128xbf16>
    %cst_22 = arith.constant dense<0.000000e+00> : vector<128x128xf32>
    %32 = tpu.matmul %30, %31, %cst_22 {dimension_numbers = #tpu.dot_dimension_numbers<[1], [0], [0], [1], [0, 0, 1, 1], [], []>} : vector<128x32xbf16>, vector<32x128xbf16>, vector<128x128xf32> -> vector<128x128xf32>
    %c0_23 = arith.constant 0 : index
    %c0_24 = arith.constant 0 : index
    %33 = vector.load %arg10[%c0_23, %c0_24] : memref<1x128xf32, #tpu.memory_space<vmem>>, vector<1x128xf32>
    %34 = vector.broadcast %33 : vector<1x128xf32> to vector<128x128xf32>
    %35 = arith.addf %32, %34 : vector<128x128xf32>
    %cst_25 = arith.constant 0.000000e+00 : f32
    %36 = vector.broadcast %cst_25 : f32 to vector<128x128xf32>
    %37 = arith.maximumf %35, %36 : vector<128x128xf32>
    %38 = arith.truncf %37 : vector<128x128xf32> to vector<128x128xbf16>
    %c0_26 = arith.constant 0 : index
    %c0_27 = arith.constant 0 : index
    %39 = vector.load %arg11[%c0_26, %c0_27] : memref<128x256xbf16, #tpu.memory_space<vmem>>, vector<128x256xbf16>
    %cst_28 = arith.constant dense<0.000000e+00> : vector<128x256xf32>
    %40 = tpu.matmul %38, %39, %cst_28 {dimension_numbers = #tpu.dot_dimension_numbers<[1], [0], [0], [1], [0, 0, 1, 1], [], []>} : vector<128x128xbf16>, vector<128x256xbf16>, vector<128x256xf32> -> vector<128x256xf32>
    %c0_29 = arith.constant 0 : index
    %c0_30 = arith.constant 0 : index
    %41 = vector.load %arg12[%c0_29, %c0_30] : memref<1x256xf32, #tpu.memory_space<vmem>>, vector<1x256xf32>
    %42 = vector.broadcast %41 : vector<1x256xf32> to vector<128x256xf32>
    %43 = arith.addf %40, %42 : vector<128x256xf32>
    %cst_31 = arith.constant 0.000000e+00 : f32
    %44 = vector.broadcast %cst_31 : f32 to vector<128x256xf32>
    %45 = arith.maximumf %43, %44 : vector<128x256xf32>
    %46 = arith.truncf %45 : vector<128x256xf32> to vector<128x256xbf16>
    %c0_32 = arith.constant 0 : index
    %c0_33 = arith.constant 0 : index
    %47 = vector.load %arg13[%c0_32, %c0_33] : memref<256x896xbf16, #tpu.memory_space<vmem>>, vector<256x896xbf16>
    %cst_34 = arith.constant dense<0.000000e+00> : vector<128x896xf32>
    %48 = tpu.matmul %46, %47, %cst_34 {dimension_numbers = #tpu.dot_dimension_numbers<[1], [0], [0], [1], [0, 0, 1, 1], [], []>} : vector<128x256xbf16>, vector<256x896xbf16>, vector<128x896xf32> -> vector<128x896xf32>
    %c0_35 = arith.constant 0 : index
    %c0_36 = arith.constant 0 : index
    %49 = vector.load %arg14[%c0_35, %c0_36] : memref<1x896xf32, #tpu.memory_space<vmem>>, vector<1x896xf32>
    %50 = vector.broadcast %49 : vector<1x896xf32> to vector<128x896xf32>
    %51 = arith.addf %48, %50 : vector<128x896xf32>
    %cst_37 = arith.constant 0.000000e+00 : f32
    %52 = vector.broadcast %cst_37 : f32 to vector<128x896xf32>
    %53 = arith.subf %52, %51 : vector<128x896xf32>
    %54 = math.exp %53 : vector<128x896xf32>
    %cst_38 = arith.constant 1.000000e+00 : f32
    %55 = vector.broadcast %cst_38 : f32 to vector<128x896xf32>
    %56 = arith.addf %55, %54 : vector<128x896xf32>
    %57 = tpu.reciprocal %56 {approx = true} : vector<128x896xf32> -> vector<128x896xf32>
    %c0_39 = arith.constant 0 : index
    %c0_40 = arith.constant 0 : index
    %58 = vector.load %arg15[%c0_39, %c0_40] : memref<128x896xf32, #tpu.memory_space<vmem>>, vector<128x896xf32>
    tpu.vector_store %arg15[%c0_39, %c0_40], %57 {strides = array<i32>} : memref<128x896xf32, #tpu.memory_space<vmem>>, vector<128x896xf32>,
    %c0_41 = arith.constant 0 : index
    %c0_42 = arith.constant 0 : index
    %59 = vector.load %arg16[%c0_41, %c0_42] : memref<128x32xf32, #tpu.memory_space<vmem>>, vector<128x32xf32>
    tpu.vector_store %arg16[%c0_41, %c0_42], %22 {strides = array<i32>} : memref<128x32xf32, #tpu.memory_space<vmem>>, vector<128x32xf32>,
    %c0_43 = arith.constant 0 : index
    %c0_44 = arith.constant 0 : index
    %60 = vector.load %arg17[%c0_43, %c0_44] : memref<128x32xf32, #tpu.memory_space<vmem>>, vector<128x32xf32>
    tpu.vector_store %arg17[%c0_43, %c0_44], %23 {strides = array<i32>} : memref<128x32xf32, #tpu.memory_space<vmem>>, vector<128x32xf32>,
    return
  }
  func.func @transform_0(%arg0: i32) -> (i32, i32) {
    %c0_i32 = arith.constant 0 : i32
    %c0_i32_0 = arith.constant 0 : i32
    return %arg0, %c0_i32 : i32, i32
  }
  func.func @transform_1(%arg0: i32) -> (i32, i32) {
    %c0_i32 = arith.constant 0 : i32
    %c0_i32_0 = arith.constant 0 : i32
    return %arg0, %c0_i32 : i32, i32
  }
  func.func @transform_2(%arg0: i32) -> (i32, i32) {
    %c0_i32 = arith.constant 0 : i32
    %c0_i32_0 = arith.constant 0 : i32
    %c0_i32_1 = arith.constant 0 : i32
    return %c0_i32, %c0_i32_0 : i32, i32
  }
  func.func @transform_3(%arg0: i32) -> (i32, i32) {
    %c0_i32 = arith.constant 0 : i32
    %c0_i32_0 = arith.constant 0 : i32
    %c0_i32_1 = arith.constant 0 : i32
    return %c0_i32, %c0_i32_0 : i32, i32
  }
  func.func @transform_4(%arg0: i32) -> (i32, i32) {
    %c0_i32 = arith.constant 0 : i32
    %c0_i32_0 = arith.constant 0 : i32
    %c0_i32_1 = arith.constant 0 : i32
    return %c0_i32, %c0_i32_0 : i32, i32
  }
  func.func @transform_5(%arg0: i32) -> (i32, i32) {
    %c0_i32 = arith.constant 0 : i32
    %c0_i32_0 = arith.constant 0 : i32
    %c0_i32_1 = arith.constant 0 : i32
    return %c0_i32, %c0_i32_0 : i32, i32
  }
  func.func @transform_6(%arg0: i32) -> (i32, i32) {
    %c0_i32 = arith.constant 0 : i32
    %c0_i32_0 = arith.constant 0 : i32
    %c0_i32_1 = arith.constant 0 : i32
    return %c0_i32, %c0_i32_0 : i32, i32
  }
  func.func @transform_7(%arg0: i32) -> (i32, i32) {
    %c0_i32 = arith.constant 0 : i32
    %c0_i32_0 = arith.constant 0 : i32
    %c0_i32_1 = arith.constant 0 : i32
    return %c0_i32, %c0_i32_0 : i32, i32
  }
  func.func @transform_8(%arg0: i32) -> (i32, i32) {
    %c0_i32 = arith.constant 0 : i32
    %c0_i32_0 = arith.constant 0 : i32
    %c0_i32_1 = arith.constant 0 : i32
    return %c0_i32, %c0_i32_0 : i32, i32
  }
  func.func @transform_9(%arg0: i32) -> (i32, i32) {
    %c0_i32 = arith.constant 0 : i32
    %c0_i32_0 = arith.constant 0 : i32
    %c0_i32_1 = arith.constant 0 : i32
    return %c0_i32, %c0_i32_0 : i32, i32
  }
  func.func @transform_10(%arg0: i32) -> (i32, i32) {
    %c0_i32 = arith.constant 0 : i32
    %c0_i32_0 = arith.constant 0 : i32
    %c0_i32_1 = arith.constant 0 : i32
    return %c0_i32, %c0_i32_0 : i32, i32
  }
  func.func @transform_11(%arg0: i32) -> (i32, i32) {
    %c0_i32 = arith.constant 0 : i32
    %c0_i32_0 = arith.constant 0 : i32
    %c0_i32_1 = arith.constant 0 : i32
    return %c0_i32, %c0_i32_0 : i32, i32
  }
  func.func @transform_12(%arg0: i32) -> (i32, i32) {
    %c0_i32 = arith.constant 0 : i32
    %c0_i32_0 = arith.constant 0 : i32
    %c0_i32_1 = arith.constant 0 : i32
    return %c0_i32, %c0_i32_0 : i32, i32
  }
  func.func @transform_13(%arg0: i32) -> (i32, i32) {
    %c0_i32 = arith.constant 0 : i32
    %c0_i32_0 = arith.constant 0 : i32
    %c0_i32_1 = arith.constant 0 : i32
    return %c0_i32, %c0_i32_0 : i32, i32
  }
  func.func @transform_14(%arg0: i32) -> (i32, i32) {
    %c0_i32 = arith.constant 0 : i32
    %c0_i32_0 = arith.constant 0 : i32
    return %arg0, %c0_i32 : i32, i32
  }
  func.func @transform_15(%arg0: i32) -> (i32, i32) {
    %c0_i32 = arith.constant 0 : i32
    %c0_i32_0 = arith.constant 0 : i32
    return %arg0, %c0_i32 : i32, i32
  }
  func.func @transform_16(%arg0: i32) -> (i32, i32) {
    %c0_i32 = arith.constant 0 : i32
    %c0_i32_0 = arith.constant 0 : i32
    return %arg0, %c0_i32 : i32, i32
  }
}

</mosaic_0001>

<bundles_post_ra>
// kernel: tpu_custom_call.1
= control target key start
LH: loop header
LB: loop body
LE: loop exit
PB: predicated region body
PF: predicated region fallthrough
CT: control target
= control target key end

     0   :  { %s8824_s0 = inlined_call_operand.hbm [shape: bf16[256,896], index: 0, kind: input, shape index: {}]   ;;  %s8825_s1 = inlined_call_operand.vmem [shape: f32[256,32], index: 1, kind: input, shape index: {}]   ;;  %s8826_s2 = inlined_call_operand.hbm [shape: bf16[896,256], index: 2, kind: input, shape index: {}]   ;;  %s8827_s3 = inlined_call_operand.vmem [shape: f32[1,256], index: 3, kind: input, shape index: {}]   ;;  %s8828_s4 = inlined_call_operand.vmem [shape: bf16[256,128], index: 4, kind: input, shape index: {}]   ;;  %s8829_s5 = inlined_call_operand.vmem [shape: f32[1,128], index: 5, kind: input, shape index: {}]   ;;  %s8830_s6 = inlined_call_operand.vmem [shape: bf16[128,64], index: 6, kind: input, shape index: {}]   ;;  %s8831_s7 = inlined_call_operand.vmem [shape: f32[1,64], index: 7, kind: input, shape index: {}]   ;;  %s8832_s8 = inlined_call_operand.vmem [shape: bf16[32,128], index: 8, kind: input, shape index: {}]   ;;  %s8833_s9 = inlined_call_operand.vmem [shape: f32[1,128], index: 9, kind: input, shape index: {}]   ;;  %s8834_s10 = inlined_call_operand.vmem [shape: bf16[128,256], index: 10, kind: input, shape index: {}]   ;;  %s8835_s11 = inlined_call_operand.vmem [shape: f32[1,256], index: 11, kind: input, shape index: {}]   ;;  %s8836_s12 = inlined_call_operand.hbm [shape: bf16[256,896], index: 12, kind: input, shape index: {}]   ;;  %s8837_s13 = inlined_call_operand.vmem [shape: f32[1,896], index: 13, kind: input, shape index: {}]   ;;  %s8838_s14 = inlined_call_operand.hbm [shape: f32[256,896], index: 14, kind: output, shape index: {0}]   ;;  %s8839_s15 = inlined_call_operand.vmem [shape: f32[256,32], index: 15, kind: output, shape index: {1}]   ;;  %s8840_s16 = inlined_call_operand.vmem [shape: f32[256,32], index: 16, kind: output, shape index: {2}]  }
   0x1   :  { %8851 = sst [smem:[#allocation15_spill]] %s8824_s0 }
   0x2   :  { %8852 = sst [smem:[#allocation16_spill]] %s8826_s2 }
   0x3   :  { %8853 = sst [smem:[#allocation17_spill]] %s8833_s9 }
   0x4   :  { %8854 = sst [smem:[#allocation18_spill]] %s8835_s11 }
   0x5   :  { %8855 = sst [smem:[#allocation19_spill]] %s8836_s12 }
   0x6   :  { %8856 = sst [smem:[#allocation20_spill]] %s8837_s13 }
   0x7   :  { %8857 = sst [smem:[#allocation21_spill]] %s8838_s14 }
   0x8   :  { %8858 = sst [smem:[#allocation22_spill]] %s8840_s16 }
   0x9   :  { %22 = vsyncpa [#allocation3], 0 }
   0xa   :  { %24 = vsyncpa [#allocation3 + $0x1], 0 }
   0xb   :  { %25 = vsyncpa [#allocation6], 0 }
   0xc   :  { %26 = vsyncpa [#allocation4], 0 }
   0xd   :  { %28 = vsyncpa [#allocation4 + $0x1], 0  ;;  %s7299_s21 = smov 0   ;;  %s7301_s22 = smov 0  }
   0xe   :  { %s7303_s23 = smov 0   ;;  %s7305_s24 = smov 0  }
   0xf LB: > { %8859 = sst [smem:[#allocation12_spill]] %s7188_s21  ;;  %s7320_s25 = sadd.s32 4294967295, %s7200_s24   ;;  %s7200_s24 = sphi %s7305_s24, %s8891_s24   ;;  %s7196_s23 = sphi %s7303_s23, %s8890_s23   ;;  %s7192_s22 = sphi %s7301_s22, %s8889_s22   ;;  %s7188_s21 = sphi %s7299_s21, %s8888_s21  }
  0x10   : > { %s5320_s26 = sadd.s32 4294967294, %s7200_s24   ;;  %p54_p0 = scmp.ne.s32.totalorder %s7192_s22, %s7188_s21 }
  0x11   : > { %p8846_p1 = scmp.eq.s32.totalorder %s7320_s25, 0  ;;  %p362_p3 = scmp.eq.s32.totalorder %s5320_s26, 1 }
  0x12   : > { %p5321_p5 = scmp.ge.s32.totalorder %s7200_s24, 1  ;;  %p421_p7 = scmp.lt.s32.totalorder %s7200_s24, 3 }
  0x13   : > { %p7329_p4 = por %p8846_p1, %p54_p0  ;;  %p7334_p6 = por %p362_p3, %p54_p0 }
  0x14   : > { %p7339_p8 = pnand %p5321_p5, %p421_p7  ;;  %s7202_s30 = smov [#allocation5]  }
  0x15   : > { %s8860_s27 = scalar_select %p7329_p4, 1, 0 }
  0x16   : > { %s8861_s28 = scalar_select %p7334_p6, 1, 0 }
  0x17   : > { %s433_s0 = sshll.u32 %s7202_s30, 4  ;;  %p6042_p9 = pneg %p7339_p8  ;;  %s7343_s0 = int_to_ptr.vmem [resolvable:$true] %s433_s0 }
  0x18   : > { %8862 = sst [smem:[#allocation13_spill]] %s8861_s28  ;;  %s7203_s18 = smov [#allocation7]  }
  0x19   : > { %p7350_p11 = pnand %p6042_p9, %p8846_p1  ;;  %s473_s19 = sshll.u32 %s7203_s18, 4  ;;  %s7354_s19 = int_to_ptr.vmem [resolvable:$true] %s473_s19 }
  0x1a   : > { %s8865_s2 = sld [smem:[#allocation16_spill]] }
  0x1b   : > { %p7046_p13 = pneg %p7350_p11 }
  0x20   : > { %s7044_s30 = scalar_lea.hbm %s8865_s2, 14336 }
  0x21   : > { %p7045_p12 = scmp.ne.s32.totalorder %s8865_s2, %s7044_s30  ;;  %p7051_p5 = scmp.lt.u32.totalorder %s7044_s30, %s8865_s2 }
  0x23   : > { %p7047_p0 = pnand %p7046_p13, %p7045_p12 }
  0x25   : > { %p7048_p3 = pneg %p7047_p0 }
  0x27   : > { %p7053_p7 = pnand %p7051_p5, %p7048_p3 }
  0x29   : > { %7056 = shalt.err (!%p7053_p7)
}
  0x2a   : > { %s7057_s18 = scalar_lea.vmem %s7343_s0, 14336  ;;  %p7065_p2 = scmp.lt.s32.totalorder %s7343_s0, %s7343_s0 }
  0x2b   : > { %p7058_p9 = scmp.ne.s32.totalorder %s7343_s0, %s7057_s18  ;;  %p7066_p12 = scmp.lt.s32.totalorder %s7057_s18, %s7057_s18 }
  0x2d   : > { %p7060_p10 = pnand %p7058_p9, %p7046_p13  ;;  %p7067_p0 = por %p7066_p12, %p7065_p2 }
  0x2f   : > { %p7061_p1 = pneg %p7060_p10 }
  0x31   : > { %p7068_p6 = pnand %p7067_p0, %p7061_p1 }
  0x33   : > { %7071 = shalt.err (!%p7068_p6)
}
  0x34   : > { %s7204_s13 = smov 128   ;;  %s7205_s14 = smov 8  }
  0x35   : > { %6045 = dma.hbm_to_vmem [thread:$0]  (!%p7350_p11), %s8865_s2, 14336, %s7343_s0, [#allocation6], %s7204_s13, %s7204_s13, %s7205_s14  }
  0x36   : > { %s8866_s12 = sld [smem:[#allocation19_spill]] }
  0x3c   : > { %s7072_s30 = scalar_lea.hbm %s8866_s12, 14336 }
  0x3d   : > { %p7073_p2 = scmp.ne.s32.totalorder %s8866_s12, %s7072_s30  ;;  %p7079_p10 = scmp.lt.u32.totalorder %s7072_s30, %s8866_s12 }
  0x3f   : > { %p7075_p1 = pnand %p7073_p2, %p7046_p13 }
  0x41   : > { %p7076_p6 = pneg %p7075_p1 }
  0x43   : > { %p7081_p3 = pnand %p7079_p10, %p7076_p6 }
  0x45   : > { %7084 = shalt.err (!%p7081_p3)
}
  0x46   : > { %s7085_s0 = scalar_lea.vmem %s7354_s19, 14336  ;;  %p7093_p12 = scmp.lt.s32.totalorder %s7354_s19, %s7354_s19 }
  0x47   : > { %p7086_p5 = scmp.ne.s32.totalorder %s7354_s19, %s7085_s0  ;;  %p7094_p0 = scmp.lt.s32.totalorder %s7085_s0, %s7085_s0 }
  0x49   : > { %p7088_p7 = pnand %p7086_p5, %p7046_p13  ;;  %p7095_p2 = por %p7094_p0, %p7093_p12 }
  0x4b   : > { %p7089_p9 = pneg %p7088_p7 }
  0x4d   : > { %p7096_p1 = pnand %p7095_p2, %p7089_p9 }
  0x4f   : > { %7099 = shalt.err (!%p7096_p1)
}
  0x50   : > { %s8847_s9 = smov 448   ;;  %s8848_s11 = smov 28  }
  0x51   : > { %6048 = dma.hbm_to_vmem [thread:$0]  (!%p7350_p11), %s8866_s12, 14336, %s7354_s19, [#allocation6], %s8847_s9, %s8847_s9, %s8848_s11  }
  0x52   : > { %s7412_s14 = sadd.s32 1, %s7200_s24   ;;  %s41_s28 = sadd.s32 1, %s7196_s23 }
  0x53   : > { %s38_s21 = ssub.s32 %s7200_s24, %s7412_s14  ;;  %p48_p6 = scmp.ne.s32.totalorder %s7196_s23, %s7192_s22 }
  0x54   : > { %p39_p13 = scmp.eq.s32.totalorder %s38_s21, 0  ;;  %p49_p10 = scmp.eq.s32.totalorder %s7200_s24, 0 }
  0x55   : > { %p8868_p5 = scmp.eq.s32.totalorder %s7320_s25, 1  ;;  %p6059_p9 = scmp.lt.s32.totalorder %s7200_s24, 2 }
  0x56   : > { %s7421_s20 = scalar_select %p39_p13, %s7196_s23, %s41_s28  }
  0x57   : > { %p50_p3 = por %p49_p10, %p48_p6  ;;  %p7425_p7 = por %p8868_p5, %p48_p6 }
  0x58   : > { %8867 = sst [smem:[#allocation14_spill]] %s7421_s20  ;;  %s490_s26 = sand.u32 1, %s7196_s23  }
  0x59   : > { %s8869_s17 = scalar_select %p7425_p7, 1, 0 }
  0x5a   : > { %s6025_s30 = smul.u32 448, %s490_s26  ;;  %p7432_p11 = pnand %p6059_p9, %p50_p3 }
  0x5b   : > { %s6026_s19 = smul.u32 7168, %s7200_s24  ;;  %s8871_s13 = sld [smem:[#allocation15_spill]] }
  0x5c   : > { %s494_s28 = scalar_lea.vmem [#allocation2], %s6025_s30  ;;  %s7443_s11 = scalar_lea.sflag [#allocation3], %s490_s26 }
  0x5d   : > { %s502_s9 = sshll.u32 %s494_s28, 4  ;;  %p7102_p0 = pneg %p7432_p11  ;;  %s7441_s9 = int_to_ptr.vmem [resolvable:$true] %s502_s9 }
  0x61   : > { %s7439_s21 = scalar_lea.hbm %s8871_s13, %s6026_s19  ;;  %s7105_s16 = scalar_lea.hbm %s8871_s13, 14336 }
  0x62   : > { %s7100_s2 = scalar_lea.hbm %s7439_s21, 7168  ;;  %p7106_p13 = scmp.lt.u32.totalorder %s7439_s21, %s8871_s13 }
  0x63   : > { %p7101_p12 = scmp.ne.s32.totalorder %s7439_s21, %s7100_s2  ;;  %p7107_p6 = scmp.lt.u32.totalorder %s7105_s16, %s7100_s2 }
  0x64   : > { %p7109_p3 = scmp.lt.u32.totalorder %s7100_s2, %s7439_s21 }
  0x65   : > { %p7103_p2 = pnand %p7102_p0, %p7101_p12  ;;  %p7108_p10 = por %p7107_p6, %p7106_p13 }
  0x67   : > { %p7104_p1 = pneg %p7103_p2  ;;  %p7110_p5 = por %p7109_p3, %p7108_p10 }
  0x69   : > { %p7111_p9 = pnand %p7110_p5, %p7104_p1 }
  0x6b   : > { %7114 = shalt.err (!%p7111_p9)
}
  0x6c   : > { %s7115_s26 = scalar_lea.vmem %s7441_s9, 7168  ;;  %s7208_s30 = smov [#allocation2]  }
  0x6d   : > { %p7116_p12 = scmp.ne.s32.totalorder %s7441_s9, %s7115_s26  ;;  %s7120_s28 = sshll.u32 %s7208_s30, 4  ;;  %s7121_s28 = int_to_ptr.vmem [resolvable:$false] %s7120_s28 }
  0x6e   : > { %s7122_s12 = scalar_lea.vmem %s7121_s28, 14336  ;;  %p7123_p4 = scmp.lt.s32.totalorder %s7441_s9, %s7121_s28 }
  0x6f   : > { %p7118_p2 = pnand %p7116_p12, %p7102_p0  ;;  %p7124_p13 = scmp.lt.s32.totalorder %s7122_s12, %s7115_s26 }
  0x71   : > { %p7119_p7 = pneg %p7118_p2  ;;  %p7125_p6 = por %p7124_p13, %p7123_p4 }
  0x73   : > { %p7126_p10 = pnand %p7125_p6, %p7119_p7 }
  0x75   : > { %7129 = shalt.err (!%p7126_p10)
}
  0x76   : > { %s8872_s2 = smov 28   ;;  %s8873_s20 = smov 448  }
  0x77   : > { %6052 = dma.hbm_to_vmem [thread:$0]  (!%p7432_p11), %s7439_s21, 7168, %s7441_s9, %s7443_s11, %s8873_s20, %s8873_s20, %s8872_s2  }
  0x78   : > { %523 = sbr.rel (%p7339_p8) target bundleno = 2115 (0x843), region = 76  ;;  %s7477_s19 = sand.u32 (!%p7339_p8), 1, %s7192_s22  }
  0x79   : > { %s6027_s0 = smul.u32 (!%p7339_p8), 448, %s7477_s19  ;;  %s526_s16 = scalar_lea.sflag (!%p7339_p8), [#allocation3], %s7477_s19 }
  0x7a   : > { %p8874_p4 = scmp.ne.s32.totalorder (!%p7339_p8), %s8860_s27, 0 }
  0x7b   : > { %s7481_s26 = scalar_lea.vmem (!%p7339_p8), [#allocation2], %s6027_s0 }
  0x7f   : > { %7175 = dma.done.wait (%p8874_p4), %s526_s16, 7168  }
  0x80   : > { %7177 = vsyncadd (%p8874_p4), %s526_s16, 4294960128  ;;  %p8875_p7 = scmp.eq.s32.totalorder %s7320_s25, 0 }
  0x82   : > { %7179 = dma.done.wait (%p8875_p7), [#allocation6], 28672   ;;  %p8876_p8 = pmov %p8875_p7 }
  0x83   : > { %v6105_v0 = vld [vmem:[#allocation5 + $0x4] ss:$8 sps:$4 sm:$0xff]   ;;  %v6107_v1 = vld [vmem:[#allocation5] ss:$8 sps:$4 sm:$0xff]   ;;  %v6108_v2 = vld [vmem:[#allocation5 + $0x14] ss:$8 sps:$4 sm:$0xff]  }
  0x84   : > { %7181 = vsyncadd (%p8876_p8), [#allocation6], 4294938624  ;;  %1658 = vmatprep.subr.bf16.mxu0 %v6105_v0  ;;  %v6110_v3 = vld [vmem:[#allocation5 + $0x10] ss:$8 sps:$4 sm:$0xff]   ;;  %v6111_v4 = vld [vmem:[#allocation5 + $0x24] ss:$8 sps:$4 sm:$0xff]  }
  0x85   : > { %1659 = vmatpush1.bf16.msra.mxu0 %v6107_v1  ;;  %v6113_v5 = vld [vmem:[#allocation5 + $0x20] ss:$8 sps:$4 sm:$0xff]   ;;  %v6114_v6 = vld [vmem:[#allocation5 + $0x34] ss:$8 sps:$4 sm:$0xff]   ;;  %v6116_v7 = vld [vmem:[#allocation5 + $0x30] ss:$8 sps:$4 sm:$0xff]  }
  0x86   : > { %1660 = vmatprep.subr.bf16.mxu0 %v6108_v2  ;;  %v6117_v8 = vld [vmem:[#allocation5 + $0x44] ss:$8 sps:$4 sm:$0xff]   ;;  %v6119_v9 = vld [vmem:[#allocation5 + $0x40] ss:$8 sps:$4 sm:$0xff]   ;;  %v6120_v10 = vld [vmem:[#allocation5 + $0x54] ss:$8 sps:$4 sm:$0xff]  }
  0x87   : > { %v6122_v11 = vld [vmem:[#allocation5 + $0x50] ss:$8 sps:$4 sm:$0xff]   ;;  %v6123_v12 = vld [vmem:[#allocation5 + $0x64] ss:$8 sps:$4 sm:$0xff]   ;;  %v6125_v14 = vld [vmem:[#allocation5 + $0x60] ss:$8 sps:$4 sm:$0xff]  }
  0x88   : > { %v6155_v13 = vld [vmem:[%s7481_s26 + $0x4] ss:$28 sps:$4 sm:$0xff]   ;;  %v6126_v15 = vld [vmem:[#allocation5 + $0x74] ss:$8 sps:$4 sm:$0xff]   ;;  %v6128_v16 = vld [vmem:[#allocation5 + $0x70] ss:$8 sps:$4 sm:$0xff]  }
  0x89   : > { %1661 = vmatpush1.bf16.msra.mxu0 %v6110_v3  ;;  %1690 = vmatprep.mubr.bf16.mxu0 %v6155_v13  ;;  %v6129_v17 = vld [vmem:[#allocation5 + $0x84] ss:$8 sps:$4 sm:$0xff]   ;;  %v6131_v18 = vld [vmem:[#allocation5 + $0x80] ss:$8 sps:$4 sm:$0xff]   ;;  %v6132_v19 = vld [vmem:[#allocation5 + $0x94] ss:$8 sps:$4 sm:$0xff]  }
  0x8a   : > { %1662 = vmatprep.subr.bf16.mxu0 %v6111_v4  ;;  %v6134_v20 = vld [vmem:[#allocation5 + $0x90] ss:$8 sps:$4 sm:$0xff]   ;;  %v6135_v21 = vld [vmem:[#allocation5 + $0xa4] ss:$8 sps:$4 sm:$0xff]   ;;  %v6137_v22 = vld [vmem:[#allocation5 + $0xa0] ss:$8 sps:$4 sm:$0xff]  }
  0x8b   : > { %v6138_v23 = vld [vmem:[#allocation5 + $0xb4] ss:$8 sps:$4 sm:$0xff]   ;;  %v6140_v24 = vld [vmem:[#allocation5 + $0xb0] ss:$8 sps:$4 sm:$0xff]   ;;  %v6141_v25 = vld [vmem:[#allocation5 + $0xc4] ss:$8 sps:$4 sm:$0xff]  }
  0x8c   : > { %v6143_v26 = vld [vmem:[#allocation5 + $0xc0] ss:$8 sps:$4 sm:$0xff]   ;;  %v6144_v27 = vld [vmem:[#allocation5 + $0xd4] ss:$8 sps:$4 sm:$0xff]   ;;  %v6146_v28 = vld [vmem:[#allocation5 + $0xd0] ss:$8 sps:$4 sm:$0xff]  }
  0x8d   : > { %1663 = vmatpush1.bf16.msra.mxu0 %v6113_v5  ;;  %v6147_v29 = vld [vmem:[#allocation5 + $0xe4] ss:$8 sps:$4 sm:$0xff]   ;;  %v6149_v30 = vld [vmem:[#allocation5 + $0xe0] ss:$8 sps:$4 sm:$0xff]   ;;  %v6150_v31 = vld [vmem:[#allocation5 + $0xf4] ss:$8 sps:$4 sm:$0xff]  }
  0x8e   : > { %1664 = vmatprep.subr.bf16.mxu0 %v6114_v6  ;;  %v6152_v32 = vld [vmem:[#allocation5 + $0xf0] ss:$8 sps:$4 sm:$0xff]   ;;  %v6158_v33 = vld [vmem:[#allocation5 + $0x104] ss:$8 sps:$4 sm:$0xff]   ;;  %v6153_v34 = vld [vmem:[%s7481_s26] ss:$28 sps:$4 sm:$0xff]  }
  0x8f   : > { %v6156_v35 = vld [vmem:[#allocation5 + $0x100] ss:$8 sps:$4 sm:$0xff]   ;;  %v6162_v36 = vld [vmem:[%s7481_s26 + $0x3c] ss:$28 sps:$4 sm:$0xff]   ;;  %v6167_v39 = vld [vmem:[#allocation5 + $0x124] ss:$8 sps:$4 sm:$0xff]  }
  0x90   : > { %v6161_v37 = vld [vmem:[#allocation5 + $0x114] ss:$8 sps:$4 sm:$0xff]   ;;  %v6159_v38 = vld [vmem:[#allocation5 + $0x110] ss:$8 sps:$4 sm:$0xff]   ;;  %v6165_v41 = vld [vmem:[#allocation5 + $0x120] ss:$8 sps:$4 sm:$0xff]  }
  0x91   : > { %1665 = vmatpush1.bf16.msra.mxu0 %v6116_v7  ;;  %v6164_v40 = vld [vmem:[%s7481_s26 + $0x38] ss:$28 sps:$4 sm:$0xff]   ;;  %v6176_v45 = vld [vmem:[#allocation5 + $0x144] ss:$8 sps:$4 sm:$0xff]   ;;  %v6174_v47 = vld [vmem:[#allocation5 + $0x140] ss:$8 sps:$4 sm:$0xff]  }
  0x92   : > { %1666 = vmatprep.subr.bf16.mxu0 %v6117_v8  ;;  %v6171_v42 = vld [vmem:[%s7481_s26 + $0x74] ss:$28 sps:$4 sm:$0xff]   ;;  %v6180_v48 = vld [vmem:[%s7481_s26 + $0xac] ss:$28 sps:$4 sm:$0xff]   ;;  %v6189_v54 = vld [vmem:[%s7481_s26 + $0xe4] ss:$28 sps:$4 sm:$0xff]  }
  0x93   : > { %v6170_v43 = vld [vmem:[#allocation5 + $0x134] ss:$8 sps:$4 sm:$0xff]   ;;  %v6168_v44 = vld [vmem:[#allocation5 + $0x130] ss:$8 sps:$4 sm:$0xff]   ;;  %v6185_v51 = vld [vmem:[#allocation5 + $0x164] ss:$8 sps:$4 sm:$0xff]  }
  0x94   : > { %v6173_v46 = vld [vmem:[%s7481_s26 + $0x70] ss:$28 sps:$4 sm:$0xff]   ;;  %v6179_v49 = vld [vmem:[#allocation5 + $0x154] ss:$8 sps:$4 sm:$0xff]   ;;  %v6182_v52 = vld [vmem:[%s7481_s26 + $0xa8] ss:$28 sps:$4 sm:$0xff]  }
  0x95   : > { %1667 = vmatpush1.bf16.msra.mxu0 %v6119_v9  ;;  %v6177_v50 = vld [vmem:[#allocation5 + $0x150] ss:$8 sps:$4 sm:$0xff]   ;;  %v6183_v53 = vld [vmem:[#allocation5 + $0x160] ss:$8 sps:$4 sm:$0xff]   ;;  %v6188_v55 = vld [vmem:[#allocation5 + $0x174] ss:$8 sps:$4 sm:$0xff]  }
  0x96   : > { %1668 = vmatprep.subr.bf16.mxu0 %v6120_v10  ;;  %v6186_v56 = vld [vmem:[#allocation5 + $0x170] ss:$8 sps:$4 sm:$0xff]   ;;  %v6194_v57 = vld [vmem:[#allocation5 + $0x184] ss:$8 sps:$4 sm:$0xff]   ;;  %v6191_v58 = vld [vmem:[%s7481_s26 + $0xe0] ss:$28 sps:$4 sm:$0xff]  }
  0x97   : > { %v6192_v59 = vld [vmem:[#allocation5 + $0x180] ss:$8 sps:$4 sm:$0xff]   ;;  %v6198_v60 = vld [vmem:[%s7481_s26 + $0x11c] ss:$28 sps:$4 sm:$0xff]   ;;  %v6203_v63 = vld [vmem:[#allocation5 + $0x1a4] ss:$8 sps:$4 sm:$0xff]  }
  0x98   : > { %v6197_v61 = vld [vmem:[#allocation5 + $0x194] ss:$8 sps:$4 sm:$0xff]   ;;  %v6195_v62 = vld [vmem:[#allocation5 + $0x190] ss:$8 sps:$4 sm:$0xff]   ;;  %v6201_v1 = vld [vmem:[#allocation5 + $0x1a0] ss:$8 sps:$4 sm:$0xff]  }
  0x99   : > { %1669 = vmatpush1.bf16.msra.mxu0 %v6122_v11  ;;  %v6200_v0 = vld [vmem:[%s7481_s26 + $0x118] ss:$28 sps:$4 sm:$0xff]   ;;  %v6212_v5 = vld [vmem:[#allocation5 + $0x1c4] ss:$8 sps:$4 sm:$0xff]   ;;  %v6210_v7 = vld [vmem:[#allocation5 + $0x1c0] ss:$8 sps:$4 sm:$0xff]  }
  0x9a   : > { %1670 = vmatprep.subr.bf16.mxu0 %v6123_v12  ;;  %v6207_v2 = vld [vmem:[%s7481_s26 + $0x154] ss:$28 sps:$4 sm:$0xff]   ;;  %v6216_v8 = vld [vmem:[%s7481_s26 + $0x18c] ss:$28 sps:$4 sm:$0xff]   ;;  %s5331_s9 = sshll.u32 %s7320_s25, 4  ;;  %vm2773_vm0 = vcmask 261120  }
  0x9b   : > { %v6206_v3 = vld [vmem:[#allocation5 + $0x1b4] ss:$8 sps:$4 sm:$0xff]   ;;  %v6204_v4 = vld [vmem:[#allocation5 + $0x1b0] ss:$8 sps:$4 sm:$0xff]   ;;  %v6221_v11 = vld [vmem:[#allocation5 + $0x1e4] ss:$8 sps:$4 sm:$0xff]  }
  0x9c   : > { %v6209_v6 = vld [vmem:[%s7481_s26 + $0x150] ss:$28 sps:$4 sm:$0xff]   ;;  %v6215_v9 = vld [vmem:[#allocation5 + $0x1d4] ss:$8 sps:$4 sm:$0xff]   ;;  %v6218_v12 = vld [vmem:[%s7481_s26 + $0x188] ss:$28 sps:$4 sm:$0xff]  }
  0x9d   : > { %1671 = vmatpush1.bf16.msra.mxu0 %v6125_v14  ;;  %v6213_v10 = vld [vmem:[#allocation5 + $0x1d0] ss:$8 sps:$4 sm:$0xff]   ;;  %v6219_v13 = vld [vmem:[#allocation5 + $0x1e0] ss:$8 sps:$4 sm:$0xff]   ;;  %p603_p11 = scmp.lt.s32.totalorder %s5331_s9, 31  ;;  %s7210_s12 = smov 96  }
  0x9e   : > { %1672 = vmatprep.subr.bf16.mxu0 %v6126_v15  ;;  %v6227_v14 = vld [vmem:[%s7481_s26 + $0xc] ss:$28 sps:$4 sm:$0xff]   ;;  %v6224_v15 = vld [vmem:[#allocation5 + $0x1f4] ss:$8 sps:$4 sm:$0xff]   ;;  %s8877_s29 = sld [smem:[#allocation22_spill]]  ;;  %s8878_s0 = sld [smem:[#allocation17_spill]] }
  0x9f   : > { %s8893_s9 = smov (!%p603_p11, %s5331_s9), 31  ;;  %s6028_s18 = smul.u32 896, %s7477_s19 }
  0xa0   : > { %s7704_s11 = sshll.u32 %s8893_s9, 3  ;;  %s8881_s16 = sld [smem:[#allocation21_spill]] }
  0xa1   : > { %1673 = vmatpush1.bf16.msra.mxu0 %v6128_v16  ;;  %v6222_v16 = vld [vmem:[#allocation5 + $0x1f0] ss:$8 sps:$4 sm:$0xff]   ;;  %s7715_s28 = scalar_lea.vmem %s8839_s15, %s7704_s11  ;;  %s7884_s27 = scalar_lea.vmem %s8825_s1, %s7704_s11 }
  0xa2   : > { %1674 = vmatprep.subr.bf16.mxu0 %v6129_v17  ;;  %v6230_v17 = vld [vmem:[#allocation5 + $0x204] ss:$8 sps:$4 sm:$0xff]   ;;  %s8280_s21 = scalar_lea.vmem [#allocation8], %s6028_s18  ;;  %p8882_p1 = scmp.ne.s32.totalorder %s8869_s17, 0 }
  0xa3   : > { %s5158_s2 = sshll.u32 %s8280_s21, 4  ;;  %s8778_s2 = int_to_ptr.vmem [resolvable:$true] %s5158_s2 }
  0xa4   : > { %s7959_s9 = scalar_lea.vmem %s8877_s29, %s7704_s11  ;;  %s7211_s11 = smov [#allocation8]  }
  0xa5   : > { %1675 = vmatpush1.bf16.msra.mxu0 %v6131_v18  ;;  %v6225_v18 = vld [vmem:[%s7481_s26 + $0x8] ss:$28 sps:$4 sm:$0xff]  }
  0xa6   : > { %1676 = vmatprep.subr.bf16.mxu0 %v6132_v19  ;;  %v6228_v19 = vld [vmem:[#allocation5 + $0x200] ss:$8 sps:$4 sm:$0xff]  }
  0xa9   : > { %1677 = vmatpush1.bf16.msra.mxu0 %v6134_v20  ;;  %v6234_v20 = vld [vmem:[%s7481_s26 + $0x44] ss:$28 sps:$4 sm:$0xff]  }
  0xaa   : > { %1678 = vmatprep.subr.bf16.mxu0 %v6135_v21  ;;  %v6233_v21 = vld [vmem:[#allocation5 + $0x214] ss:$8 sps:$4 sm:$0xff]  }
  0xad   : > { %1679 = vmatpush1.bf16.msra.mxu0 %v6137_v22  ;;  %v6231_v22 = vld [vmem:[#allocation5 + $0x210] ss:$8 sps:$4 sm:$0xff]  }
  0xae   : > { %1680 = vmatprep.subr.bf16.mxu0 %v6138_v23  ;;  %v6239_v23 = vld [vmem:[#allocation5 + $0x224] ss:$8 sps:$4 sm:$0xff]  }
  0xb1   : > { %1681 = vmatpush1.bf16.msra.mxu0 %v6140_v24  ;;  %v6236_v24 = vld [vmem:[%s7481_s26 + $0x40] ss:$28 sps:$4 sm:$0xff]  }
  0xb2   : > { %1682 = vmatprep.subr.bf16.mxu0 %v6141_v25  ;;  %v6237_v25 = vld [vmem:[#allocation5 + $0x220] ss:$8 sps:$4 sm:$0xff]  }
  0xb5   : > { %1683 = vmatpush1.bf16.msra.mxu0 %v6143_v26  ;;  %v6243_v26 = vld [vmem:[%s7481_s26 + $0x7c] ss:$28 sps:$4 sm:$0xff]  }
  0xb6   : > { %1684 = vmatprep.subr.bf16.mxu0 %v6144_v27  ;;  %v6242_v27 = vld [vmem:[#allocation5 + $0x234] ss:$8 sps:$4 sm:$0xff]  }
  0xb9   : > { %1685 = vmatpush1.bf16.msra.mxu0 %v6146_v28  ;;  %v6240_v28 = vld [vmem:[#allocation5 + $0x230] ss:$8 sps:$4 sm:$0xff]  }
  0xba   : > { %1686 = vmatprep.subr.bf16.mxu0 %v6147_v29  ;;  %v6248_v29 = vld [vmem:[#allocation5 + $0x244] ss:$8 sps:$4 sm:$0xff]  }
  0xbd   : > { %1687 = vmatpush1.bf16.msra.mxu0 %v6149_v30  ;;  %v6245_v30 = vld [vmem:[%s7481_s26 + $0x78] ss:$28 sps:$4 sm:$0xff]  }
  0xbe   : > { %1688 = vmatprep.subr.bf16.mxu0 %v6150_v31  ;;  %v6246_v31 = vld [vmem:[#allocation5 + $0x240] ss:$8 sps:$4 sm:$0xff]  }
  0xc1   : > { %1689 = vmatpush1.bf16.msra.mxu0 %v6152_v32  ;;  %v6252_v32 = vld [vmem:[%s7481_s26 + $0xb4] ss:$28 sps:$4 sm:$0xff]  }
  0xc2   : > { %1771 = vmatprep.subr.bf16.mxu0 %v6158_v33  ;;  %v6251_v33 = vld [vmem:[#allocation5 + $0x254] ss:$8 sps:$4 sm:$0xff]  }
  0xc4   : > { %1691 = vmatmul.mubr.bf16.vlgmr.msra.gmra.mrb[0].mxu0 %v6153_v34  ;;  %v6249_v34 = vld [vmem:[#allocation5 + $0x250] ss:$8 sps:$4 sm:$0xff]  }
  0xc5   : > { %1772 = vmatpush1.bf16.msra.mxu0 %v6156_v35  ;;  %1700 = vmatprep.mubr.bf16.mxu0 %v6162_v36  ;;  %v6257_v35 = vld [vmem:[#allocation5 + $0x264] ss:$8 sps:$4 sm:$0xff]  }
  0xc6   : > { %1773 = vmatprep.subr.bf16.mxu0 %v6161_v37  ;;  %v6254_v36 = vld [vmem:[%s7481_s26 + $0xb0] ss:$28 sps:$4 sm:$0xff]   ;;  %v6255_v37 = vld [vmem:[#allocation5 + $0x260] ss:$8 sps:$4 sm:$0xff]  }
  0xc9   : > { %1774 = vmatpush1.bf16.msra.mxu0 %v6159_v38  ;;  %v6261_v38 = vld [vmem:[%s7481_s26 + $0xec] ss:$28 sps:$4 sm:$0xff]  }
  0xca   : > { %1775 = vmatprep.subr.bf16.mxu0 %v6167_v39  ;;  %v6260_v39 = vld [vmem:[#allocation5 + $0x274] ss:$8 sps:$4 sm:$0xff]  }
  0xcc   : > { %1701 = vmatmul.mubr.bf16.gmra.mrb[4].mxu0 %v6164_v40  ;;  %v6258_v40 = vld [vmem:[#allocation5 + $0x270] ss:$8 sps:$4 sm:$0xff]  }
  0xcd   : > { %1776 = vmatpush1.bf16.msra.mxu0 %v6165_v41  ;;  %1710 = vmatprep.mubr.bf16.mxu0 %v6171_v42  ;;  %v6266_v41 = vld [vmem:[#allocation5 + $0x284] ss:$8 sps:$4 sm:$0xff]  }
  0xce   : > { %1777 = vmatprep.subr.bf16.mxu0 %v6170_v43  ;;  %v6263_v42 = vld [vmem:[%s7481_s26 + $0xe8] ss:$28 sps:$4 sm:$0xff]  }
  0xcf   : > { %v6264_v43 = vld [vmem:[#allocation5 + $0x280] ss:$8 sps:$4 sm:$0xff]  }
  0xd1   : > { %1778 = vmatpush1.bf16.msra.mxu0 %v6168_v44  ;;  %v6270_v44 = vld [vmem:[%s7481_s26 + $0x124] ss:$28 sps:$4 sm:$0xff]  }
  0xd2   : > { %1779 = vmatprep.subr.bf16.mxu0 %v6176_v45  ;;  %v6269_v45 = vld [vmem:[#allocation5 + $0x294] ss:$8 sps:$4 sm:$0xff]  }
  0xd4   : > { %1711 = vmatmul.mubr.bf16.gmra.mrb[8].mxu0 %v6173_v46  ;;  %v6267_v46 = vld [vmem:[#allocation5 + $0x290] ss:$8 sps:$4 sm:$0xff]  }
  0xd5   : > { %1780 = vmatpush1.bf16.msra.mxu0 %v6174_v47  ;;  %1720 = vmatprep.mubr.bf16.mxu0 %v6180_v48  ;;  %v6275_v47 = vld [vmem:[#allocation5 + $0x2a4] ss:$8 sps:$4 sm:$0xff]   ;;  %v6272_v48 = vld [vmem:[%s7481_s26 + $0x120] ss:$28 sps:$4 sm:$0xff]  }
  0xd6   : > { %1781 = vmatprep.subr.bf16.mxu0 %v6179_v49  ;;  %v6273_v49 = vld [vmem:[#allocation5 + $0x2a0] ss:$8 sps:$4 sm:$0xff]  }
  0xd9   : > { %1782 = vmatpush1.bf16.msra.mxu0 %v6177_v50  ;;  %v6279_v50 = vld [vmem:[%s7481_s26 + $0x15c] ss:$28 sps:$4 sm:$0xff]  }
  0xda   : > { %1783 = vmatprep.subr.bf16.mxu0 %v6185_v51  ;;  %v6278_v51 = vld [vmem:[#allocation5 + $0x2b4] ss:$8 sps:$4 sm:$0xff]  }
  0xdc   : > { %1721 = vmatmul.mubr.bf16.gmra.mrb[12].mxu0 %v6182_v52  ;;  %v6276_v52 = vld [vmem:[#allocation5 + $0x2b0] ss:$8 sps:$4 sm:$0xff]  }
  0xdd   : > { %1784 = vmatpush1.bf16.msra.mxu0 %v6183_v53  ;;  %1730 = vmatprep.mubr.bf16.mxu0 %v6189_v54  ;;  %v6284_v53 = vld [vmem:[#allocation5 + $0x2c4] ss:$8 sps:$4 sm:$0xff]   ;;  %v6281_v54 = vld [vmem:[%s7481_s26 + $0x158] ss:$28 sps:$4 sm:$0xff]  }
  0xde   : > { %1785 = vmatprep.subr.bf16.mxu0 %v6188_v55  ;;  %v6282_v55 = vld [vmem:[#allocation5 + $0x2c0] ss:$8 sps:$4 sm:$0xff]  }
  0xe1   : > { %1786 = vmatpush1.bf16.msra.mxu0 %v6186_v56  ;;  %v6288_v56 = vld [vmem:[%s7481_s26 + $0x194] ss:$28 sps:$4 sm:$0xff]  }
  0xe2   : > { %1787 = vmatprep.subr.bf16.mxu0 %v6194_v57  ;;  %v6287_v57 = vld [vmem:[#allocation5 + $0x2d4] ss:$8 sps:$4 sm:$0xff]  }
  0xe4   : > { %1731 = vmatmul.mubr.bf16.gmra.mrb[16].mxu0 %v6191_v58  ;;  %v6285_v58 = vld [vmem:[#allocation5 + $0x2d0] ss:$8 sps:$4 sm:$0xff]  }
  0xe5   : > { %1788 = vmatpush1.bf16.msra.mxu0 %v6192_v59  ;;  %1740 = vmatprep.mubr.bf16.mxu0 %v6198_v60  ;;  %v6293_v59 = vld [vmem:[#allocation5 + $0x2e4] ss:$8 sps:$4 sm:$0xff]  }
  0xe6   : > { %1789 = vmatprep.subr.bf16.mxu0 %v6197_v61  ;;  %v6290_v60 = vld [vmem:[%s7481_s26 + $0x190] ss:$28 sps:$4 sm:$0xff]   ;;  %v6291_v61 = vld [vmem:[#allocation5 + $0x2e0] ss:$8 sps:$4 sm:$0xff]  }
  0xe9   : > { %1790 = vmatpush1.bf16.msra.mxu0 %v6195_v62  ;;  %v6299_v62 = vld [vmem:[%s7481_s26 + $0x14] ss:$28 sps:$4 sm:$0xff]  }
  0xea   : > { %1791 = vmatprep.subr.bf16.mxu0 %v6203_v63  ;;  %v6296_v63 = vld [vmem:[#allocation5 + $0x2f4] ss:$8 sps:$4 sm:$0xff]  }
  0xec   : > { %1741 = vmatmul.mubr.bf16.gmra.mrb[20].mxu0 %v6200_v0  ;;  %v6353_v0 = vld [vmem:[%s8828_s4 + $0x40] sm:$0xff]  }
  0xed   : > { %1792 = vmatpush1.bf16.msra.mxu0 %v6201_v1  ;;  %1750 = vmatprep.mubr.bf16.mxu0 %v6207_v2  ;;  %v6354_v1 = vld [vmem:[%s8828_s4] sm:$0xff]   ;;  %v6355_v2 = vld [vmem:[%s8828_s4 + $0x48] sm:$0xff]  }
  0xee   : > { %1793 = vmatprep.subr.bf16.mxu0 %v6206_v3  ;;  %v6294_v3 = vld [vmem:[#allocation5 + $0x2f0] ss:$8 sps:$4 sm:$0xff]   ;;  %5675 = vmatprep.subr.bf16.mxu1 %v6353_v0 }
  0xef   : > { %5676 = vmatpush3.bf16.msra.mxu1 %v6354_v1 }
  0xf0   : > { %5677 = vmatprep.subr.bf16.mxu1 %v6355_v2 }
  0xf1   : > { %1794 = vmatpush1.bf16.msra.mxu0 %v6204_v4  ;;  %v6302_v4 = vld [vmem:[#allocation5 + $0x304] ss:$8 sps:$4 sm:$0xff]  }
  0xf2   : > { %1795 = vmatprep.subr.bf16.mxu0 %v6212_v5  ;;  %v6356_v5 = vld [vmem:[%s8828_s4 + $0x8] sm:$0xff]  }
  0xf3   : > { %5678 = vmatpush3.bf16.msra.mxu1 %v6356_v5 }
  0xf4   : > { %1751 = vmatmul.mubr.bf16.gmra.mrb[24].mxu0 %v6209_v6  ;;  %v6297_v6 = vld [vmem:[%s7481_s26 + $0x10] ss:$28 sps:$4 sm:$0xff]  }
  0xf5   : > { %1796 = vmatpush1.bf16.msra.mxu0 %v6210_v7  ;;  %1760 = vmatprep.mubr.bf16.mxu0 %v6216_v8  ;;  %v6357_v7 = vld [vmem:[%s8828_s4 + $0x50] sm:$0xff]   ;;  %v6300_v8 = vld [vmem:[#allocation5 + $0x300] ss:$8 sps:$4 sm:$0xff]  }
  0xf6   : > { %1797 = vmatprep.subr.bf16.mxu0 %v6215_v9  ;;  %v6303_v9 = vld [vmem:[%s7481_s26 + $0x4c] ss:$28 sps:$4 sm:$0xff]   ;;  %5679 = vmatprep.subr.bf16.mxu1 %v6357_v7 }
  0xf9   : > { %1798 = vmatpush1.bf16.msra.mxu0 %v6213_v10  ;;  %v6308_v10 = vld [vmem:[#allocation5 + $0x314] ss:$8 sps:$4 sm:$0xff]  }
  0xfa   : > { %1799 = vmatprep.subr.bf16.mxu0 %v6221_v11  ;;  %v6358_v11 = vld [vmem:[%s8828_s4 + $0x10] sm:$0xff]  }
  0xfb   : > { %5680 = vmatpush3.bf16.msra.mxu1 %v6358_v11 }
  0xfc   : > { %1761 = vmatmul.mubr.bf16.gmra.mrb[28].mxu0 %v6218_v12  ;;  %v6359_v12 = vld [vmem:[%s8828_s4 + $0x58] sm:$0xff]  }
  0xfd   : > { %1800 = vmatpush1.bf16.msra.mxu0 %v6219_v13  ;;  %1803 = vmatprep.mubr.bf16.mxu0 %v6227_v14  ;;  %v6306_v13 = vld [vmem:[#allocation5 + $0x310] ss:$8 sps:$4 sm:$0xff]   ;;  %v6314_v14 = vld [vmem:[#allocation5 + $0x324] ss:$8 sps:$4 sm:$0xff]  }
  0xfe   : > { %1801 = vmatprep.subr.bf16.mxu0 %v6224_v15  ;;  %v6360_v15 = vld [vmem:[%s8828_s4 + $0x18] sm:$0xff]   ;;  %5681 = vmatprep.subr.bf16.mxu1 %v6359_v12 }
  0xff   : > { %5682 = vmatpush3.bf16.msra.mxu1 %v6360_v15 }
 0x101   : > { %1802 = vmatpush1.bf16.msra.mxu0 %v6222_v16  ;;  %v6305_v16 = vld [vmem:[%s7481_s26 + $0x48] ss:$28 sps:$4 sm:$0xff]  }
 0x102   : > { %1884 = vmatprep.subr.bf16.mxu0 %v6230_v17  ;;  %v6361_v17 = vld [vmem:[%s8828_s4 + $0x60] sm:$0xff]  }
 0x103   : > { %5683 = vmatprep.subr.bf16.mxu1 %v6361_v17 }
 0x104   : > { %1804 = vmatmul.mubr.bf16.vlgmr.msra.gmra.mrb[0].mxu0 %v6225_v18  ;;  %v6309_v18 = vld [vmem:[%s7481_s26 + $0x84] ss:$28 sps:$4 sm:$0xff]  }
 0x105   : > { %1885 = vmatpush1.bf16.msra.mxu0 %v6228_v19  ;;  %1813 = vmatprep.mubr.bf16.mxu0 %v6234_v20  ;;  %v6312_v19 = vld [vmem:[#allocation5 + $0x320] ss:$8 sps:$4 sm:$0xff]   ;;  %v6320_v20 = vld [vmem:[#allocation5 + $0x334] ss:$8 sps:$4 sm:$0xff]  }
 0x106   : > { %1886 = vmatprep.subr.bf16.mxu0 %v6233_v21  ;;  %v6362_v21 = vld [vmem:[%s8828_s4 + $0x20] sm:$0xff]  }
 0x107   : > { %5684 = vmatpush3.bf16.msra.mxu1 %v6362_v21 }
 0x109   : > { %1887 = vmatpush1.bf16.msra.mxu0 %v6231_v22  ;;  %v6363_v22 = vld [vmem:[%s8828_s4 + $0x68] sm:$0xff]  }
 0x10a   : > { %1888 = vmatprep.subr.bf16.mxu0 %v6239_v23  ;;  %v6318_v23 = vld [vmem:[#allocation5 + $0x330] ss:$8 sps:$4 sm:$0xff]   ;;  %5685 = vmatprep.subr.bf16.mxu1 %v6363_v22 }
 0x10c   : > { %1814 = vmatmul.mubr.bf16.gmra.mrb[4].mxu0 %v6236_v24  ;;  %v6326_v24 = vld [vmem:[#allocation5 + $0x344] ss:$8 sps:$4 sm:$0xff]  }
 0x10d   : > { %1889 = vmatpush1.bf16.msra.mxu0 %v6237_v25  ;;  %1823 = vmatprep.mubr.bf16.mxu0 %v6243_v26  ;;  %v6311_v25 = vld [vmem:[%s7481_s26 + $0x80] ss:$28 sps:$4 sm:$0xff]  }
 0x10e   : > { %1890 = vmatprep.subr.bf16.mxu0 %v6242_v27  ;;  %v6315_v26 = vld [vmem:[%s7481_s26 + $0xbc] ss:$28 sps:$4 sm:$0xff]   ;;  %v6324_v27 = vld [vmem:[#allocation5 + $0x340] ss:$8 sps:$4 sm:$0xff]  }
 0x111   : > { %1891 = vmatpush1.bf16.msra.mxu0 %v6240_v28  ;;  %v6332_v28 = vld [vmem:[#allocation5 + $0x354] ss:$8 sps:$4 sm:$0xff]  }
 0x112   : > { %1892 = vmatprep.subr.bf16.mxu0 %v6248_v29  ;;  %v6330_v29 = vld [vmem:[#allocation5 + $0x350] ss:$8 sps:$4 sm:$0xff]  }
 0x114   : > { %1824 = vmatmul.mubr.bf16.gmra.mrb[8].mxu0 %v6245_v30  ;;  %v6338_v30 = vld [vmem:[#allocation5 + $0x364] ss:$8 sps:$4 sm:$0xff]  }
 0x115   : > { %1893 = vmatpush1.bf16.msra.mxu0 %v6246_v31  ;;  %1833 = vmatprep.mubr.bf16.mxu0 %v6252_v32  ;;  %v6317_v31 = vld [vmem:[%s7481_s26 + $0xb8] ss:$28 sps:$4 sm:$0xff]  }
 0x116   : > { %1894 = vmatprep.subr.bf16.mxu0 %v6251_v33  ;;  %v6321_v32 = vld [vmem:[%s7481_s26 + $0xf4] ss:$28 sps:$4 sm:$0xff]   ;;  %v6336_v33 = vld [vmem:[#allocation5 + $0x360] ss:$8 sps:$4 sm:$0xff]  }
 0x119   : > { %1895 = vmatpush1.bf16.msra.mxu0 %v6249_v34  ;;  %v6344_v34 = vld [vmem:[#allocation5 + $0x374] ss:$8 sps:$4 sm:$0xff]  }
 0x11a   : > { %1896 = vmatprep.subr.bf16.mxu0 %v6257_v35  ;;  %v6342_v35 = vld [vmem:[#allocation5 + $0x370] ss:$8 sps:$4 sm:$0xff]  }
 0x11c   : > { %1834 = vmatmul.mubr.bf16.gmra.mrb[12].mxu0 %v6254_v36  ;;  %v6323_v36 = vld [vmem:[%s7481_s26 + $0xf0] ss:$28 sps:$4 sm:$0xff]  }
 0x11d   : > { %1897 = vmatpush1.bf16.msra.mxu0 %v6255_v37  ;;  %1843 = vmatprep.mubr.bf16.mxu0 %v6261_v38  ;;  %v6327_v37 = vld [vmem:[%s7481_s26 + $0x12c] ss:$28 sps:$4 sm:$0xff]  }
 0x11e   : > { %1898 = vmatprep.subr.bf16.mxu0 %v6260_v39  ;;  %v6329_v38 = vld [vmem:[%s7481_s26 + $0x128] ss:$28 sps:$4 sm:$0xff]  }
 0x11f   : > { %v6333_v39 = vld [vmem:[%s7481_s26 + $0x164] ss:$28 sps:$4 sm:$0xff]  }
 0x121   : > { %1899 = vmatpush1.bf16.msra.mxu0 %v6258_v40  ;;  %v6335_v40 = vld [vmem:[%s7481_s26 + $0x160] ss:$28 sps:$4 sm:$0xff]  }
 0x122   : > { %1900 = vmatprep.subr.bf16.mxu0 %v6266_v41  ;;  %v6339_v41 = vld [vmem:[%s7481_s26 + $0x19c] ss:$28 sps:$4 sm:$0xff]  }
 0x124   : > { %1844 = vmatmul.mubr.bf16.gmra.mrb[16].mxu0 %v6263_v42  ;;  %v6341_v42 = vld [vmem:[%s7481_s26 + $0x198] ss:$28 sps:$4 sm:$0xff]  }
 0x125   : > { %1901 = vmatpush1.bf16.msra.mxu0 %v6264_v43  ;;  %1853 = vmatprep.mubr.bf16.mxu0 %v6270_v44  ;;  %v7209_v43 = vmov 0   ;;  %v6345_v44 = vld [vmem:[%s7481_s26 + $0x18] ss:$28 sps:$4 sm:$0xff]  }
 0x126   : > { %1902 = vmatprep.subr.bf16.mxu0 %v6269_v45  ;;  %v6346_v45 = vld [vmem:[%s7481_s26 + $0x50] ss:$28 sps:$4 sm:$0xff]  }
 0x129   : > { %1903 = vmatpush1.bf16.msra.mxu0 %v6267_v46  ;;  %v6347_v46 = vld [vmem:[%s7481_s26 + $0x88] ss:$28 sps:$4 sm:$0xff]  }
 0x12a   : > { %1904 = vmatprep.subr.bf16.mxu0 %v6275_v47  ;;  %v6348_v47 = vld [vmem:[%s7481_s26 + $0xc0] ss:$28 sps:$4 sm:$0xff]  }
 0x12c   : > { %1854 = vmatmul.mubr.bf16.gmra.mrb[20].mxu0 %v6272_v48  ;;  %v6349_v48 = vld [vmem:[%s7481_s26 + $0xf8] ss:$28 sps:$4 sm:$0xff]  }
 0x12d   : > { %1905 = vmatpush1.bf16.msra.mxu0 %v6273_v49  ;;  %1863 = vmatprep.mubr.bf16.mxu0 %v6279_v50  ;;  %v6350_v49 = vld [vmem:[%s7481_s26 + $0x130] ss:$28 sps:$4 sm:$0xff]   ;;  %v6351_v50 = vld [vmem:[%s7481_s26 + $0x168] ss:$28 sps:$4 sm:$0xff]  }
 0x12e   : > { %1906 = vmatprep.subr.bf16.mxu0 %v6278_v51  ;;  %v6352_v51 = vld [vmem:[%s7481_s26 + $0x1a0] ss:$28 sps:$4 sm:$0xff]   ;;  %s8880_s26 = sld [smem:[#allocation20_spill]] }
 0x131   : > { %1907 = vmatpush1.bf16.msra.mxu0 %v6276_v52  ;;  %v6364_v52 = vld [vmem:[%s8828_s4 + $0x28] sm:$0xff]  }
 0x132   : > { %1908 = vmatprep.subr.bf16.mxu0 %v6284_v53  ;;  %5686 = vmatpush3.bf16.msra.mxu1 %v6364_v52  ;;  %v6365_v53 = vld [vmem:[%s8828_s4 + $0x70] sm:$0xff]  }
 0x133   : > { %5687 = vmatprep.subr.bf16.mxu1 %v6365_v53 }
 0x134   : > { %1864 = vmatmul.mubr.bf16.gmra.mrb[24].mxu0 %v6281_v54  ;;  %v6366_v54 = vld [vmem:[%s8828_s4 + $0x30] sm:$0xff]  }
 0x135   : > { %1909 = vmatpush1.bf16.msra.mxu0 %v6282_v55  ;;  %1873 = vmatprep.mubr.bf16.mxu0 %v6288_v56  ;;  %v6367_v55 = vld [vmem:[%s8828_s4 + $0x78] sm:$0xff]  }
 0x136   : > { %1910 = vmatprep.subr.bf16.mxu0 %v6287_v57  ;;  %5688 = vmatpush3.bf16.msra.mxu1 %v6366_v54  ;;  %v6368_v56 = vld [vmem:[%s8828_s4 + $0x38] sm:$0xff]   ;;  %v6369_v57 = vld [vmem:[%s8830_s6] sm:$0xff]  }
 0x137   : > { %5689 = vmatprep.subr.bf16.mxu1 %v6367_v55 }
 0x139   : > { %1911 = vmatpush1.bf16.msra.mxu0 %v6285_v58  ;;  %v800_v58 = vlaneseq }
 0x13a   : > { %1912 = vmatprep.subr.bf16.mxu0 %v6293_v59  ;;  %5690 = vmatpush3.bf16.msra.mxu1 %v6368_v56 }
 0x13b   : > { %5829 = vmatprep.subr.bf16.mxu1 %v6369_v57  ;;  %v7606_v59 = vshrl.u32 %v800_v58, 7 }
 0x13c   : > { %1874 = vmatmul.mubr.bf16.gmra.mrb[28].mxu0 %v6290_v60 }
 0x13d   : > { %1913 = vmatpush1.bf16.msra.mxu0 %v6291_v61  ;;  %1916 = vmatprep.mubr.bf16.mxu0 %v6299_v62  ;;  %v7609_v60 = vsub.s32 0, %v7606_v59  ;;  %v798_v61 = vld [vmem:[%s8827_s3] sm:$0x3]  ;;  %v7615_v62 = vsub.s32 1, %v7606_v59 }
 0x13e   : > { %1914 = vmatprep.subr.bf16.mxu0 %v6296_v63 }
 0x13f   : > { %v7618_v63 = vrot.slane %v798_v61, %v7609_v60  ;;  %v7621_v0 = vrot.slane %v798_v61, %v7615_v62 }
 0x141   : > { %1915 = vmatpush1.bf16.msra.mxu0 %v6294_v3 }
 0x142   : > { %1997 = vmatprep.subr.bf16.mxu0 %v6302_v4 }
 0x144   : > { %1917 = vmatmul.mubr.bf16.vlgmr.msra.gmra.mrb[0].mxu0 %v6297_v6 }
 0x145   : > { %1998 = vmatpush1.bf16.msra.mxu0 %v6300_v8  ;;  %1926 = vmatprep.mubr.bf16.mxu0 %v6303_v9 }
 0x146   : > { %1999 = vmatprep.subr.bf16.mxu0 %v6308_v10 }
 0x149   : > { %2000 = vmatpush1.bf16.msra.mxu0 %v6306_v13 }
 0x14a   : > { %2001 = vmatprep.subr.bf16.mxu0 %v6314_v14 }
 0x14c   : > { %1927 = vmatmul.mubr.bf16.gmra.mrb[4].mxu0 %v6305_v16 }
 0x14d   : > { %1936 = vmatprep.mubr.bf16.mxu0 %v6309_v18  ;;  %2002 = vmatpush1.bf16.msra.mxu0 %v6312_v19  ;;  %v6370_v18 = vld [vmem:[%s8830_s6 + $0x8] sm:$0xff]  }
 0x14e   : > { %2003 = vmatprep.subr.bf16.mxu0 %v6320_v20 }
 0x151   : > { %2004 = vmatpush1.bf16.msra.mxu0 %v6318_v23 }
 0x152   : > { %2005 = vmatprep.subr.bf16.mxu0 %v6326_v24 }
 0x154   : > { %1937 = vmatmul.mubr.bf16.gmra.mrb[8].mxu0 %v6311_v25 }
 0x155   : > { %1946 = vmatprep.mubr.bf16.mxu0 %v6315_v26  ;;  %2006 = vmatpush1.bf16.msra.mxu0 %v6324_v27  ;;  %v6371_v26 = vld [vmem:[%s8830_s6 + $0x10] sm:$0xff]  }
 0x156   : > { %2007 = vmatprep.subr.bf16.mxu0 %v6332_v28 }
 0x159   : > { %2008 = vmatpush1.bf16.msra.mxu0 %v6330_v29 }
 0x15a   : > { %2009 = vmatprep.subr.bf16.mxu0 %v6338_v30 }
 0x15c   : > { %1947 = vmatmul.mubr.bf16.gmra.mrb[12].mxu0 %v6317_v31 }
 0x15d   : > { %1956 = vmatprep.mubr.bf16.mxu0 %v6321_v32  ;;  %2010 = vmatpush1.bf16.msra.mxu0 %v6336_v33 }
 0x15e   : > { %2011 = vmatprep.subr.bf16.mxu0 %v6344_v34  ;;  %v6372_v34 = vld [vmem:[%s8830_s6 + $0x18] sm:$0xff]  }
 0x161   : > { %2012 = vmatpush1.bf16.msra.mxu0 %v6342_v35 }
 0x164   : > { %1957 = vmatmul.mubr.bf16.gmra.mrb[16].mxu0 %v6323_v36 }
 0x165   : > { %1966 = vmatprep.mubr.bf16.mxu0 %v6327_v37 }
 0x16c   : > { %1967 = vmatmul.mubr.bf16.gmra.mrb[20].mxu0 %v6329_v38 }
 0x16d   : > { %1976 = vmatprep.mubr.bf16.mxu0 %v6333_v39 }
 0x174   : > { %1977 = vmatmul.mubr.bf16.gmra.mrb[24].mxu0 %v6335_v40 }
 0x175   : > { %1986 = vmatprep.mubr.bf16.mxu0 %v6339_v41 }
 0x17c   : > { %1987 = vmatmul.mubr.bf16.gmra.mrb[28].mxu0 %v6341_v42  ;;  %v6373_v42 = vld [vmem:[%s8830_s6 + $0x20] sm:$0xff]  }
 0x17d   : > { %2029 = vmatprep.mubr.bf16.mxu0 %v7209_v43 }
 0x184   : > { %2030 = vmatmul.mubr.bf16.vlgmr.msra.gmra.mrb[0].mxu0 %v6345_v44 }
 0x185   : > { %2039 = vmatprep.mubr.bf16.mxu0 %v7209_v43 }
 0x18c   : > { %2040 = vmatmul.mubr.bf16.gmra.mrb[4].mxu0 %v6346_v45 }
 0x18d   : > { %2049 = vmatprep.mubr.bf16.mxu0 %v7209_v43 }
 0x194   : > { %2050 = vmatmul.mubr.bf16.gmra.mrb[8].mxu0 %v6347_v46 }
 0x195   : > { %2059 = vmatprep.mubr.bf16.mxu0 %v7209_v43 }
 0x19c   : > { %2060 = vmatmul.mubr.bf16.gmra.mrb[12].mxu0 %v6348_v47 }
 0x19d   : > { %2069 = vmatprep.mubr.bf16.mxu0 %v7209_v43 }
 0x1a4   : > { %2070 = vmatmul.mubr.bf16.gmra.mrb[16].mxu0 %v6349_v48 }
 0x1a5   : > { %2079 = vmatprep.mubr.bf16.mxu0 %v7209_v43 }
 0x1ac   : > { %2080 = vmatmul.mubr.bf16.gmra.mrb[20].mxu0 %v6350_v49 }
 0x1ad   : > { %2089 = vmatprep.mubr.bf16.mxu0 %v7209_v43 }
 0x1b4   : > { %2090 = vmatmul.mubr.bf16.gmra.mrb[24].mxu0 %v6351_v50 }
 0x1b5   : > { %2099 = vmatprep.mubr.bf16.mxu0 %v7209_v43 }
 0x1bc   : > { %2100 = vmatmul.mubr.bf16.gmra.mrb[28].mxu0 %v6352_v51  ;;  %v6374_v51 = vld [vmem:[%s8830_s6 + $0x28] sm:$0xff]  }
 0x257   : > { %v2031_v1 = vpop.f32.mrb[0].mxu0 }
 0x258   : > { %v5897_v2 = vadd.f32 %v2031_v1, %v7618_v63  ;;  %v2033_v3 = vpop.f32.mrb[1].mxu0 }
 0x259   : > { %v5898_v4 = vadd.f32 %v2033_v3, %v7621_v0  ;;  %v2035_v5 = vpop.f32.mrb[2].mxu0 }
 0x25a   : > { %v5899_v6 = vadd.f32 %v2035_v5, %v7618_v63  ;;  %v2037_v7 = vpop.f32.mrb[3].mxu0  ;;  %v2110_v9 = vmax.f32 %v5897_v2, 0.0 }
 0x25b   : > { %v5900_v8 = vadd.f32 %v2037_v7, %v7621_v0  ;;  %v2111_v11 = vmax.f32 %v5898_v4, 0.0 }
 0x25c   : > { %v2112_v10 = vmax.f32 %v5899_v6, 0.0 }
 0x25d   : > { %v2113_v12 = vmax.f32 %v5900_v8, 0.0 }
 0x25e   : > { %v2142_v13 = vpack.c.bf16 %v2112_v10, %v2110_v9 }
 0x25f   : > { %v2041_v14 = vpop.f32.mrb[4].mxu0  ;;  %v2143_v15 = vpack.c.bf16 %v2113_v12, %v2111_v11 }
 0x260   : > { %v5901_v16 = vadd.f32 %v2041_v14, %v7618_v63  ;;  %v2043_v17 = vpop.f32.mrb[5].mxu0 }
 0x261   : > { %v5902_v19 = vadd.f32 %v2043_v17, %v7621_v0  ;;  %v2045_v20 = vpop.f32.mrb[6].mxu0  ;;  %2325 = vmatprep.mubr.bf16.mxu1 %v2143_v15 }
 0x262   : > { %v5903_v21 = vadd.f32 %v2045_v20, %v7618_v63  ;;  %v2047_v22 = vpop.f32.mrb[7].mxu0  ;;  %2326 = vmatmul.mubr.bf16.vlgmr.msra.gmra.mrb[0].mxu1 %v2142_v13  ;;  %v2114_v24 = vmax.f32 %v5901_v16, 0.0 }
 0x263   : > { %v5904_v23 = vadd.f32 %v2047_v22, %v7621_v0  ;;  %5830 = vmatpush3.bf16.msra.mxu1 %v6369_v57  ;;  %v2115_v27 = vmax.f32 %v5902_v19, 0.0 }
 0x264   : > { %v2116_v25 = vmax.f32 %v5903_v21, 0.0  ;;  %5831 = vmatprep.subr.bf16.mxu1 %v6370_v18 }
 0x265   : > { %v2117_v28 = vmax.f32 %v5904_v23, 0.0 }
 0x266   : > { %v2144_v29 = vpack.c.bf16 %v2116_v25, %v2114_v24 }
 0x267   : > { %v2145_v30 = vpack.c.bf16 %v2117_v28, %v2115_v27  ;;  %v2051_v31 = vpop.f32.mrb[8].mxu0  ;;  %5832 = vmatpush3.bf16.msra.mxu1 %v6370_v18 }
 0x268   : > { %v5905_v32 = vadd.f32 %v2051_v31, %v7618_v63  ;;  %v2053_v33 = vpop.f32.mrb[9].mxu0  ;;  %5833 = vmatprep.subr.bf16.mxu1 %v6371_v26 }
 0x269   : > { %v5906_v35 = vadd.f32 %v2053_v33, %v7621_v0  ;;  %v2055_v36 = vpop.f32.mrb[10].mxu0  ;;  %2333 = vmatprep.mubr.bf16.mxu1 %v2145_v30 }
 0x26a   : > { %v5907_v37 = vadd.f32 %v2055_v36, %v7618_v63  ;;  %v2057_v38 = vpop.f32.mrb[11].mxu0  ;;  %2334 = vmatmul.mubr.bf16.gmra.mrb[4].mxu1 %v2144_v29  ;;  %v2118_v40 = vmax.f32 %v5905_v32, 0.0 }
 0x26b   : > { %v5908_v39 = vadd.f32 %v2057_v38, %v7621_v0  ;;  %5834 = vmatpush3.bf16.msra.mxu1 %v6371_v26  ;;  %v2119_v44 = vmax.f32 %v5906_v35, 0.0 }
 0x26c   : > { %v2120_v41 = vmax.f32 %v5907_v37, 0.0  ;;  %5835 = vmatprep.subr.bf16.mxu1 %v6372_v34 }
 0x26d   : > { %v2121_v45 = vmax.f32 %v5908_v39, 0.0 }
 0x26e   : > { %v2146_v46 = vpack.c.bf16 %v2120_v41, %v2118_v40 }
 0x26f   : > { %v2147_v47 = vpack.c.bf16 %v2121_v45, %v2119_v44  ;;  %v2061_v48 = vpop.f32.mrb[12].mxu0  ;;  %5836 = vmatpush3.bf16.msra.mxu1 %v6372_v34 }
 0x270   : > { %v5909_v49 = vadd.f32 %v2061_v48, %v7618_v63  ;;  %v2063_v50 = vpop.f32.mrb[13].mxu0  ;;  %5837 = vmatprep.subr.bf16.mxu1 %v6373_v42 }
 0x271   : > { %v5910_v52 = vadd.f32 %v2063_v50, %v7621_v0  ;;  %v2065_v53 = vpop.f32.mrb[14].mxu0  ;;  %2341 = vmatprep.mubr.bf16.mxu1 %v2147_v47 }
 0x272   : > { %v5911_v54 = vadd.f32 %v2065_v53, %v7618_v63  ;;  %v2067_v55 = vpop.f32.mrb[15].mxu0  ;;  %2342 = vmatmul.mubr.bf16.gmra.mrb[8].mxu1 %v2146_v46  ;;  %v2122_v57 = vmax.f32 %v5909_v49, 0.0 }
 0x273   : > { %v5912_v56 = vadd.f32 %v2067_v55, %v7621_v0  ;;  %5838 = vmatpush3.bf16.msra.mxu1 %v6373_v42  ;;  %v2123_v61 = vmax.f32 %v5910_v52, 0.0 }
 0x274   : > { %v2124_v58 = vmax.f32 %v5911_v54, 0.0  ;;  %5839 = vmatprep.subr.bf16.mxu1 %v6374_v51 }
 0x275   : > { %v2125_v1 = vmax.f32 %v5912_v56, 0.0 }
 0x276   : > { %v2148_v2 = vpack.c.bf16 %v2124_v58, %v2122_v57 }
 0x277   : > { %v2149_v3 = vpack.c.bf16 %v2125_v1, %v2123_v61  ;;  %v2071_v4 = vpop.f32.mrb[16].mxu0  ;;  %5840 = vmatpush3.bf16.msra.mxu1 %v6374_v51 }
 0x278   : > { %v5913_v5 = vadd.f32 %v2071_v4, %v7618_v63  ;;  %v2073_v6 = vpop.f32.mrb[17].mxu0 }
 0x279   : > { %v5914_v7 = vadd.f32 %v2073_v6, %v7621_v0  ;;  %v2075_v8 = vpop.f32.mrb[18].mxu0  ;;  %2349 = vmatprep.mubr.bf16.mxu1 %v2149_v3  ;;  %v7679_v3 = vld [vmem:[%s8829_s5] ss:$0 sm:$0xff] }
 0x27a   : > { %v5915_v9 = vadd.f32 %v2075_v8, %v7618_v63  ;;  %v2077_v10 = vpop.f32.mrb[19].mxu0  ;;  %2350 = vmatmul.mubr.bf16.gmra.mrb[12].mxu1 %v2148_v2  ;;  %v2126_v12 = vmax.f32 %v5913_v5, 0.0  ;;  %v6375_v2 = vld [vmem:[%s8830_s6 + $0x30] sm:$0xff]  }
 0x27b   : > { %v5916_v11 = vadd.f32 %v2077_v10, %v7621_v0  ;;  %v2127_v14 = vmax.f32 %v5914_v7, 0.0  ;;  %5841 = vmatprep.subr.bf16.mxu1 %v6375_v2 }
 0x27c   : > { %v2128_v13 = vmax.f32 %v5915_v9, 0.0  ;;  %5842 = vmatpush3.bf16.msra.mxu1 %v6375_v2 }
 0x27d   : > { %v2129_v15 = vmax.f32 %v5916_v11, 0.0 }
 0x27e   : > { %v2150_v16 = vpack.c.bf16 %v2128_v13, %v2126_v12 }
 0x27f   : > { %v2151_v17 = vpack.c.bf16 %v2129_v15, %v2127_v14  ;;  %v2081_v18 = vpop.f32.mrb[20].mxu0 }
 0x280   : > { %v5917_v19 = vadd.f32 %v2081_v18, %v7618_v63  ;;  %v2083_v20 = vpop.f32.mrb[21].mxu0 }
 0x281   : > { %v5918_v21 = vadd.f32 %v2083_v20, %v7621_v0  ;;  %v2085_v22 = vpop.f32.mrb[22].mxu0  ;;  %2357 = vmatprep.mubr.bf16.mxu1 %v2151_v17 }
 0x282   : > { %v5919_v23 = vadd.f32 %v2085_v22, %v7618_v63  ;;  %v2087_v24 = vpop.f32.mrb[23].mxu0  ;;  %2358 = vmatmul.mubr.bf16.gmra.mrb[16].mxu1 %v2150_v16  ;;  %v2130_v26 = vmax.f32 %v5917_v19, 0.0 }
 0x283   : > { %v5920_v25 = vadd.f32 %v2087_v24, %v7621_v0  ;;  %v2131_v28 = vmax.f32 %v5918_v21, 0.0 }
 0x284   : > { %v2132_v27 = vmax.f32 %v5919_v23, 0.0 }
 0x285   : > { %v2133_v29 = vmax.f32 %v5920_v25, 0.0 }
 0x286   : > { %v2152_v30 = vpack.c.bf16 %v2132_v27, %v2130_v26 }
 0x287   : > { %v2153_v31 = vpack.c.bf16 %v2133_v29, %v2131_v28  ;;  %v2091_v32 = vpop.f32.mrb[24].mxu0 }
 0x288   : > { %v5921_v33 = vadd.f32 %v2091_v32, %v7618_v63  ;;  %v2093_v34 = vpop.f32.mrb[25].mxu0 }
 0x289   : > { %v5922_v35 = vadd.f32 %v2093_v34, %v7621_v0  ;;  %v2095_v36 = vpop.f32.mrb[26].mxu0  ;;  %2365 = vmatprep.mubr.bf16.mxu1 %v2153_v31 }
 0x28a   : > { %v5923_v37 = vadd.f32 %v2095_v36, %v7618_v63  ;;  %v2097_v38 = vpop.f32.mrb[27].mxu0  ;;  %2366 = vmatmul.mubr.bf16.gmra.mrb[20].mxu1 %v2152_v30  ;;  %v2134_v40 = vmax.f32 %v5921_v33, 0.0 }
 0x28b   : > { %v5924_v39 = vadd.f32 %v2097_v38, %v7621_v0  ;;  %v2135_v42 = vmax.f32 %v5922_v35, 0.0 }
 0x28c   : > { %v2136_v41 = vmax.f32 %v5923_v37, 0.0 }
 0x28d   : > { %v2137_v44 = vmax.f32 %v5924_v39, 0.0 }
 0x28e   : > { %v2154_v45 = vpack.c.bf16 %v2136_v41, %v2134_v40 }
 0x28f   : > { %v2155_v46 = vpack.c.bf16 %v2137_v44, %v2135_v42  ;;  %v2101_v47 = vpop.f32.mrb[28].mxu0 }
 0x290   : > { %v5925_v48 = vadd.f32 %v2101_v47, %v7618_v63  ;;  %v2103_v49 = vpop.f32.mrb[29].mxu0 }
 0x291   : > { %v5926_v50 = vadd.f32 %v2103_v49, %v7621_v0  ;;  %v2105_v51 = vpop.f32.mrb[30].mxu0  ;;  %2373 = vmatprep.mubr.bf16.mxu1 %v2155_v46 }
 0x292   : > { %v5927_v52 = vadd.f32 %v2105_v51, %v7618_v63  ;;  %v2107_v53 = vpop.f32.mrb[31].mxu0  ;;  %2374 = vmatmul.mubr.bf16.gmra.mrb[24].mxu1 %v2154_v45  ;;  %v2138_v55 = vmax.f32 %v5925_v48, 0.0  ;;  %v6376_v63 = vld [vmem:[%s8830_s6 + $0x38] sm:$0xff]  }
 0x293   : > { %v5928_v54 = vadd.f32 %v2107_v53, %v7621_v0  ;;  %v2139_v57 = vmax.f32 %v5926_v50, 0.0  ;;  %5843 = vmatprep.subr.bf16.mxu1 %v6376_v63 }
 0x294   : > { %v2140_v56 = vmax.f32 %v5927_v52, 0.0  ;;  %5844 = vmatpush3.bf16.msra.mxu1 %v6376_v63 }
 0x295   : > { %v2141_v58 = vmax.f32 %v5928_v54, 0.0 }
 0x296   : > { %v2156_v61 = vpack.c.bf16 %v2140_v56, %v2138_v55 }
 0x297   : > { %v2157_v1 = vpack.c.bf16 %v2141_v58, %v2139_v57 }
 0x299   : > { %2381 = vmatprep.mubr.bf16.mxu1 %v2157_v1 }
 0x29a   : > { %2382 = vmatmul.mubr.bf16.gmra.mrb[28].mxu1 %v2156_v61 }
 0x335   : > { %v5691_v0 = vpop.f32.mrb[0].mxu1 }
 0x336   : > { %v5692_v4 = vpop.f32.mrb[1].mxu1 }
 0x337   : > { %v5693_v5 = vadd.f32 %v5692_v4, %v5691_v0  ;;  %v5694_v6 = vpop.f32.mrb[2].mxu1 }
 0x338   : > { %v5695_v7 = vpop.f32.mrb[3].mxu1 }
 0x339   : > { %v2328_v8 = vadd.f32 %v5693_v5, %v7679_v3  ;;  %v5696_v9 = vadd.f32 %v5695_v7, %v5694_v6 }
 0x33b   : > { %v2331_v10 = vadd.f32 %v5696_v9, %v7679_v3  ;;  %v2390_v11 = vmax.f32 %v2328_v8, 0.0 }
 0x33d   : > { %v2391_v12 = vmax.f32 %v2331_v10, 0.0  ;;  %v5697_v13 = vpop.f32.mrb[4].mxu1 }
 0x33e   : > { %v5698_v14 = vpop.f32.mrb[5].mxu1 }
 0x33f   : > { %v5699_v15 = vadd.f32 %v5698_v14, %v5697_v13  ;;  %v5700_v16 = vpop.f32.mrb[6].mxu1  ;;  %v2406_v17 = vpack.c.bf16 %v2391_v12, %v2390_v11 }
 0x340   : > { %v5701_v18 = vpop.f32.mrb[7].mxu1 }
 0x341   : > { %v2336_v19 = vadd.f32 %v5699_v15, %v7679_v3  ;;  %v5702_v20 = vadd.f32 %v5701_v18, %v5700_v16  ;;  %5845 = vmatprep.mubr.bf16.mxu1 %v2406_v17 }
 0x343   : > { %v2339_v21 = vadd.f32 %v5702_v20, %v7679_v3  ;;  %v2392_v22 = vmax.f32 %v2336_v19, 0.0 }
 0x345   : > { %v2393_v23 = vmax.f32 %v2339_v21, 0.0  ;;  %v5703_v24 = vpop.f32.mrb[8].mxu1 }
 0x346   : > { %v5704_v25 = vpop.f32.mrb[9].mxu1 }
 0x347   : > { %v2407_v26 = vpack.c.bf16 %v2393_v23, %v2392_v22  ;;  %v5705_v27 = vadd.f32 %v5704_v25, %v5703_v24  ;;  %v5706_v28 = vpop.f32.mrb[10].mxu1 }
 0x348   : > { %v5707_v29 = vpop.f32.mrb[11].mxu1 }
 0x349   : > { %v2344_v30 = vadd.f32 %v5705_v27, %v7679_v3  ;;  %v5708_v31 = vadd.f32 %v5707_v29, %v5706_v28  ;;  %5846 = vmatmul.mubr.bf16.vlgmr.msra.gmra.mrb[32].mxu1 %v2407_v26 }
 0x34b   : > { %v2347_v32 = vadd.f32 %v5708_v31, %v7679_v3  ;;  %v2394_v33 = vmax.f32 %v2344_v30, 0.0 }
 0x34d   : > { %v2395_v34 = vmax.f32 %v2347_v32, 0.0  ;;  %v5709_v35 = vpop.f32.mrb[12].mxu1  ;;  %v6377_v32 = vld [vmem:[%s8832_s8] sm:$0xff]  }
 0x34e   : > { %v5710_v36 = vpop.f32.mrb[13].mxu1  ;;  %5861 = vmatprep.subr.bf16.mxu1 %v6377_v32 }
 0x34f   : > { %v5711_v37 = vadd.f32 %v5710_v36, %v5709_v35  ;;  %v5712_v38 = vpop.f32.mrb[14].mxu1  ;;  %v2408_v39 = vpack.c.bf16 %v2395_v34, %v2394_v33  ;;  %v6378_v33 = vld [vmem:[%s8832_s8 + $0x8] sm:$0xff]   ;;  %5862 = vmatpush3.bf16.msra.mxu1 %v6377_v32 }
 0x350   : > { %v5713_v40 = vpop.f32.mrb[15].mxu1  ;;  %5863 = vmatprep.subr.bf16.mxu1 %v6378_v33 }
 0x351   : > { %v2352_v41 = vadd.f32 %v5711_v37, %v7679_v3  ;;  %v5714_v42 = vadd.f32 %v5713_v40, %v5712_v38  ;;  %5849 = vmatprep.mubr.bf16.mxu1 %v2408_v39 }
 0x353   : > { %v2355_v44 = vadd.f32 %v5714_v42, %v7679_v3  ;;  %v2396_v45 = vmax.f32 %v2352_v41, 0.0  ;;  %5864 = vmatpush3.bf16.msra.mxu1 %v6378_v33 }
 0x355   : > { %v2397_v46 = vmax.f32 %v2355_v44, 0.0  ;;  %v5715_v47 = vpop.f32.mrb[16].mxu1 }
 0x356   : > { %v5716_v48 = vpop.f32.mrb[17].mxu1 }
 0x357   : > { %v5717_v49 = vadd.f32 %v5716_v48, %v5715_v47  ;;  %v5718_v50 = vpop.f32.mrb[18].mxu1  ;;  %v2409_v51 = vpack.c.bf16 %v2397_v46, %v2396_v45 }
 0x358   : > { %v5719_v52 = vpop.f32.mrb[19].mxu1 }
 0x359   : > { %v2360_v53 = vadd.f32 %v5717_v49, %v7679_v3  ;;  %v5720_v54 = vadd.f32 %v5719_v52, %v5718_v50  ;;  %5850 = vmatmul.mubr.bf16.gmra.mrb[36].mxu1 %v2409_v51 }
 0x35b   : > { %v2363_v55 = vadd.f32 %v5720_v54, %v7679_v3  ;;  %v2398_v56 = vmax.f32 %v2360_v53, 0.0 }
 0x35d   : > { %v2399_v57 = vmax.f32 %v2363_v55, 0.0  ;;  %v5721_v58 = vpop.f32.mrb[20].mxu1 }
 0x35e   : > { %v5722_v61 = vpop.f32.mrb[21].mxu1 }
 0x35f   : > { %v5723_v1 = vadd.f32 %v5722_v61, %v5721_v58  ;;  %v5724_v2 = vpop.f32.mrb[22].mxu1  ;;  %v2410_v63 = vpack.c.bf16 %v2399_v57, %v2398_v56 }
 0x360   : > { %v5725_v0 = vpop.f32.mrb[23].mxu1 }
 0x361   : > { %v2368_v4 = vadd.f32 %v5723_v1, %v7679_v3  ;;  %v5726_v5 = vadd.f32 %v5725_v0, %v5724_v2  ;;  %5853 = vmatprep.mubr.bf16.mxu1 %v2410_v63 }
 0x363   : > { %v2371_v6 = vadd.f32 %v5726_v5, %v7679_v3  ;;  %v2400_v7 = vmax.f32 %v2368_v4, 0.0 }
 0x365   : > { %v2401_v8 = vmax.f32 %v2371_v6, 0.0  ;;  %v5727_v9 = vpop.f32.mrb[24].mxu1 }
 0x366   : > { %v5728_v10 = vpop.f32.mrb[25].mxu1 }
 0x367   : > { %v5729_v11 = vadd.f32 %v5728_v10, %v5727_v9  ;;  %v5730_v12 = vpop.f32.mrb[26].mxu1  ;;  %v2411_v13 = vpack.c.bf16 %v2401_v8, %v2400_v7 }
 0x368   : > { %v5731_v14 = vpop.f32.mrb[27].mxu1 }
 0x369   : > { %v2376_v15 = vadd.f32 %v5729_v11, %v7679_v3  ;;  %v5732_v16 = vadd.f32 %v5731_v14, %v5730_v12  ;;  %5854 = vmatmul.mubr.bf16.gmra.mrb[40].mxu1 %v2411_v13 }
 0x36b   : > { %v2379_v17 = vadd.f32 %v5732_v16, %v7679_v3  ;;  %v2402_v18 = vmax.f32 %v2376_v15, 0.0 }
 0x36d   : > { %v2403_v19 = vmax.f32 %v2379_v17, 0.0  ;;  %v5733_v20 = vpop.f32.mrb[28].mxu1 }
 0x36e   : > { %v5734_v21 = vpop.f32.mrb[29].mxu1 }
 0x36f   : > { %v5735_v22 = vadd.f32 %v5734_v21, %v5733_v20  ;;  %v5736_v23 = vpop.f32.mrb[30].mxu1  ;;  %v2412_v24 = vpack.c.bf16 %v2403_v19, %v2402_v18 }
 0x370   : > { %v5737_v25 = vpop.f32.mrb[31].mxu1 }
 0x371   : > { %v2384_v26 = vadd.f32 %v5735_v22, %v7679_v3  ;;  %v5738_v27 = vadd.f32 %v5737_v25, %v5736_v23  ;;  %5857 = vmatprep.mubr.bf16.mxu1 %v2412_v24 }
 0x373   : > { %v2387_v28 = vadd.f32 %v5738_v27, %v7679_v3  ;;  %v2404_v29 = vmax.f32 %v2384_v26, 0.0  ;;  %v7709_v3 = vld [vmem:[%s8831_s7] ss:$0 sm:$0xff] }
 0x375   : > { %v2405_v30 = vmax.f32 %v2387_v28, 0.0 }
 0x377   : > { %v2413_v31 = vpack.c.bf16 %v2405_v30, %v2404_v29 }
 0x379   : > { %5858 = vmatmul.mubr.bf16.gmra.mrb[44].mxu1 %v2413_v31 }
 0x41c   : > { %v5847_v34 = vpop.f32.mrb[32].mxu1 }
 0x41d   : > { %v7718_v35 = vadd.f32 %v5847_v34, %v7709_v3  ;;  %v2519_v36 = vpop.f32.mrb[33].mxu1 }
 0x41e   : > { %v7721_v37 = vadd.f32 %v7709_v3, %v2519_v36  ;;  %v5848_v38 = vpop.f32.mrb[34].mxu1 }
 0x41f   : > { %v2584_v39 = vmul.f32 0.5, %v7718_v35  ;;  %5039 = vst.msk [vmem:[%s7715_s28 + $0x10] sm:$0xff] %vm2773_vm0, %v7718_v35  ;;  %v7728_v40 = vadd.f32 %v5848_v38, %v7709_v3  ;;  %v2522_v41 = vpop.f32.mrb[35].mxu1 }
 0x420   : > { %v2582_v42 = vmul.f32 0.5, %v7721_v37  ;;  %5037 = vst.msk [vmem:[%s7715_s28] sm:$0xff] %vm2773_vm0, %v7721_v37  ;;  %v7735_v44 = vadd.f32 %v7709_v3, %v2522_v41 }
 0x421   : > { %v2602_v45 = vmul.f32 1.442695, %v2584_v39  ;;  %v2585_v46 = vmul.f32 0.5, %v7728_v40  ;;  %5040 = vst.msk [vmem:[%s7715_s28 + $0x18] sm:$0xff] %vm2773_vm0, %v7728_v40 }
 0x422   : > { %v2598_v47 = vmul.f32 1.442695, %v2582_v42  ;;  %v2583_v48 = vmul.f32 0.5, %v7735_v44  ;;  %5038 = vst.msk [vmem:[%s7715_s28 + $0x8] sm:$0xff] %vm2773_vm0, %v7735_v44 }
 0x423   : > { %6563 = vpow2.f32 %v2602_v45  ;;  %v2604_v49 = vmul.f32 1.442695, %v2585_v46 }
 0x424   : > { %6565 = vpow2.f32 %v2598_v47  ;;  %v2600_v50 = vmul.f32 1.442695, %v2583_v48 }
 0x425   : > { %6567 = vpow2.f32 %v2604_v49 }
 0x426   : > { %6569 = vpow2.f32 %v2600_v50 }
 0x42c   : > { %v5851_v51 = vpop.f32.mrb[36].mxu1 }
 0x42d   : > { %v6564_v52 = vpop.eup %6563  ;;  %v7746_v53 = vadd.f32 %v5851_v51, %v7709_v3  ;;  %v2535_v54 = vpop.f32.mrb[37].mxu1 }
 0x42e   : > { %v6566_v55 = vpop.eup %6565  ;;  %v7749_v56 = vadd.f32 %v7709_v3, %v2535_v54  ;;  %2666 = vrot.lane.b32.xlu1 %v6564_v52, %s7210_s12  ;;  %v5852_v57 = vpop.f32.mrb[38].mxu1 }
 0x42f   : > { %5043 = vst.msk [vmem:[%s7715_s28 + $0x30] sm:$0xff] %vm2773_vm0, %v7746_v53  ;;  %v7756_v58 = vadd.f32 %v5852_v57, %v7709_v3  ;;  %v2538_v61 = vpop.f32.mrb[39].mxu1  ;;  %2662 = vrot.lane.b32.xlu0 %v6566_v55, %s7210_s12  ;;  %v2588_v1 = vmul.f32 0.5, %v7746_v53  ;;  %v6568_v0 = vpop.eup %6567 }
 0x430   : > { %v2586_v2 = vmul.f32 0.5, %v7749_v56  ;;  %5041 = vst.msk [vmem:[%s7715_s28 + $0x20] sm:$0xff] %vm2773_vm0, %v7749_v56  ;;  %v7765_v63 = vadd.f32 %v7709_v3, %v2538_v61  ;;  %v6570_v4 = vpop.eup %6569 }
 0x431   : > { %5044 = vst.msk [vmem:[%s7715_s28 + $0x38] sm:$0xff] %vm2773_vm0, %v7756_v58  ;;  %v2589_v6 = vmul.f32 0.5, %v7756_v58  ;;  %v2610_v8 = vmul.f32 1.442695, %v2588_v1 }
 0x432   : > { %v2606_v5 = vmul.f32 1.442695, %v2586_v2  ;;  %v2587_v7 = vmul.f32 0.5, %v7765_v63  ;;  %5042 = vst.msk [vmem:[%s7715_s28 + $0x28] sm:$0xff] %vm2773_vm0, %v7765_v63  ;;  %2668 = vrot.lane.b32.xlu1 %v6568_v0, %s7210_s12  ;;  %v6381_v0 = vld [vmem:[%s8834_s10 + $0x4] ss:$8 sps:$4 sm:$0xff]  }
 0x433   : > { %2664 = vrot.lane.b32.xlu0 %v6570_v4, %s7210_s12  ;;  %v2612_v10 = vmul.f32 1.442695, %v2589_v6  ;;  %3027 = vmatprep.subr.bf16.mxu1 %v6381_v0 }
 0x434   : > { %6571 = vpow2.f32 %v2606_v5  ;;  %v2608_v9 = vmul.f32 1.442695, %v2587_v7  ;;  %v2630_v5 = vld [vmem:[%s7884_s27] sm:$0xff]  ;;  %v2632_v7 = vld [vmem:[%s7884_s27 + $0x10] sm:$0xff] }
 0x436   : > { %6573 = vpow2.f32 %v2608_v9  ;;  %v2631_v9 = vld [vmem:[%s7884_s27 + $0x8] sm:$0xff] }
 0x437   : > { %6575 = vpow2.f32 %v2610_v8  ;;  %v2633_v8 = vld [vmem:[%s7884_s27 + $0x18] sm:$0xff] }
 0x438   : > { %6577 = vpow2.f32 %v2612_v10 }
 0x43c   : > { %v5855_v11 = vpop.f32.mrb[40].mxu1 }
 0x43d   : > { %v7778_v12 = vadd.f32 %v5855_v11, %v7709_v3  ;;  %v2551_v13 = vpop.f32.mrb[41].mxu1 }
 0x43e   : > { %v6572_v14 = vpop.eup %6571  ;;  %v7781_v15 = vadd.f32 %v7709_v3, %v2551_v13  ;;  %v5856_v16 = vpop.f32.mrb[42].mxu1 }
 0x43f   : > { %5047 = vst.msk [vmem:[%s7715_s28 + $0x50] sm:$0xff] %vm2773_vm0, %v7778_v12  ;;  %v7787_v17 = vadd.f32 %v5856_v16, %v7709_v3  ;;  %v2554_v18 = vpop.f32.mrb[43].mxu1  ;;  %2670 = vrot.lane.b32.xlu0 %v6572_v14, %s7210_s12  ;;  %v2592_v20 = vmul.f32 0.5, %v7778_v12 }
 0x440   : > { %v6574_v19 = vpop.eup %6573  ;;  %v2590_v21 = vmul.f32 0.5, %v7781_v15  ;;  %5045 = vst.msk [vmem:[%s7715_s28 + $0x40] sm:$0xff] %vm2773_vm0, %v7781_v15  ;;  %v7796_v22 = vadd.f32 %v7709_v3, %v2554_v18 }
 0x441   : > { %5048 = vst.msk [vmem:[%s7715_s28 + $0x58] sm:$0xff] %vm2773_vm0, %v7787_v17  ;;  %2672 = vrot.lane.b32.xlu1 %v6574_v19, %s7210_s12  ;;  %v6576_v23 = vpop.eup %6575  ;;  %v2593_v25 = vmul.f32 0.5, %v7787_v17  ;;  %v2618_v28 = vmul.f32 1.442695, %v2592_v20 }
 0x442   : > { %v2614_v24 = vmul.f32 1.442695, %v2590_v21  ;;  %v2591_v26 = vmul.f32 0.5, %v7796_v22  ;;  %5046 = vst.msk [vmem:[%s7715_s28 + $0x48] sm:$0xff] %vm2773_vm0, %v7796_v22  ;;  %v6578_v27 = vpop.eup %6577 }
 0x443   : > { %2674 = vrot.lane.b32.xlu0 %v6576_v23, %s7210_s12  ;;  %v2620_v30 = vmul.f32 1.442695, %v2593_v25  ;;  %v6379_v25 = vld [vmem:[%s8834_s10] ss:$8 sps:$4 sm:$0xff]  }
 0x444   : > { %6579 = vpow2.f32 %v2614_v24  ;;  %v2616_v29 = vmul.f32 1.442695, %v2591_v26 }
 0x445   : > { %2676 = vrot.lane.b32.xlu1 %v6578_v27, %s7210_s12  ;;  %v6384_v27 = vld [vmem:[%s8834_s10 + $0x14] ss:$8 sps:$4 sm:$0xff]  }
 0x446   : > { %6581 = vpow2.f32 %v2616_v29 }
 0x447   : > { %6583 = vpow2.f32 %v2618_v28  ;;  %v2635_v28 = vld [vmem:[%s7884_s27 + $0x28] sm:$0xff] }
 0x448   : > { %6585 = vpow2.f32 %v2620_v30  ;;  %v6385_v30 = vld [vmem:[%s8834_s10 + $0x20] ss:$8 sps:$4 sm:$0xff]  }
 0x44c   : > { %v5859_v31 = vpop.f32.mrb[44].mxu1 }
 0x44d   : > { %v7810_v32 = vadd.f32 %v5859_v31, %v7709_v3  ;;  %v2567_v33 = vpop.f32.mrb[45].mxu1 }
 0x44e   : > { %v6580_v34 = vpop.eup %6579  ;;  %v7813_v36 = vadd.f32 %v7709_v3, %v2567_v33  ;;  %v5860_v38 = vpop.f32.mrb[46].mxu1  ;;  %v2636_v33 = vld [vmem:[%s7884_s27 + $0x30] sm:$0xff] }
 0x44f   : > { %5051 = vst.msk [vmem:[%s7715_s28 + $0x70] sm:$0xff] %vm2773_vm0, %v7810_v32  ;;  %v7819_v39 = vadd.f32 %v5860_v38, %v7709_v3  ;;  %v2570_v41 = vpop.f32.mrb[47].mxu1  ;;  %2678 = vrot.lane.b32.xlu0 %v6580_v34, %s7210_s12  ;;  %v2596_v45 = vmul.f32 0.5, %v7810_v32  ;;  %v6390_v34 = vld [vmem:[%s8834_s10 + $0x34] ss:$8 sps:$4 sm:$0xff]  }
 0x450   : > { %v6582_v42 = vpop.eup %6581  ;;  %v2594_v46 = vmul.f32 0.5, %v7813_v36  ;;  %5049 = vst.msk [vmem:[%s7715_s28 + $0x60] sm:$0xff] %vm2773_vm0, %v7813_v36  ;;  %v7828_v47 = vadd.f32 %v7709_v3, %v2570_v41 }
 0x451   : > { %5052 = vst.msk [vmem:[%s7715_s28 + $0x78] sm:$0xff] %vm2773_vm0, %v7819_v39  ;;  %2680 = vrot.lane.b32.xlu1 %v6582_v42, %s7210_s12  ;;  %v6584_v48 = vpop.eup %6583  ;;  %v2597_v50 = vmul.f32 0.5, %v7819_v39  ;;  %v2626_v54 = vmul.f32 1.442695, %v2596_v45  ;;  %v2637_v42 = vld [vmem:[%s7884_s27 + $0x38] sm:$0xff] }
 0x452   : > { %v2622_v49 = vmul.f32 1.442695, %v2594_v46  ;;  %v2595_v51 = vmul.f32 0.5, %v7828_v47  ;;  %5050 = vst.msk [vmem:[%s7715_s28 + $0x68] sm:$0xff] %vm2773_vm0, %v7828_v47  ;;  %v6586_v52 = vpop.eup %6585 }
 0x453   : > { %2682 = vrot.lane.b32.xlu0 %v6584_v48, %s7210_s12  ;;  %v2628_v55 = vmul.f32 1.442695, %v2597_v50 }
 0x454   : > { %6587 = vpow2.f32 %v2622_v49  ;;  %v2624_v3 = vmul.f32 1.442695, %v2595_v51  ;;  %v6388_v49 = vld [vmem:[%s8834_s10 + $0x30] ss:$8 sps:$4 sm:$0xff]   ;;  %v6393_v51 = vld [vmem:[%s8834_s10 + $0x44] ss:$8 sps:$4 sm:$0xff]  }
 0x455   : > { %2684 = vrot.lane.b32.xlu1 %v6586_v52, %s7210_s12 }
 0x456   : > { %6589 = vpow2.f32 %v2624_v3  ;;  %v6391_v3 = vld [vmem:[%s8834_s10 + $0x40] ss:$8 sps:$4 sm:$0xff]  }
 0x457   : > { %6591 = vpow2.f32 %v2626_v54 }
 0x458   : > { %6593 = vpow2.f32 %v2628_v55 }
 0x45e   : > { %v6588_v57 = vpop.eup %6587 }
 0x45f   : > { %2686 = vrot.lane.b32.xlu0 %v6588_v57, %s7210_s12  ;;  %v6396_v57 = vld [vmem:[%s8834_s10 + $0x54] ss:$8 sps:$4 sm:$0xff]  }
 0x460   : > { %v6590_v61 = vpop.eup %6589 }
 0x461   : > { %2688 = vrot.lane.b32.xlu1 %v6590_v61, %s7210_s12  ;;  %v6592_v1 = vpop.eup %6591 }
 0x462   : > { %v6594_v2 = vpop.eup %6593 }
 0x463   : > { %2690 = vrot.lane.b32.xlu0 %v6592_v1, %s7210_s12  ;;  %v2639_v1 = vld [vmem:[%s7884_s27 + $0x48] sm:$0xff] }
 0x465   : > { %2692 = vrot.lane.b32.xlu1 %v6594_v2, %s7210_s12 }
 0x467   : > { %5069 = vrot.lane.b32.xlu0 %v7721_v37, %s7210_s12 }
 0x469   : > { %5071 = vrot.lane.b32.xlu1 %v7735_v44, %s7210_s12 }
 0x46b   : > { %5073 = vrot.lane.b32.xlu0 %v7718_v35, %s7210_s12 }
 0x46d   : > { %5075 = vrot.lane.b32.xlu1 %v7728_v40, %s7210_s12 }
 0x46f   : > { %5077 = vrot.lane.b32.xlu0 %v7749_v56, %s7210_s12 }
 0x471   : > { %5079 = vrot.lane.b32.xlu1 %v7765_v63, %s7210_s12 }
 0x473   : > { %5081 = vrot.lane.b32.xlu0 %v7746_v53, %s7210_s12 }
 0x475   : > { %5083 = vrot.lane.b32.xlu1 %v7756_v58, %s7210_s12 }
 0x477   : > { %5085 = vrot.lane.b32.xlu0 %v7781_v15, %s7210_s12 }
 0x479   : > { %5087 = vrot.lane.b32.xlu1 %v7796_v22, %s7210_s12 }
 0x47b   : > { %5089 = vrot.lane.b32.xlu0 %v7778_v12, %s7210_s12 }
 0x47d   : > { %5091 = vrot.lane.b32.xlu1 %v7787_v17, %s7210_s12 }
 0x47f   : > { %5093 = vrot.lane.b32.xlu0 %v7813_v36, %s7210_s12 }
 0x481   : > { %5095 = vrot.lane.b32.xlu1 %v7828_v47, %s7210_s12 }
 0x483   : > { %5097 = vrot.lane.b32.xlu0 %v7810_v32, %s7210_s12 }
 0x485   : > { %5099 = vrot.lane.b32.xlu1 %v7819_v39, %s7210_s12  ;;  %s6029_s12 = smul.u32 14336, %s7320_s25  ;;  %s5134_s25 = scalar_lea.sflag [#allocation4], %s7477_s19 }
 0x487   : > { %s8775_s29 = scalar_lea.hbm %s8881_s16, %s6029_s12 }
 0x4a0   : > { %v2667_v4 = vpop.permute.xlu1 %2666 }
 0x4a1   : > { %v2663_v6 = vpop.permute.xlu0 %2662  ;;  %v2712_v13 = vmul.f32 %v2667_v4, %v2632_v7  ;;  %v2640_v4 = vld [vmem:[%s7884_s27 + $0x50] sm:$0xff]  ;;  %v2641_v7 = vld [vmem:[%s7884_s27 + $0x58] sm:$0xff] }
 0x4a2   : > { %v2710_v10 = vmul.f32 %v2663_v6, %v2630_v5 }
 0x4a3   : > { %v2728_v23 = vadd.f32 %v2712_v13, %v7718_v35  ;;  %v6382_v35 = vld [vmem:[%s8834_s10 + $0x10] ss:$8 sps:$4 sm:$0xff]  }
 0x4a4   : > { %v2669_v11 = vpop.permute.xlu1 %2668  ;;  %v2726_v20 = vadd.f32 %v2710_v10, %v7721_v37  ;;  %v2634_v37 = vld [vmem:[%s7884_s27 + $0x20] sm:$0xff] }
 0x4a5   : > { %v2713_v14 = vmul.f32 %v2669_v11, %v2633_v8  ;;  %v2665_v16 = vpop.permute.xlu0 %2664 }
 0x4a6   : > { %v2711_v18 = vmul.f32 %v2665_v16, %v2631_v9 }
 0x4a7   : > { %v2729_v19 = vadd.f32 %v2713_v14, %v7728_v40  ;;  %v6387_v40 = vld [vmem:[%s8834_s10 + $0x24] ss:$8 sps:$4 sm:$0xff]  }
 0x4a8   : > { %v2727_v21 = vadd.f32 %v2711_v18, %v7735_v44 }
 0x4a9   : > { %v2743_v26 = vpack.c.bf16 %v2729_v19, %v2728_v23 }
 0x4aa   : > { %v2742_v24 = vpack.c.bf16 %v2727_v21, %v2726_v20  ;;  %v2642_v20 = vld [vmem:[%s7884_s27 + $0x60] sm:$0xff]  ;;  %v2643_v21 = vld [vmem:[%s7884_s27 + $0x68] sm:$0xff] }
 0x4ac   : > { %5865 = vmatprep.mubr.msk.bf16.mxu1 %vm2773_vm0, %v2742_v24  ;;  %v2644_v24 = vld [vmem:[%s7884_s27 + $0x70] sm:$0xff] }
 0x4ad   : > { %5866 = vmatmul.mubr.msk.bf16.vlgmr.msra.gmra.mrb[48].mxu1 %vm2773_vm0, %v2743_v26 }
 0x4ae   : > { %3028 = vmatpush1.bf16.msra.mxu1 %v6379_v25 }
 0x4af   : > { %3029 = vmatprep.subr.bf16.mxu1 %v6384_v27  ;;  %v2645_v27 = vld [vmem:[%s7884_s27 + $0x78] sm:$0xff] }
 0x4b1   : > { %v2671_v44 = vpop.permute.xlu0 %2670 }
 0x4b2   : > { %v2714_v29 = vmul.f32 %v2671_v44, %v2634_v37  ;;  %3030 = vmatpush1.bf16.msra.mxu1 %v6382_v35 }
 0x4b3   : > { %v2673_v31 = vpop.permute.xlu1 %2672  ;;  %3031 = vmatprep.subr.bf16.mxu1 %v6387_v40 }
 0x4b4   : > { %v2715_v38 = vmul.f32 %v2673_v31, %v2635_v28  ;;  %v2730_v45 = vadd.f32 %v2714_v29, %v7749_v56 }
 0x4b5   : > { %v2675_v41 = vpop.permute.xlu0 %2674 }
 0x4b6   : > { %v2731_v46 = vadd.f32 %v2715_v38, %v7765_v63  ;;  %v2716_v48 = vmul.f32 %v2675_v41, %v2636_v33  ;;  %3032 = vmatpush1.bf16.msra.mxu1 %v6385_v30 }
 0x4b7   : > { %v2677_v50 = vpop.permute.xlu1 %2676  ;;  %3033 = vmatprep.subr.bf16.mxu1 %v6390_v34 }
 0x4b8   : > { %v2744_v52 = vpack.c.bf16 %v2731_v46, %v2730_v45  ;;  %v2717_v54 = vmul.f32 %v2677_v50, %v2637_v42  ;;  %v2732_v56 = vadd.f32 %v2716_v48, %v7746_v53  ;;  %v2638_v53 = vld [vmem:[%s7884_s27 + $0x40] sm:$0xff]  ;;  %s7134_s27 = sshll.u32 %s7211_s11, 4  ;;  %s7135_s27 = int_to_ptr.vmem [resolvable:$false] %s7134_s27 }
 0x4b9   : > { %s7136_s18 = scalar_lea.vmem %s7135_s27, 28672  ;;  %p7137_p9 = scmp.lt.s32.totalorder %s8778_s2, %s7135_s27 }
 0x4ba   : > { %v2733_v63 = vadd.f32 %v2717_v54, %v7756_v58  ;;  %5869 = vmatprep.mubr.msk.bf16.mxu1 %vm2773_vm0, %v2744_v52  ;;  %3034 = vmatpush1.bf16.msra.mxu1 %v6388_v49  ;;  %v6394_v58 = vld [vmem:[%s8834_s10 + $0x50] ss:$8 sps:$4 sm:$0xff]   ;;  %v6399_v52 = vld [vmem:[%s8834_s10 + $0x64] ss:$8 sps:$4 sm:$0xff]   ;;  %v6397_v54 = vld [vmem:[%s8834_s10 + $0x60] ss:$8 sps:$4 sm:$0xff]  }
 0x4bb   : > { %3035 = vmatprep.subr.bf16.mxu1 %v6393_v51 }
 0x4bc   : > { %v2745_v55 = vpack.c.bf16 %v2733_v63, %v2732_v56  ;;  %v6402_v56 = vld [vmem:[%s8834_s10 + $0x74] ss:$8 sps:$4 sm:$0xff]   ;;  %v6400_v63 = vld [vmem:[%s8834_s10 + $0x70] ss:$8 sps:$4 sm:$0xff]  }
 0x4be   : > { %5870 = vmatmul.mubr.msk.bf16.gmra.mrb[52].mxu1 %vm2773_vm0, %v2745_v55  ;;  %v6406_v55 = vld [vmem:[#allocation7 + $0x10] ss:$28 sps:$4 sm:$0xff]  }
 0x4bf   : > { %3036 = vmatpush1.bf16.msra.mxu1 %v6391_v3  ;;  %v6405_v3 = vld [vmem:[#allocation7 + $0x4] ss:$28 sps:$4 sm:$0xff]  }
 0x4c0   : > { %3037 = vmatprep.subr.bf16.mxu1 %v6396_v57  ;;  %v6408_v57 = vld [vmem:[#allocation7 + $0x14] ss:$28 sps:$4 sm:$0xff]  }
 0x4c1   : > { %v2679_v61 = vpop.permute.xlu0 %2678  ;;  %4155 = vmatprep.subr.bf16.mxu0 %v6408_v57 }
 0x4c2   : > { %v2718_v2 = vmul.f32 %v2679_v61, %v2638_v53  ;;  %v6414_v53 = vld [vmem:[#allocation7 + $0x4c] ss:$28 sps:$4 sm:$0xff]   ;;  %4156 = vmatpush1.bf16.msra.mxu0 %v6406_v55  ;;  %v6420_v61 = vld [vmem:[#allocation7 + $0x84] ss:$28 sps:$4 sm:$0xff]  }
 0x4c3   : > { %v2681_v0 = vpop.permute.xlu1 %2680  ;;  %3038 = vmatpush1.bf16.msra.mxu1 %v6394_v58  ;;  %v6412_v58 = vld [vmem:[#allocation7 + $0x48] ss:$28 sps:$4 sm:$0xff]   ;;  %4157 = vmatprep.subr.bf16.mxu0 %v6414_v53 }
 0x4c4   : > { %v2719_v5 = vmul.f32 %v2681_v0, %v2639_v1  ;;  %v2734_v8 = vadd.f32 %v2718_v2, %v7781_v15  ;;  %3039 = vmatprep.subr.bf16.mxu1 %v6399_v52  ;;  %v6418_v1 = vld [vmem:[#allocation7 + $0x80] ss:$28 sps:$4 sm:$0xff]   ;;  %v6424_v0 = vld [vmem:[#allocation7 + $0xb8] ss:$28 sps:$4 sm:$0xff]  }
 0x4c5   : > { %v2683_v6 = vpop.permute.xlu0 %2682  ;;  %v6426_v2 = vld [vmem:[#allocation7 + $0xbc] ss:$28 sps:$4 sm:$0xff]  }
 0x4c6   : > { %v2735_v9 = vadd.f32 %v2719_v5, %v7796_v22  ;;  %v2720_v10 = vmul.f32 %v2683_v6, %v2640_v4  ;;  %4158 = vmatpush1.bf16.msra.mxu0 %v6412_v58  ;;  %v6432_v4 = vld [vmem:[#allocation7 + $0xf4] ss:$28 sps:$4 sm:$0xff]   ;;  %v6438_v6 = vld [vmem:[#allocation7 + $0x12c] ss:$28 sps:$4 sm:$0xff]  }
 0x4c7   : > { %v2685_v11 = vpop.permute.xlu1 %2684  ;;  %3040 = vmatpush1.bf16.msra.mxu1 %v6397_v54  ;;  %4159 = vmatprep.subr.bf16.mxu0 %v6420_v61  ;;  %v6430_v5 = vld [vmem:[#allocation7 + $0xf0] ss:$28 sps:$4 sm:$0xff]   ;;  %v6427_v61 = vld [vmem:[#allocation7 + $0xe0] ss:$28 sps:$4 sm:$0xff]  }
 0x4c8   : > { %v2746_v13 = vpack.c.bf16 %v2735_v9, %v2734_v8  ;;  %v2721_v14 = vmul.f32 %v2685_v11, %v2641_v7  ;;  %v2736_v16 = vadd.f32 %v2720_v10, %v7778_v12  ;;  %3041 = vmatprep.subr.bf16.mxu1 %v6402_v56  ;;  %v6436_v7 = vld [vmem:[#allocation7 + $0x128] ss:$28 sps:$4 sm:$0xff]   ;;  %v6442_v9 = vld [vmem:[#allocation7 + $0x160] ss:$28 sps:$4 sm:$0xff]   ;;  %v6448_v11 = vld [vmem:[#allocation7 + $0x198] ss:$28 sps:$4 sm:$0xff]  }
 0x4c9   : > { %v6444_v8 = vld [vmem:[#allocation7 + $0x164] ss:$28 sps:$4 sm:$0xff]   ;;  %v6450_v10 = vld [vmem:[#allocation7 + $0x19c] ss:$28 sps:$4 sm:$0xff]  }
 0x4ca   : > { %v2737_v18 = vadd.f32 %v2721_v14, %v7787_v17  ;;  %5873 = vmatprep.mubr.msk.bf16.mxu1 %vm2773_vm0, %v2746_v13  ;;  %4160 = vmatpush1.bf16.msra.mxu0 %v6418_v1  ;;  %v6456_v13 = vld [vmem:[#allocation7 + $0x1d4] ss:$28 sps:$4 sm:$0xff]   ;;  %v6429_v56 = vld [vmem:[#allocation7 + $0xe4] ss:$28 sps:$4 sm:$0xff]  }
 0x4cb   : > { %3042 = vmatpush1.bf16.msra.mxu1 %v6400_v63  ;;  %4161 = vmatprep.subr.bf16.mxu0 %v6426_v2  ;;  %v6454_v14 = vld [vmem:[#allocation7 + $0x1d0] ss:$28 sps:$4 sm:$0xff]   ;;  %v6435_v2 = vld [vmem:[#allocation7 + $0x11c] ss:$28 sps:$4 sm:$0xff]  }
 0x4cc   : > { %v2747_v19 = vpack.c.bf16 %v2737_v18, %v2736_v16  ;;  %3929 = vmatprep.subr.bf16.mxu1 %v6405_v3  ;;  %v6462_v16 = vld [vmem:[#allocation7 + $0x20c] ss:$28 sps:$4 sm:$0xff]  }
 0x4cd   : > { %v6460_v18 = vld [vmem:[#allocation7 + $0x208] ss:$28 sps:$4 sm:$0xff]  }
 0x4ce   : > { %5874 = vmatmul.mubr.msk.bf16.gmra.mrb[56].mxu1 %vm2773_vm0, %v2747_v19  ;;  %4162 = vmatpush1.bf16.msra.mxu0 %v6424_v0  ;;  %v6468_v19 = vld [vmem:[#allocation7 + $0x244] ss:$28 sps:$4 sm:$0xff]   ;;  %v6433_v0 = vld [vmem:[#allocation7 + $0x118] ss:$28 sps:$4 sm:$0xff]  }
 0x4cf   : > { %4163 = vmatprep.subr.bf16.mxu0 %v6432_v4  ;;  %v6441_v4 = vld [vmem:[#allocation7 + $0x154] ss:$28 sps:$4 sm:$0xff]  }
 0x4d1   : > { %v2687_v15 = vpop.permute.xlu0 %2686 }
 0x4d2   : > { %v2722_v23 = vmul.f32 %v2687_v15, %v2642_v20  ;;  %4164 = vmatpush1.bf16.msra.mxu0 %v6430_v5  ;;  %v6466_v20 = vld [vmem:[#allocation7 + $0x240] ss:$28 sps:$4 sm:$0xff]   ;;  %v6439_v5 = vld [vmem:[#allocation7 + $0x150] ss:$28 sps:$4 sm:$0xff]  }
 0x4d3   : > { %v2689_v22 = vpop.permute.xlu1 %2688  ;;  %4165 = vmatprep.subr.bf16.mxu0 %v6438_v6  ;;  %v6474_v15 = vld [vmem:[#allocation7 + $0x27c] ss:$28 sps:$4 sm:$0xff]  }
 0x4d4   : > { %v2723_v25 = vmul.f32 %v2689_v22, %v2643_v21  ;;  %v2738_v35 = vadd.f32 %v2722_v23, %v7813_v36  ;;  %v6472_v21 = vld [vmem:[#allocation7 + $0x278] ss:$28 sps:$4 sm:$0xff]   ;;  %v6478_v22 = vld [vmem:[#allocation7 + $0x2b0] ss:$28 sps:$4 sm:$0xff]  }
 0x4d5   : > { %v2691_v26 = vpop.permute.xlu0 %2690  ;;  %v6480_v23 = vld [vmem:[#allocation7 + $0x2b4] ss:$28 sps:$4 sm:$0xff]  }
 0x4d6   : > { %v2739_v12 = vadd.f32 %v2723_v25, %v7828_v47  ;;  %v2724_v17 = vmul.f32 %v2691_v26, %v2644_v24  ;;  %4166 = vmatpush1.bf16.msra.mxu0 %v6436_v7  ;;  %v6486_v24 = vld [vmem:[#allocation7 + $0x2ec] ss:$28 sps:$4 sm:$0xff]   ;;  %v8013_v26 = vld [vmem:[%s8878_s0] ss:$0 sm:$0xff] }
 0x4d7   : > { %v2693_v37 = vpop.permute.xlu1 %2692  ;;  %4167 = vmatprep.subr.bf16.mxu0 %v6444_v8  ;;  %v6484_v25 = vld [vmem:[#allocation7 + $0x2e8] ss:$28 sps:$4 sm:$0xff]  }
 0x4d8   : > { %v2748_v40 = vpack.c.bf16 %v2739_v12, %v2738_v35  ;;  %v2725_v44 = vmul.f32 %v2693_v37, %v2645_v27  ;;  %v2740_v29 = vadd.f32 %v2724_v17, %v7810_v32  ;;  %v6447_v7 = vld [vmem:[#allocation7 + $0x18c] ss:$28 sps:$4 sm:$0xff]  }
 0x4d9   : > { %v5070_v28 = vpop.permute.xlu0 %5069 }
 0x4da   : > { %v2741_v36 = vadd.f32 %v2725_v44, %v7819_v39  ;;  %5117 = vst.msk [vmem:[%s7959_s9] sm:$0xff] %vm2773_vm0, %v5070_v28  ;;  %5877 = vmatprep.mubr.msk.bf16.mxu1 %vm2773_vm0, %v2748_v40  ;;  %4168 = vmatpush1.bf16.msra.mxu0 %v6442_v9 }
 0x4db   : > { %v5072_v47 = vpop.permute.xlu1 %5071  ;;  %4169 = vmatprep.subr.bf16.mxu0 %v6450_v10 }
 0x4dc   : > { %v2749_v30 = vpack.c.bf16 %v2741_v36, %v2740_v29  ;;  %5118 = vst.msk [vmem:[%s7959_s9 + $0x8] sm:$0xff] %vm2773_vm0, %v5072_v47 }
 0x4dd   : > { %v5074_v31 = vpop.permute.xlu0 %5073 }
 0x4de   : > { %5119 = vst.msk [vmem:[%s7959_s9 + $0x10] sm:$0xff] %vm2773_vm0, %v5074_v31  ;;  %5878 = vmatmul.mubr.msk.bf16.gmra.mrb[60].mxu1 %vm2773_vm0, %v2749_v30  ;;  %4170 = vmatpush1.bf16.msra.mxu0 %v6448_v11 }
 0x4df   : > { %v5076_v32 = vpop.permute.xlu1 %5075  ;;  %3059 = vmatprep.mubr.bf16.mxu1 %v7209_v43  ;;  %4171 = vmatprep.subr.bf16.mxu0 %v6456_v13 }
 0x4e0   : > { %5120 = vst.msk [vmem:[%s7959_s9 + $0x18] sm:$0xff] %vm2773_vm0, %v5076_v32  ;;  %v6403_v32 = vld [vmem:[#allocation7] ss:$28 sps:$4 sm:$0xff]  }
 0x4e1   : > { %v5078_v39 = vpop.permute.xlu0 %5077 }
 0x4e2   : > { %5121 = vst.msk [vmem:[%s7959_s9 + $0x20] sm:$0xff] %vm2773_vm0, %v5078_v39  ;;  %4172 = vmatpush1.bf16.msra.mxu0 %v6454_v14 }
 0x4e3   : > { %v5080_v33 = vpop.permute.xlu1 %5079  ;;  %4173 = vmatprep.subr.bf16.mxu0 %v6462_v16  ;;  %v6445_v16 = vld [vmem:[#allocation7 + $0x188] ss:$28 sps:$4 sm:$0xff]  }
 0x4e4   : > { %5122 = vst.msk [vmem:[%s7959_s9 + $0x28] sm:$0xff] %vm2773_vm0, %v5080_v33  ;;  %v6411_v33 = vld [vmem:[#allocation7 + $0x3c] ss:$28 sps:$4 sm:$0xff]  }
 0x4e5   : > { %v5082_v34 = vpop.permute.xlu0 %5081 }
 0x4e6   : > { %5123 = vst.msk [vmem:[%s7959_s9 + $0x30] sm:$0xff] %vm2773_vm0, %v5082_v34  ;;  %4174 = vmatpush1.bf16.msra.mxu0 %v6460_v18  ;;  %v6409_v34 = vld [vmem:[#allocation7 + $0x38] ss:$28 sps:$4 sm:$0xff]  }
 0x4e7   : > { %v5084_v38 = vpop.permute.xlu1 %5083  ;;  %4175 = vmatprep.subr.bf16.mxu0 %v6468_v19  ;;  %v6453_v19 = vld [vmem:[#allocation7 + $0x1c4] ss:$28 sps:$4 sm:$0xff]  }
 0x4e8   : > { %5124 = vst.msk [vmem:[%s7959_s9 + $0x38] sm:$0xff] %vm2773_vm0, %v5084_v38  ;;  %v6417_v38 = vld [vmem:[#allocation7 + $0x74] ss:$28 sps:$4 sm:$0xff]  }
 0x4e9   : > { %v5086_v41 = vpop.permute.xlu0 %5085 }
 0x4ea   : > { %5125 = vst.msk [vmem:[%s7959_s9 + $0x40] sm:$0xff] %vm2773_vm0, %v5086_v41  ;;  %4176 = vmatpush1.bf16.msra.mxu0 %v6466_v20  ;;  %v6415_v41 = vld [vmem:[#allocation7 + $0x70] ss:$28 sps:$4 sm:$0xff]  }
 0x4eb   : > { %v5088_v42 = vpop.permute.xlu1 %5087  ;;  %4177 = vmatprep.subr.bf16.mxu0 %v6474_v15 }
 0x4ec   : > { %5126 = vst.msk [vmem:[%s7959_s9 + $0x48] sm:$0xff] %vm2773_vm0, %v5088_v42  ;;  %v6423_v42 = vld [vmem:[#allocation7 + $0xac] ss:$28 sps:$4 sm:$0xff]  }
 0x4ed   : > { %v5090_v45 = vpop.permute.xlu0 %5089 }
 0x4ee   : > { %5127 = vst.msk [vmem:[%s7959_s9 + $0x50] sm:$0xff] %vm2773_vm0, %v5090_v45  ;;  %4178 = vmatpush1.bf16.msra.mxu0 %v6472_v21 }
 0x4ef   : > { %v5092_v46 = vpop.permute.xlu1 %5091  ;;  %4179 = vmatprep.subr.bf16.mxu0 %v6480_v23 }
 0x4f0   : > { %5128 = vst.msk [vmem:[%s7959_s9 + $0x58] sm:$0xff] %vm2773_vm0, %v5092_v46 }
 0x4f1   : > { %v5094_v48 = vpop.permute.xlu0 %5093 }
 0x4f2   : > { %5129 = vst.msk [vmem:[%s7959_s9 + $0x60] sm:$0xff] %vm2773_vm0, %v5094_v48  ;;  %4180 = vmatpush1.bf16.msra.mxu0 %v6478_v22 }
 0x4f3   : > { %v5096_v49 = vpop.permute.xlu1 %5095  ;;  %4181 = vmatprep.subr.bf16.mxu0 %v6486_v24  ;;  %v6451_v24 = vld [vmem:[#allocation7 + $0x1c0] ss:$28 sps:$4 sm:$0xff]  }
 0x4f4   : > { %5130 = vst.msk [vmem:[%s7959_s9 + $0x68] sm:$0xff] %vm2773_vm0, %v5096_v49 }
 0x4f5   : > { %v5098_v50 = vpop.permute.xlu0 %5097 }
 0x4f6   : > { %5131 = vst.msk [vmem:[%s7959_s9 + $0x70] sm:$0xff] %vm2773_vm0, %v5098_v50  ;;  %4182 = vmatpush1.bf16.msra.mxu0 %v6484_v25 }
 0x4f7   : > { %v5100_v51 = vpop.permute.xlu1 %5099 }
 0x4f8   : > { %5132 = vst.msk [vmem:[%s7959_s9 + $0x78] sm:$0xff] %vm2773_vm0, %v5100_v51  ;;  %v6421_v51 = vld [vmem:[#allocation7 + $0xa8] ss:$28 sps:$4 sm:$0xff]   ;;  %s8879_s9 = sld [smem:[#allocation18_spill]] }
 0x580   : > { %v5867_v27 = vpop.f32.mrb[48].mxu1 }
 0x581   : > { %v2841_v35 = vadd.f32 %v5867_v27, %v8013_v26  ;;  %v2832_v12 = vpop.f32.mrb[49].mxu1  ;;  %v6459_v27 = vld [vmem:[#allocation7 + $0x1fc] ss:$28 sps:$4 sm:$0xff]  }
 0x582   : > { %v2833_v17 = vadd.f32 %v8013_v26, %v2832_v12  ;;  %v5868_v37 = vpop.f32.mrb[50].mxu1  ;;  %v6465_v12 = vld [vmem:[#allocation7 + $0x234] ss:$28 sps:$4 sm:$0xff]  }
 0x583   : > { %v2844_v40 = vadd.f32 %v5868_v37, %v8013_v26  ;;  %v2835_v44 = vpop.f32.mrb[51].mxu1  ;;  %v2897_v29 = vmax.f32 %v2841_v35, 0.0  ;;  %v6457_v35 = vld [vmem:[#allocation7 + $0x1f8] ss:$28 sps:$4 sm:$0xff]  }
 0x584   : > { %v2836_v28 = vadd.f32 %v8013_v26, %v2835_v44  ;;  %v2895_v47 = vmax.f32 %v2833_v17, 0.0  ;;  %v6463_v17 = vld [vmem:[#allocation7 + $0x230] ss:$28 sps:$4 sm:$0xff]  }
 0x585   : > { %v2898_v36 = vmax.f32 %v2844_v40, 0.0  ;;  %v6471_v40 = vld [vmem:[#allocation7 + $0x26c] ss:$28 sps:$4 sm:$0xff]  }
 0x586   : > { %v2896_v30 = vmax.f32 %v2836_v28, 0.0 }
 0x587   : > { %v2912_v31 = vpack.c.bf16 %v2898_v36, %v2897_v29 }
 0x588   : > { %v2911_v39 = vpack.c.bf16 %v2896_v30, %v2895_v47 }
 0x58a   : > { %3060 = vmatmul.mubr.bf16.vlgmr.msra.gmra.mrb[64].mxu1 %v2911_v39  ;;  %v6477_v39 = vld [vmem:[#allocation7 + $0x2a4] ss:$28 sps:$4 sm:$0xff]  }
 0x58b   : > { %3069 = vmatprep.mubr.bf16.mxu1 %v7209_v43  ;;  %3930 = vmatpush1.bf16.msra.mxu1 %v6403_v32 }
 0x58c   : > { %3931 = vmatprep.subr.bf16.mxu1 %v6411_v33 }
 0x58f   : > { %3932 = vmatpush1.bf16.msra.mxu1 %v6409_v34 }
 0x590   : > { %3933 = vmatprep.subr.bf16.mxu1 %v6417_v38 }
 0x591   : > { %v5871_v45 = vpop.f32.mrb[52].mxu1 }
 0x592   : > { %v2857_v46 = vadd.f32 %v5871_v45, %v8013_v26  ;;  %v2848_v48 = vpop.f32.mrb[53].mxu1  ;;  %3070 = vmatmul.mubr.bf16.gmra.mrb[68].mxu1 %v2912_v31  ;;  %v6469_v31 = vld [vmem:[#allocation7 + $0x268] ss:$28 sps:$4 sm:$0xff]   ;;  %v6475_v45 = vld [vmem:[#allocation7 + $0x2a0] ss:$28 sps:$4 sm:$0xff]  }
 0x593   : > { %v2849_v49 = vadd.f32 %v8013_v26, %v2848_v48  ;;  %v5872_v50 = vpop.f32.mrb[54].mxu1  ;;  %3079 = vmatprep.mubr.bf16.mxu1 %v7209_v43  ;;  %3934 = vmatpush1.bf16.msra.mxu1 %v6415_v41  ;;  %v6483_v48 = vld [vmem:[#allocation7 + $0x2dc] ss:$28 sps:$4 sm:$0xff]  }
 0x594   : > { %v2860_v52 = vadd.f32 %v5872_v50, %v8013_v26  ;;  %v2851_v54 = vpop.f32.mrb[55].mxu1  ;;  %3935 = vmatprep.subr.bf16.mxu1 %v6423_v42  ;;  %v2901_v3 = vmax.f32 %v2857_v46, 0.0  ;;  %v6492_v50 = vld [vmem:[#allocation7 + $0x324] ss:$28 sps:$4 sm:$0xff]  }
 0x595   : > { %v2852_v63 = vadd.f32 %v8013_v26, %v2851_v54  ;;  %v2899_v57 = vmax.f32 %v2849_v49, 0.0  ;;  %v6481_v49 = vld [vmem:[#allocation7 + $0x2d8] ss:$28 sps:$4 sm:$0xff]   ;;  %4183 = vmatprep.subr.bf16.mxu0 %v6492_v50  ;;  %v6495_v54 = vld [vmem:[#allocation7 + $0x34c] ss:$28 sps:$4 sm:$0xff]  }
 0x596   : > { %v2902_v55 = vmax.f32 %v2860_v52, 0.0  ;;  %v6490_v52 = vld [vmem:[#allocation7 + $0x320] ss:$28 sps:$4 sm:$0xff]  }
 0x597   : > { %v2900_v53 = vmax.f32 %v2852_v63, 0.0  ;;  %3936 = vmatpush1.bf16.msra.mxu1 %v6421_v51  ;;  %v6487_v51 = vld [vmem:[#allocation7 + $0x310] ss:$28 sps:$4 sm:$0xff]   ;;  %4184 = vmatpush1.bf16.msra.mxu0 %v6490_v52  ;;  %v6493_v63 = vld [vmem:[#allocation7 + $0x348] ss:$28 sps:$4 sm:$0xff]  }
 0x598   : > { %v2914_v58 = vpack.c.bf16 %v2902_v55, %v2901_v3  ;;  %3937 = vmatprep.subr.bf16.mxu1 %v6429_v56  ;;  %v6498_v56 = vld [vmem:[#allocation7 + $0x35c] ss:$28 sps:$4 sm:$0xff]  }
 0x599   : > { %v2913_v1 = vpack.c.bf16 %v2900_v53, %v2899_v57  ;;  %v6496_v3 = vld [vmem:[#allocation7 + $0x358] ss:$28 sps:$4 sm:$0xff]   ;;  %4185 = vmatprep.subr.bf16.mxu0 %v6498_v56  ;;  %v2935_v57 = vld [vmem:[%s8879_s9] sm:$0x3]  ;;  %s7130_s9 = scalar_lea.vmem %s8778_s2, 14336 }
 0x59a   : > { %v8038_v55 = vld [vmem:[#allocation7 + $0x1d8] ss:$28 sps:$4 sm:$0xff]   ;;  %v8045_v53 = vrot.slane %v2935_v57, %v7609_v60  ;;  %p7131_p0 = scmp.ne.s32.totalorder %s8778_s2, %s7130_s9  ;;  %p7138_p12 = scmp.lt.s32.totalorder %s7136_s18, %s7130_s9 }
 0x59b   : > { %3080 = vmatmul.mubr.bf16.gmra.mrb[72].mxu1 %v2913_v1  ;;  %4186 = vmatpush1.bf16.msra.mxu0 %v6496_v3  ;;  %v8098_v52 = vld [vmem:[#allocation7 + $0x2b8] ss:$28 sps:$4 sm:$0xff]  }
 0x59c   : > { %3089 = vmatprep.mubr.bf16.mxu1 %v7209_v43  ;;  %3938 = vmatpush1.bf16.msra.mxu1 %v6427_v61  ;;  %p7132_p3 = pnand %p7131_p0, %p8882_p1  ;;  %p7139_p2 = por %p7138_p12, %p7137_p9 }
 0x59d   : > { %3939 = vmatprep.subr.bf16.mxu1 %v6435_v2  ;;  %5765 = vmatprep.subr.bf16.mxu0 %v8038_v55 }
 0x59e   : > { %p7133_p5 = pneg %p7132_p3 }
 0x5a0   : > { %3940 = vmatpush1.bf16.msra.mxu1 %v6433_v0  ;;  %p7140_p13 = pnand %p7139_p2, %p7133_p5 }
 0x5a1   : > { %v5875_v6 = vpop.f32.mrb[56].mxu1  ;;  %3941 = vmatprep.subr.bf16.mxu1 %v6441_v4 }
 0x5a2   : > { %v2873_v8 = vadd.f32 %v5875_v6, %v8013_v26  ;;  %v2864_v9 = vpop.f32.mrb[57].mxu1 }
 0x5a3   : > { %v2865_v10 = vadd.f32 %v8013_v26, %v2864_v9  ;;  %v5876_v11 = vpop.f32.mrb[58].mxu1  ;;  %3090 = vmatmul.mubr.bf16.gmra.mrb[76].mxu1 %v2914_v58  ;;  %v8048_v58 = vrot.slane %v2935_v57, %v7615_v62 }
 0x5a4   : > { %v2876_v13 = vadd.f32 %v5876_v11, %v8013_v26  ;;  %v2867_v14 = vpop.f32.mrb[59].mxu1  ;;  %3099 = vmatprep.mubr.bf16.mxu1 %v7209_v43  ;;  %3942 = vmatpush1.bf16.msra.mxu1 %v6439_v5  ;;  %v2905_v20 = vmax.f32 %v2873_v8, 0.0 }
 0x5a5   : > { %v2868_v18 = vadd.f32 %v8013_v26, %v2867_v14  ;;  %3943 = vmatprep.subr.bf16.mxu1 %v6447_v7  ;;  %v2903_v21 = vmax.f32 %v2865_v10, 0.0 }
 0x5a6   : > { %v2906_v15 = vmax.f32 %v2876_v13, 0.0 }
 0x5a7   : > { %v2904_v23 = vmax.f32 %v2868_v18, 0.0  ;;  %v6499_v18 = vld [vmem:[#allocation7 + $0x8] ss:$28 sps:$4 sm:$0xff]  }
 0x5a8   : > { %v2916_v22 = vpack.c.bf16 %v2906_v15, %v2905_v20  ;;  %3944 = vmatpush1.bf16.msra.mxu1 %v6445_v16 }
 0x5a9   : > { %v2915_v25 = vpack.c.bf16 %v2904_v23, %v2903_v21  ;;  %3945 = vmatprep.subr.bf16.mxu1 %v6453_v19  ;;  %v8058_v19 = vld [vmem:[#allocation7 + $0x18] ss:$28 sps:$4 sm:$0xff]   ;;  %v6504_v21 = vld [vmem:[#allocation7 + $0x44] ss:$28 sps:$4 sm:$0xff]   ;;  %v8061_v23 = vld [vmem:[#allocation7 + $0x210] ss:$28 sps:$4 sm:$0xff]  }
 0x5ab   : > { %3100 = vmatmul.mubr.bf16.gmra.mrb[80].mxu1 %v2915_v25 }
 0x5ac   : > { %3109 = vmatprep.mubr.bf16.mxu1 %v7209_v43  ;;  %3946 = vmatpush1.bf16.msra.mxu1 %v6451_v24 }
 0x5ad   : > { %3947 = vmatprep.subr.bf16.mxu1 %v6459_v27 }
 0x5b0   : > { %3948 = vmatpush1.bf16.msra.mxu1 %v6457_v35 }
 0x5b1   : > { %v5879_v37 = vpop.f32.mrb[60].mxu1  ;;  %3949 = vmatprep.subr.bf16.mxu1 %v6465_v12  ;;  %v6502_v12 = vld [vmem:[#allocation7 + $0x40] ss:$28 sps:$4 sm:$0xff]  }
 0x5b2   : > { %v2889_v44 = vadd.f32 %v5879_v37, %v8013_v26  ;;  %v2880_v28 = vpop.f32.mrb[61].mxu1 }
 0x5b3   : > { %v2881_v29 = vadd.f32 %v8013_v26, %v2880_v28  ;;  %v5880_v36 = vpop.f32.mrb[62].mxu1  ;;  %3110 = vmatmul.mubr.bf16.gmra.mrb[84].mxu1 %v2916_v22  ;;  %v8074_v28 = vld [vmem:[#allocation7 + $0x248] ss:$28 sps:$4 sm:$0xff]  }
 0x5b4   : > { %v2892_v47 = vadd.f32 %v5880_v36, %v8013_v26  ;;  %v2883_v30 = vpop.f32.mrb[63].mxu1  ;;  %3119 = vmatprep.mubr.bf16.mxu1 %v7209_v43  ;;  %3950 = vmatpush1.bf16.msra.mxu1 %v6463_v17  ;;  %v2909_v33 = vmax.f32 %v2889_v44, 0.0  ;;  %v8071_v17 = vld [vmem:[#allocation7 + $0x50] ss:$28 sps:$4 sm:$0xff]   ;;  %v6507_v44 = vld [vmem:[#allocation7 + $0x7c] ss:$28 sps:$4 sm:$0xff]  }
 0x5b5   : > { %v2884_v32 = vadd.f32 %v8013_v26, %v2883_v30  ;;  %3951 = vmatprep.subr.bf16.mxu1 %v6471_v40  ;;  %v2907_v38 = vmax.f32 %v2881_v29, 0.0  ;;  %v6489_v26 = vld [vmem:[#allocation7 + $0x314] ss:$28 sps:$4 sm:$0xff]  }
 0x5b6   : > { %v2910_v34 = vmax.f32 %v2892_v47, 0.0 }
 0x5b7   : > { %v2908_v41 = vmax.f32 %v2884_v32, 0.0  ;;  %v8081_v32 = vld [vmem:[#allocation7 + $0x88] ss:$28 sps:$4 sm:$0xff]  }
 0x5b8   : > { %v2918_v42 = vpack.c.bf16 %v2910_v34, %v2909_v33  ;;  %3952 = vmatpush1.bf16.msra.mxu1 %v6469_v31  ;;  %v6505_v31 = vld [vmem:[#allocation7 + $0x78] ss:$28 sps:$4 sm:$0xff]   ;;  %v8084_v34 = vld [vmem:[#allocation7 + $0x280] ss:$28 sps:$4 sm:$0xff]  }
 0x5b9   : > { %v2917_v46 = vpack.c.bf16 %v2908_v41, %v2907_v38  ;;  %3953 = vmatprep.subr.bf16.mxu1 %v6477_v39  ;;  %v6510_v33 = vld [vmem:[#allocation7 + $0xb4] ss:$28 sps:$4 sm:$0xff]  }
 0x5bb   : > { %3120 = vmatmul.mubr.bf16.gmra.mrb[88].mxu1 %v2917_v46 }
 0x5bc   : > { %3129 = vmatprep.mubr.bf16.mxu1 %v7209_v43  ;;  %3954 = vmatpush1.bf16.msra.mxu1 %v6475_v45  ;;  %v6501_v43 = vld [vmem:[#allocation7 + $0xc] ss:$28 sps:$4 sm:$0xff]  }
 0x5bd   : > { %3955 = vmatprep.subr.bf16.mxu1 %v6483_v48 }
 0x5c0   : > { %3956 = vmatpush1.bf16.msra.mxu1 %v6481_v49  ;;  %v6508_v49 = vld [vmem:[#allocation7 + $0xb0] ss:$28 sps:$4 sm:$0xff]  }
 0x5c1   : > { %3957 = vmatprep.subr.bf16.mxu1 %v6489_v26  ;;  %v8094_v26 = vld [vmem:[#allocation7 + $0xc0] ss:$28 sps:$4 sm:$0xff]  }
 0x5c3   : > { %3130 = vmatmul.mubr.bf16.gmra.mrb[92].mxu1 %v2918_v42 }
 0x5c4   : > { %3958 = vmatpush1.bf16.msra.mxu1 %v6487_v51  ;;  %v6513_v51 = vld [vmem:[#allocation7 + $0xec] ss:$28 sps:$4 sm:$0xff]  }
 0x5c5   : > { %3959 = vmatprep.subr.bf16.mxu1 %v6495_v54 }
 0x5c8   : > { %3960 = vmatpush1.bf16.msra.mxu1 %v6493_v63 }
 0x5c9   : > { %4042 = vmatprep.subr.bf16.mxu1 %v6501_v43 }
 0x65d   : > { %v3061_v61 = vpop.f32.mrb[64].mxu1 }
 0x65e   : > { %v3062_v1 = vadd.f32 %v3061_v61, %v8045_v53  ;;  %v3063_v2 = vpop.f32.mrb[65].mxu1 }
 0x65f   : > { %v3064_v0 = vadd.f32 %v3063_v2, %v8048_v58  ;;  %v3065_v4 = vpop.f32.mrb[66].mxu1  ;;  %v8106_v2 = vld [vmem:[#allocation7 + $0xf8] ss:$28 sps:$4 sm:$0xff]  }
 0x660   : > { %v3066_v5 = vadd.f32 %v3065_v4, %v8045_v53  ;;  %v3067_v6 = vpop.f32.mrb[67].mxu1  ;;  %v3140_v8 = vmax.f32 %v3062_v1, 0.0  ;;  %v6511_v1 = vld [vmem:[#allocation7 + $0xe8] ss:$28 sps:$4 sm:$0xff]  }
 0x661   : > { %v3068_v7 = vadd.f32 %v3067_v6, %v8048_v58  ;;  %v3141_v10 = vmax.f32 %v3064_v0, 0.0  ;;  %v8109_v6 = vld [vmem:[#allocation7 + $0x2f0] ss:$28 sps:$4 sm:$0xff]  }
 0x662   : > { %v3142_v9 = vmax.f32 %v3066_v5, 0.0  ;;  %v6516_v5 = vld [vmem:[#allocation7 + $0x124] ss:$28 sps:$4 sm:$0xff]  }
 0x663   : > { %v3143_v11 = vmax.f32 %v3068_v7, 0.0 }
 0x664   : > { %v8054_v13 = vpack.c.bf16 %v3142_v9, %v3140_v8 }
 0x665   : > { %v8056_v14 = vpack.c.bf16 %v3143_v11, %v3141_v10  ;;  %v3071_v16 = vpop.f32.mrb[68].mxu1 }
 0x666   : > { %v3072_v20 = vadd.f32 %v3071_v16, %v8045_v53  ;;  %v3073_v15 = vpop.f32.mrb[69].mxu1  ;;  %v6514_v16 = vld [vmem:[#allocation7 + $0x120] ss:$28 sps:$4 sm:$0xff]  }
 0x667   : > { %v3074_v22 = vadd.f32 %v3073_v15, %v8048_v58  ;;  %v3075_v24 = vpop.f32.mrb[70].mxu1  ;;  %3961 = vmatprep.mubr.bf16.mxu1 %v8056_v14  ;;  %4187 = vmatprep.mubr.bf16.mxu0 %v8056_v14 }
 0x668   : > { %v3076_v25 = vadd.f32 %v3075_v24, %v8045_v53  ;;  %v3077_v27 = vpop.f32.mrb[71].mxu1  ;;  %3962 = vmatmul.mubr.bf16.vlgmr.msra.gmra.mrb[96].mxu1 %v8054_v13  ;;  %4188 = vmatmul.mubr.bf16.vlgmr.msra.gmra.mrb[32].mxu0 %v8054_v13  ;;  %v3144_v37 = vmax.f32 %v3072_v20, 0.0 }
 0x669   : > { %v3078_v35 = vadd.f32 %v3077_v27, %v8048_v58  ;;  %4043 = vmatpush1.bf16.msra.mxu1 %v6499_v18  ;;  %5766 = vmatpush3.bf16.msra.mxu0 %v8058_v19  ;;  %v3145_v29 = vmax.f32 %v3074_v22, 0.0  ;;  %v8119_v18 = vld [vmem:[#allocation7 + $0x130] ss:$28 sps:$4 sm:$0xff]   ;;  %v8122_v22 = vld [vmem:[#allocation7 + $0x328] ss:$28 sps:$4 sm:$0xff]  }
 0x66a   : > { %v3146_v40 = vmax.f32 %v3076_v25, 0.0  ;;  %4044 = vmatprep.subr.bf16.mxu1 %v6504_v21  ;;  %5767 = vmatprep.subr.bf16.mxu0 %v8061_v23  ;;  %v6519_v21 = vld [vmem:[#allocation7 + $0x15c] ss:$28 sps:$4 sm:$0xff]  }
 0x66b   : > { %v3147_v36 = vmax.f32 %v3078_v35, 0.0 }
 0x66c   : > { %v8076_v47 = vpack.c.bf16 %v3146_v40, %v3144_v37  ;;  %v6517_v37 = vld [vmem:[#allocation7 + $0x158] ss:$28 sps:$4 sm:$0xff]   ;;  %v8129_v40 = vld [vmem:[#allocation7 + $0x168] ss:$28 sps:$4 sm:$0xff]  }
 0x66d   : > { %v8078_v30 = vpack.c.bf16 %v3147_v36, %v3145_v29  ;;  %4045 = vmatpush1.bf16.msra.mxu1 %v6502_v12  ;;  %5768 = vmatpush3.bf16.msra.mxu0 %v8071_v17  ;;  %v6522_v36 = vld [vmem:[#allocation7 + $0x194] ss:$28 sps:$4 sm:$0xff]  }
 0x66e   : > { %v3081_v39 = vpop.f32.mrb[72].mxu1  ;;  %4046 = vmatprep.subr.bf16.mxu1 %v6507_v44  ;;  %5769 = vmatprep.subr.bf16.mxu0 %v8074_v28 }
 0x66f   : > { %v3082_v38 = vadd.f32 %v3081_v39, %v8045_v53  ;;  %v3083_v41 = vpop.f32.mrb[73].mxu1  ;;  %3971 = vmatprep.mubr.bf16.mxu1 %v8078_v30  ;;  %4197 = vmatprep.mubr.bf16.mxu0 %v8078_v30 }
 0x670   : > { %v3084_v42 = vadd.f32 %v3083_v41, %v8048_v58  ;;  %v3085_v45 = vpop.f32.mrb[74].mxu1  ;;  %3972 = vmatmul.mubr.bf16.gmra.mrb[100].mxu1 %v8076_v47  ;;  %4198 = vmatmul.mubr.bf16.gmra.mrb[36].mxu0 %v8076_v47 }
 0x671   : > { %v3086_v46 = vadd.f32 %v3085_v45, %v8045_v53  ;;  %v3087_v48 = vpop.f32.mrb[75].mxu1  ;;  %4047 = vmatpush1.bf16.msra.mxu1 %v6505_v31  ;;  %5770 = vmatpush3.bf16.msra.mxu0 %v8081_v32  ;;  %v3148_v54 = vmax.f32 %v3082_v38, 0.0  ;;  %v8133_v31 = vld [vmem:[#allocation7 + $0x360] ss:$28 sps:$4 sm:$0xff]   ;;  %v6520_v45 = vld [vmem:[#allocation7 + $0x190] ss:$28 sps:$4 sm:$0xff]  }
 0x672   : > { %v3088_v50 = vadd.f32 %v3087_v48, %v8048_v58  ;;  %4048 = vmatprep.subr.bf16.mxu1 %v6510_v33  ;;  %5771 = vmatprep.subr.bf16.mxu0 %v8084_v34  ;;  %v3149_v63 = vmax.f32 %v3084_v42, 0.0 }
 0x673   : > { %v3150_v56 = vmax.f32 %v3086_v46, 0.0  ;;  %v8143_v46 = vld [vmem:[#allocation7 + $0x1a0] ss:$28 sps:$4 sm:$0xff]  }
 0x674   : > { %v3151_v3 = vmax.f32 %v3088_v50, 0.0  ;;  %v6525_v50 = vld [vmem:[#allocation7 + $0x1cc] ss:$28 sps:$4 sm:$0xff]  }
 0x675   : > { %v8100_v43 = vpack.c.bf16 %v3150_v56, %v3148_v54  ;;  %4049 = vmatpush1.bf16.msra.mxu1 %v6508_v49  ;;  %5772 = vmatpush3.bf16.msra.mxu0 %v8094_v26 }
 0x676   : > { %v8103_v57 = vpack.c.bf16 %v3151_v3, %v3149_v63  ;;  %v3091_v61 = vpop.f32.mrb[76].mxu1  ;;  %4050 = vmatprep.subr.bf16.mxu1 %v6513_v51  ;;  %5773 = vmatprep.subr.bf16.mxu0 %v8098_v52 }
 0x677   : > { %v3092_v0 = vadd.f32 %v3091_v61, %v8045_v53  ;;  %v3093_v4 = vpop.f32.mrb[77].mxu1  ;;  %v6523_v61 = vld [vmem:[#allocation7 + $0x1c8] ss:$28 sps:$4 sm:$0xff]  }
 0x678   : > { %v3094_v7 = vadd.f32 %v3093_v4, %v8048_v58  ;;  %v3095_v8 = vpop.f32.mrb[78].mxu1  ;;  %3981 = vmatprep.mubr.bf16.mxu1 %v8103_v57  ;;  %4207 = vmatprep.mubr.bf16.mxu0 %v8103_v57  ;;  %v6530_v4 = vld [vmem:[#allocation7 + $0x204] ss:$28 sps:$4 sm:$0xff]  }
 0x679   : > { %v3096_v9 = vadd.f32 %v3095_v8, %v8045_v53  ;;  %v3097_v10 = vpop.f32.mrb[79].mxu1  ;;  %3982 = vmatmul.mubr.bf16.gmra.mrb[104].mxu1 %v8100_v43  ;;  %4208 = vmatmul.mubr.bf16.gmra.mrb[40].mxu0 %v8100_v43  ;;  %v3152_v20 = vmax.f32 %v3092_v0, 0.0 }
 0x67a   : > { %v3098_v11 = vadd.f32 %v3097_v10, %v8048_v58  ;;  %4051 = vmatpush1.bf16.msra.mxu1 %v6511_v1  ;;  %5774 = vmatpush3.bf16.msra.mxu0 %v8106_v2  ;;  %v3153_v24 = vmax.f32 %v3094_v7, 0.0 }
 0x67b   : > { %v3154_v15 = vmax.f32 %v3096_v9, 0.0  ;;  %4052 = vmatprep.subr.bf16.mxu1 %v6516_v5  ;;  %5775 = vmatprep.subr.bf16.mxu0 %v8109_v6 }
 0x67c   : > { %v3155_v25 = vmax.f32 %v3098_v11, 0.0  ;;  %v6528_v11 = vld [vmem:[#allocation7 + $0x200] ss:$28 sps:$4 sm:$0xff]  }
 0x67d   : > { %v8124_v27 = vpack.c.bf16 %v3154_v15, %v3152_v20  ;;  %v6535_v15 = vld [vmem:[#allocation7 + $0x23c] ss:$28 sps:$4 sm:$0xff]  }
 0x67e   : > { %v8126_v35 = vpack.c.bf16 %v3155_v25, %v3153_v24  ;;  %v3101_v12 = vpop.f32.mrb[80].mxu1  ;;  %4053 = vmatpush1.bf16.msra.mxu1 %v6514_v16  ;;  %5776 = vmatpush3.bf16.msra.mxu0 %v8119_v18 }
 0x67f   : > { %v3102_v44 = vadd.f32 %v3101_v12, %v8045_v53  ;;  %v3103_v29 = vpop.f32.mrb[81].mxu1  ;;  %4054 = vmatprep.subr.bf16.mxu1 %v6519_v21  ;;  %5777 = vmatprep.subr.bf16.mxu0 %v8122_v22 }
 0x680   : > { %v3104_v39 = vadd.f32 %v3103_v29, %v8048_v58  ;;  %v3105_v33 = vpop.f32.mrb[82].mxu1  ;;  %3991 = vmatprep.mubr.bf16.mxu1 %v8126_v35  ;;  %4217 = vmatprep.mubr.bf16.mxu0 %v8126_v35 }
 0x681   : > { %v3106_v38 = vadd.f32 %v3105_v33, %v8045_v53  ;;  %v3107_v41 = vpop.f32.mrb[83].mxu1  ;;  %3992 = vmatmul.mubr.bf16.gmra.mrb[108].mxu1 %v8124_v27  ;;  %4218 = vmatmul.mubr.bf16.gmra.mrb[44].mxu0 %v8124_v27  ;;  %v3156_v48 = vmax.f32 %v3102_v44, 0.0  ;;  %v6533_v44 = vld [vmem:[#allocation7 + $0x238] ss:$28 sps:$4 sm:$0xff]  }
 0x682   : > { %v3108_v42 = vadd.f32 %v3107_v41, %v8048_v58  ;;  %4055 = vmatpush1.bf16.msra.mxu1 %v6517_v37  ;;  %5778 = vmatpush3.bf16.msra.mxu0 %v8129_v40  ;;  %v3157_v51 = vmax.f32 %v3104_v39, 0.0  ;;  %v6540_v39 = vld [vmem:[#allocation7 + $0x274] ss:$28 sps:$4 sm:$0xff]  }
 0x683   : > { %v3158_v49 = vmax.f32 %v3106_v38, 0.0  ;;  %4056 = vmatprep.subr.bf16.mxu1 %v6522_v36  ;;  %5779 = vmatprep.subr.bf16.mxu0 %v8133_v31 }
 0x684   : > { %v3159_v54 = vmax.f32 %v3108_v42, 0.0 }
 0x685   : > { %v8146_v56 = vpack.c.bf16 %v3158_v49, %v3156_v48  ;;  %v6538_v48 = vld [vmem:[#allocation7 + $0x270] ss:$28 sps:$4 sm:$0xff]  }
 0x686   : > { %v8148_v63 = vpack.c.bf16 %v3159_v54, %v3157_v51  ;;  %v3111_v3 = vpop.f32.mrb[84].mxu1  ;;  %4057 = vmatpush1.bf16.msra.mxu1 %v6520_v45  ;;  %5780 = vmatpush3.bf16.msra.mxu0 %v8143_v46  ;;  %v6545_v51 = vld [vmem:[#allocation7 + $0x2ac] ss:$28 sps:$4 sm:$0xff]  }
 0x687   : > { %v3112_v1 = vadd.f32 %v3111_v3, %v8045_v53  ;;  %v3113_v0 = vpop.f32.mrb[85].mxu1  ;;  %4058 = vmatprep.subr.bf16.mxu1 %v6525_v50 }
 0x688   : > { %v3114_v5 = vadd.f32 %v3113_v0, %v8048_v58  ;;  %v3115_v7 = vpop.f32.mrb[86].mxu1  ;;  %4001 = vmatprep.mubr.bf16.mxu1 %v8148_v63  ;;  %4227 = vmatprep.mubr.bf16.mxu0 %v8148_v63 }
 0x689   : > { %v3116_v8 = vadd.f32 %v3115_v7, %v8045_v53  ;;  %v3117_v9 = vpop.f32.mrb[87].mxu1  ;;  %4002 = vmatmul.mubr.bf16.gmra.mrb[112].mxu1 %v8146_v56  ;;  %4228 = vmatmul.mubr.bf16.gmra.mrb[48].mxu0 %v8146_v56  ;;  %v3160_v16 = vmax.f32 %v3112_v1, 0.0 }
 0x68a   : > { %v3118_v10 = vadd.f32 %v3117_v9, %v8048_v58  ;;  %4059 = vmatpush1.bf16.msra.mxu1 %v6523_v61  ;;  %v3161_v21 = vmax.f32 %v3114_v5, 0.0 }
 0x68b   : > { %v3162_v20 = vmax.f32 %v3116_v8, 0.0  ;;  %4060 = vmatprep.subr.bf16.mxu1 %v6530_v4  ;;  %v6543_v4 = vld [vmem:[#allocation7 + $0x2a8] ss:$28 sps:$4 sm:$0xff]  }
 0x68c   : > { %v3163_v24 = vmax.f32 %v3118_v10, 0.0  ;;  %v6550_v8 = vld [vmem:[#allocation7 + $0x2e4] ss:$28 sps:$4 sm:$0xff]  }
 0x68d   : > { %v8159_v25 = vpack.c.bf16 %v3162_v20, %v3160_v16 }
 0x68e   : > { %v8161_v12 = vpack.c.bf16 %v3163_v24, %v3161_v21  ;;  %v3121_v37 = vpop.f32.mrb[88].mxu1  ;;  %4061 = vmatpush1.bf16.msra.mxu1 %v6528_v11 }
 0x68f   : > { %v3122_v29 = vadd.f32 %v3121_v37, %v8045_v53  ;;  %v3123_v36 = vpop.f32.mrb[89].mxu1  ;;  %4062 = vmatprep.subr.bf16.mxu1 %v6535_v15  ;;  %v6548_v15 = vld [vmem:[#allocation7 + $0x2e0] ss:$28 sps:$4 sm:$0xff]  }
 0x690   : > { %v3124_v33 = vadd.f32 %v3123_v36, %v8048_v58  ;;  %v3125_v38 = vpop.f32.mrb[90].mxu1  ;;  %4011 = vmatprep.mubr.bf16.mxu1 %v8161_v12  ;;  %4237 = vmatprep.mubr.bf16.mxu0 %v8161_v12  ;;  %v6555_v37 = vld [vmem:[#allocation7 + $0x31c] ss:$28 sps:$4 sm:$0xff]  }
 0x691   : > { %v3126_v41 = vadd.f32 %v3125_v38, %v8045_v53  ;;  %v3127_v42 = vpop.f32.mrb[91].mxu1  ;;  %4012 = vmatmul.mubr.bf16.gmra.mrb[116].mxu1 %v8159_v25  ;;  %4238 = vmatmul.mubr.bf16.gmra.mrb[52].mxu0 %v8159_v25  ;;  %v3164_v49 = vmax.f32 %v3122_v29, 0.0 }
 0x692   : > { %v3128_v45 = vadd.f32 %v3127_v42, %v8048_v58  ;;  %4063 = vmatpush1.bf16.msra.mxu1 %v6533_v44  ;;  %v3165_v54 = vmax.f32 %v3124_v33, 0.0  ;;  %v6553_v33 = vld [vmem:[#allocation7 + $0x318] ss:$28 sps:$4 sm:$0xff]  }
 0x693   : > { %v3166_v50 = vmax.f32 %v3126_v41, 0.0  ;;  %4064 = vmatprep.subr.bf16.mxu1 %v6540_v39 }
 0x694   : > { %v3167_v3 = vmax.f32 %v3128_v45, 0.0 }
 0x695   : > { %v8171_v61 = vpack.c.bf16 %v3166_v50, %v3164_v49 }
 0x696   : > { %v8173_v1 = vpack.c.bf16 %v3167_v3, %v3165_v54  ;;  %v3131_v0 = vpop.f32.mrb[92].mxu1  ;;  %4065 = vmatpush1.bf16.msra.mxu1 %v6538_v48 }
 0x697   : > { %v3132_v5 = vadd.f32 %v3131_v0, %v8045_v53  ;;  %v3133_v7 = vpop.f32.mrb[93].mxu1  ;;  %4066 = vmatprep.subr.bf16.mxu1 %v6545_v51 }
 0x698   : > { %v3134_v9 = vadd.f32 %v3133_v7, %v8048_v58  ;;  %v3135_v10 = vpop.f32.mrb[94].mxu1  ;;  %4021 = vmatprep.mubr.bf16.mxu1 %v8173_v1  ;;  %4247 = vmatprep.mubr.bf16.mxu0 %v8173_v1 }
 0x699   : > { %v3136_v11 = vadd.f32 %v3135_v10, %v8045_v53  ;;  %v3137_v16 = vpop.f32.mrb[95].mxu1  ;;  %4022 = vmatmul.mubr.bf16.gmra.mrb[120].mxu1 %v8171_v61  ;;  %4248 = vmatmul.mubr.bf16.gmra.mrb[56].mxu0 %v8171_v61  ;;  %v3168_v21 = vmax.f32 %v3132_v5, 0.0  ;;  %v6560_v53 = vld [vmem:[#allocation7 + $0x354] ss:$28 sps:$4 sm:$0xff]  }
 0x69a   : > { %v3138_v20 = vadd.f32 %v3137_v16, %v8048_v58  ;;  %4067 = vmatpush1.bf16.msra.mxu1 %v6543_v4  ;;  %v3169_v44 = vmax.f32 %v3134_v9, 0.0  ;;  %v6558_v58 = vld [vmem:[#allocation7 + $0x350] ss:$28 sps:$4 sm:$0xff]  }
 0x69b   : > { %v3170_v24 = vmax.f32 %v3136_v11, 0.0  ;;  %4068 = vmatprep.subr.bf16.mxu1 %v6550_v8 }
 0x69c   : > { %v3171_v29 = vmax.f32 %v3138_v20, 0.0 }
 0x69d   : > { %v3186_v36 = vpack.c.bf16 %v3170_v24, %v3168_v21 }
 0x69e   : > { %v3187_v39 = vpack.c.bf16 %v3171_v29, %v3169_v44  ;;  %4069 = vmatpush1.bf16.msra.mxu1 %v6548_v15 }
 0x69f   : > { %4070 = vmatprep.subr.bf16.mxu1 %v6555_v37 }
 0x6a0   : > { %4031 = vmatprep.mubr.bf16.mxu1 %v3187_v39  ;;  %4257 = vmatprep.mubr.bf16.mxu0 %v3187_v39 }
 0x6a1   : > { %4032 = vmatmul.mubr.bf16.gmra.mrb[124].mxu1 %v3186_v36  ;;  %4258 = vmatmul.mubr.bf16.gmra.mrb[60].mxu0 %v3186_v36 }
 0x6a2   : > { %4071 = vmatpush1.bf16.msra.mxu1 %v6553_v33  ;;  %4074 = vmatprep.mubr.bf16.mxu1 %v8056_v14 }
 0x6a3   : > { %4300 = vmatprep.mubr.bf16.mxu0 %v8056_v14  ;;  %4072 = vmatprep.subr.bf16.mxu1 %v6560_v53  ;;  %v3340_v14 = vsub.s32 5, %v7606_v59 }
 0x6a6   : > { %4073 = vmatpush1.bf16.msra.mxu1 %v6558_v58 }
 0x6a7   : > { %5881 = vmatprep.subr.bf16.mxu1 %v8038_v55  ;;  %v3336_v55 = vsub.s32 4, %v7606_v59 }
 0x6a9   : > { %4075 = vmatmul.mubr.bf16.vlgmr.msra.gmra.mrb[128].mxu1 %v8054_v13  ;;  %4301 = vmatmul.mubr.bf16.vlgmr.msra.gmra.mrb[64].mxu0 %v8054_v13  ;;  %v3316_v13 = vld [vmem:[%s8880_s26] sm:$0xff] }
 0x6aa   : > { %4084 = vmatprep.mubr.bf16.mxu1 %v8078_v30  ;;  %5889 = vmatpush3.bf16.msra.mxu1 %v8058_v19  ;;  %v8233_v19 = vrot.slane %v3316_v13, %v7609_v60 }
 0x6ab   : > { %4308 = vmatprep.mubr.bf16.mxu0 %v8078_v30  ;;  %5882 = vmatprep.subr.bf16.mxu1 %v8061_v23  ;;  %v8235_v23 = vrot.slane %v3316_v13, %v3336_v55 }
 0x6ae   : > { %5890 = vmatpush3.bf16.msra.mxu1 %v8071_v17  ;;  %v8238_v17 = vrot.slane %v3316_v13, %v7615_v62 }
 0x6af   : > { %5883 = vmatprep.subr.bf16.mxu1 %v8074_v28  ;;  %v8240_v28 = vrot.slane %v3316_v13, %v3340_v14 }
 0x6b1   : > { %4085 = vmatmul.mubr.bf16.gmra.mrb[132].mxu1 %v8076_v47  ;;  %4309 = vmatmul.mubr.bf16.gmra.mrb[68].mxu0 %v8076_v47 }
 0x6b2   : > { %4094 = vmatprep.mubr.bf16.mxu1 %v8103_v57  ;;  %5891 = vmatpush3.bf16.msra.mxu1 %v8081_v32 }
 0x6b3   : > { %5884 = vmatprep.subr.bf16.mxu1 %v8084_v34 }
 0x6b6   : > { %5892 = vmatpush3.bf16.msra.mxu1 %v8094_v26 }
 0x6b7   : > { %5885 = vmatprep.subr.bf16.mxu1 %v8098_v52 }
 0x6b9   : > { %4095 = vmatmul.mubr.bf16.gmra.mrb[136].mxu1 %v8100_v43 }
 0x6ba   : > { %4104 = vmatprep.mubr.bf16.mxu1 %v8126_v35  ;;  %5893 = vmatpush3.bf16.msra.mxu1 %v8106_v2 }
 0x6bb   : > { %5886 = vmatprep.subr.bf16.mxu1 %v8109_v6 }
 0x6be   : > { %5894 = vmatpush3.bf16.msra.mxu1 %v8119_v18 }
 0x6bf   : > { %5887 = vmatprep.subr.bf16.mxu1 %v8122_v22 }
 0x6c1   : > { %4105 = vmatmul.mubr.bf16.gmra.mrb[140].mxu1 %v8124_v27 }
 0x6c2   : > { %4114 = vmatprep.mubr.bf16.mxu1 %v8148_v63  ;;  %5895 = vmatpush3.bf16.msra.mxu1 %v8129_v40 }
 0x6c3   : > { %5888 = vmatprep.subr.bf16.mxu1 %v8133_v31 }
 0x6c6   : > { %5896 = vmatpush3.bf16.msra.mxu1 %v8143_v46 }
 0x6c9   : > { %4115 = vmatmul.mubr.bf16.gmra.mrb[144].mxu1 %v8146_v56 }
 0x6ca   : > { %4124 = vmatprep.mubr.bf16.mxu1 %v8161_v12 }
 0x6d1   : > { %4125 = vmatmul.mubr.bf16.gmra.mrb[148].mxu1 %v8159_v25 }
 0x6d2   : > { %4134 = vmatprep.mubr.bf16.mxu1 %v8173_v1 }
 0x6d9   : > { %4135 = vmatmul.mubr.bf16.gmra.mrb[152].mxu1 %v8171_v61 }
 0x6da   : > { %4144 = vmatprep.mubr.bf16.mxu1 %v3187_v39 }
 0x6e1   : > { %4145 = vmatmul.mubr.bf16.gmra.mrb[156].mxu1 %v3186_v36 }
 0x6e2   : > { %4316 = vmatprep.mubr.bf16.mxu1 %v8103_v57 }
 0x6e9   : > { %4317 = vmatmul.mubr.bf16.vlgmr.msra.gmra.mrb[160].mxu1 %v8100_v43 }
 0x6ea   : > { %4324 = vmatprep.mubr.bf16.mxu1 %v8126_v35 }
 0x6f1   : > { %4325 = vmatmul.mubr.bf16.gmra.mrb[164].mxu1 %v8124_v27 }
 0x6f2   : > { %4332 = vmatprep.mubr.bf16.mxu1 %v8148_v63 }
 0x6f9   : > { %4333 = vmatmul.mubr.bf16.gmra.mrb[168].mxu1 %v8146_v56 }
 0x6fa   : > { %4340 = vmatprep.mubr.bf16.mxu1 %v8161_v12 }
 0x701   : > { %4341 = vmatmul.mubr.bf16.gmra.mrb[172].mxu1 %v8159_v25 }
 0x702   : > { %4348 = vmatprep.mubr.bf16.mxu1 %v8173_v1 }
 0x709   : > { %4349 = vmatmul.mubr.bf16.gmra.mrb[176].mxu1 %v8171_v61 }
 0x70a   : > { %4356 = vmatprep.mubr.bf16.mxu1 %v3187_v39 }
 0x711   : > { %4357 = vmatmul.mubr.bf16.gmra.mrb[180].mxu1 %v3186_v36 }
 0x73b   : > { %v3963_v47 = vpop.f32.mrb[96].mxu1  ;;  %v4189_v30 = vpop.f32.mrb[32].mxu0 }
 0x73c   : > { %v3964_v32 = vadd.f32 %v3963_v47, %v8233_v19  ;;  %v4190_v34 = vadd.f32 %v4189_v30, %v8235_v23  ;;  %v3965_v26 = vpop.f32.mrb[97].mxu1  ;;  %v4191_v52 = vpop.f32.mrb[33].mxu0 }
 0x73d   : > { %v3966_v43 = vadd.f32 %v3965_v26, %v8238_v17  ;;  %v4192_v60 = vadd.f32 %v4191_v52, %v8240_v28  ;;  %v3967_v57 = vpop.f32.mrb[98].mxu1  ;;  %v4193_v2 = vpop.f32.mrb[34].mxu0 }
 0x73e   : > { %v4365_v6 = vsub.f32 0.0, %v3964_v32  ;;  %v4369_v18 = vsub.f32 0.0, %v4190_v34  ;;  %v3968_v62 = vadd.f32 %v3967_v57, %v8233_v19  ;;  %v4194_v22 = vadd.f32 %v4193_v2, %v8235_v23  ;;  %v3969_v27 = vpop.f32.mrb[99].mxu1  ;;  %v4195_v35 = vpop.f32.mrb[35].mxu0 }
 0x73f   : > { %v4366_v40 = vsub.f32 0.0, %v3966_v43  ;;  %v4370_v31 = vsub.f32 0.0, %v4192_v60  ;;  %v3970_v46 = vadd.f32 %v3969_v27, %v8238_v17  ;;  %v4196_v56 = vadd.f32 %v4195_v35, %v8240_v28 }
 0x740   : > { %v4477_v63 = vmul.f32 1.442695, %v4365_v6  ;;  %v4485_v25 = vmul.f32 1.442695, %v4369_v18  ;;  %v4372_v12 = vsub.f32 0.0, %v3968_v62  ;;  %v4376_v38 = vsub.f32 0.0, %v4194_v22 }
 0x741   : > { %v4479_v41 = vmul.f32 1.442695, %v4366_v40  ;;  %v4487_v42 = vmul.f32 1.442695, %v4370_v31  ;;  %v4373_v45 = vsub.f32 0.0, %v3970_v46  ;;  %v4377_v48 = vsub.f32 0.0, %v4196_v56 }
 0x742   : > { %6595 = vpow2.f32 %v4477_v63  ;;  %v4491_v49 = vmul.f32 1.442695, %v4372_v12  ;;  %v4499_v50 = vmul.f32 1.442695, %v4376_v38 }
 0x743   : > { %6597 = vpow2.f32 %v4485_v25  ;;  %v3973_v51 = vpop.f32.mrb[100].mxu1  ;;  %v4199_v54 = vpop.f32.mrb[36].mxu0  ;;  %v4493_v3 = vmul.f32 1.442695, %v4373_v45  ;;  %v4501_v5 = vmul.f32 1.442695, %v4377_v48 }
 0x744   : > { %6599 = vpow2.f32 %v4479_v41  ;;  %v3974_v61 = vadd.f32 %v3973_v51, %v8233_v19  ;;  %v4200_v1 = vadd.f32 %v4199_v54, %v8235_v23  ;;  %v3975_v0 = vpop.f32.mrb[101].mxu1  ;;  %v4201_v4 = vpop.f32.mrb[37].mxu0 }
 0x745   : > { %6601 = vpow2.f32 %v4487_v42  ;;  %v3976_v7 = vadd.f32 %v3975_v0, %v8238_v17  ;;  %v4202_v8 = vadd.f32 %v4201_v4, %v8240_v28  ;;  %v3977_v9 = vpop.f32.mrb[102].mxu1  ;;  %v4203_v10 = vpop.f32.mrb[38].mxu0 }
 0x746   : > { %6603 = vpow2.f32 %v4491_v49  ;;  %v4379_v11 = vsub.f32 0.0, %v3974_v61  ;;  %v4383_v16 = vsub.f32 0.0, %v4200_v1  ;;  %v3978_v20 = vadd.f32 %v3977_v9, %v8233_v19  ;;  %v3979_v15 = vpop.f32.mrb[103].mxu1  ;;  %v4205_v21 = vpop.f32.mrb[39].mxu0 }
 0x747   : > { %6605 = vpow2.f32 %v4499_v50  ;;  %v4380_v24 = vsub.f32 0.0, %v3976_v7  ;;  %v4384_v37 = vsub.f32 0.0, %v4202_v8  ;;  %v4204_v55 = vadd.f32 %v4203_v10, %v8235_v23 }
 0x748   : > { %6607 = vpow2.f32 %v4493_v3  ;;  %v4505_v44 = vmul.f32 1.442695, %v4379_v11  ;;  %v4513_v29 = vmul.f32 1.442695, %v4383_v16  ;;  %v4386_v36 = vsub.f32 0.0, %v3978_v20 }
 0x749   : > { %6609 = vpow2.f32 %v4501_v5  ;;  %v4507_v39 = vmul.f32 1.442695, %v4380_v24  ;;  %v4515_v33 = vmul.f32 1.442695, %v4384_v37  ;;  %v3980_v43 = vadd.f32 %v3979_v15, %v8238_v17 }
 0x74a   : > { %6611 = vpow2.f32 %v4505_v44  ;;  %v4519_v53 = vmul.f32 1.442695, %v4386_v36  ;;  %v4390_v27 = vsub.f32 0.0, %v4204_v55  ;;  %v4206_v46 = vadd.f32 %v4205_v21, %v8240_v28 }
 0x74b   : > { %6613 = vpow2.f32 %v4513_v29  ;;  %v4387_v25 = vsub.f32 0.0, %v3980_v43 }
 0x74c   : > { %v6596_v58 = vpop.eup %6595  ;;  %6615 = vpow2.f32 %v4507_v39  ;;  %v3983_v13 = vpop.f32.mrb[104].mxu1  ;;  %v4527_v48 = vmul.f32 1.442695, %v4390_v27  ;;  %v4391_v3 = vsub.f32 0.0, %v4206_v46 }
 0x74d   : > { %v4209_v14 = vpop.f32.mrb[40].mxu0  ;;  %v6598_v47 = vpop.eup %6597  ;;  %v4701_v30 = vadd.f32 1.0, %v6596_v58  ;;  %6617 = vpow2.f32 %v4515_v33  ;;  %v3984_v41 = vadd.f32 %v3983_v13, %v8233_v19  ;;  %v4521_v7 = vmul.f32 1.442695, %v4387_v25 }
 0x74e   : > { %v3985_v32 = vpop.f32.mrb[105].mxu1  ;;  %v4211_v34 = vpop.f32.mrb[41].mxu0  ;;  %v4705_v52 = vadd.f32 1.0, %v6598_v47  ;;  %6619 = vpow2.f32 %v4519_v53  ;;  %v4210_v49 = vadd.f32 %v4209_v14, %v8235_v23  ;;  %v4529_v14 = vmul.f32 1.442695, %v4391_v3 }
 0x74f   : > { %v6600_v26 = vpop.eup %6599  ;;  %v3987_v60 = vpop.f32.mrb[106].mxu1  ;;  %6621 = vrcp.f32 %v4701_v30  ;;  %v3986_v61 = vadd.f32 %v3985_v32, %v8238_v17  ;;  %v4212_v8 = vadd.f32 %v4211_v34, %v8240_v28  ;;  %v4393_v20 = vsub.f32 0.0, %v3984_v41 }
 0x750   : > { %v6602_v57 = vpop.eup %6601  ;;  %v4702_v2 = vadd.f32 1.0, %v6600_v26  ;;  %v4213_v6 = vpop.f32.mrb[42].mxu0  ;;  %6623 = vrcp.f32 %v4705_v52  ;;  %v3988_v15 = vadd.f32 %v3987_v60, %v8233_v19  ;;  %v4397_v44 = vsub.f32 0.0, %v4210_v49 }
 0x751   : > { %v3989_v18 = vpop.f32.mrb[107].mxu1  ;;  %v6604_v62 = vpop.eup %6603  ;;  %v4706_v22 = vadd.f32 1.0, %v6602_v57  ;;  %v4214_v29 = vadd.f32 %v4213_v6, %v8235_v23  ;;  %v4394_v58 = vsub.f32 0.0, %v3986_v61  ;;  %v4398_v47 = vsub.f32 0.0, %v4212_v8 }
 0x752   : > { %v4215_v35 = vpop.f32.mrb[43].mxu0  ;;  %v6606_v40 = vpop.eup %6605  ;;  %6625 = vrcp.f32 %v4702_v2  ;;  %v4708_v31 = vadd.f32 1.0, %v6604_v62  ;;  %v3990_v55 = vadd.f32 %v3989_v18, %v8238_v17  ;;  %v4533_v34 = vmul.f32 1.442695, %v4393_v20 }
 0x753   : > { %v6608_v56 = vpop.eup %6607  ;;  %6627 = vrcp.f32 %v4706_v22  ;;  %v4712_v63 = vadd.f32 1.0, %v6606_v40  ;;  %v4216_v30 = vadd.f32 %v4215_v35, %v8240_v28  ;;  %v4400_v26 = vsub.f32 0.0, %v3988_v15 }
 0x754   : > { %v6610_v12 = vpop.eup %6609  ;;  %6629 = vrcp.f32 %v4708_v31  ;;  %v4709_v38 = vadd.f32 1.0, %v6608_v56  ;;  %v3993_v50 = vpop.f32.mrb[108].mxu1  ;;  %v4541_v60 = vmul.f32 1.442695, %v4397_v44  ;;  %v4404_v57 = vsub.f32 0.0, %v4214_v29 }
 0x755   : > { %v6612_v42 = vpop.eup %6611  ;;  %6631 = vrcp.f32 %v4712_v63  ;;  %v4713_v45 = vadd.f32 1.0, %v6610_v12  ;;  %v4219_v1 = vpop.f32.mrb[44].mxu0  ;;  %v3994_v52 = vadd.f32 %v3993_v50, %v8233_v19  ;;  %v4535_v22 = vmul.f32 1.442695, %v4394_v58 }
 0x756   : > { %v6614_v51 = vpop.eup %6613  ;;  %6633 = vrcp.f32 %v4709_v38  ;;  %v4715_v54 = vadd.f32 1.0, %v6612_v42  ;;  %v8262_v0 = vpop.f32.mrb[109].mxu1  ;;  %v4220_v2 = vadd.f32 %v4219_v1, %v8235_v23  ;;  %v4401_v27 = vsub.f32 0.0, %v3990_v55 }
 0x757   : > { %v6616_v4 = vpop.eup %6615  ;;  %6635 = vrcp.f32 %v4713_v45  ;;  %v4719_v5 = vadd.f32 1.0, %v6614_v51  ;;  %v8265_v9 = vpop.f32.mrb[45].mxu0  ;;  %v4543_v31 = vmul.f32 1.442695, %v4398_v47  ;;  %v4405_v46 = vsub.f32 0.0, %v4216_v30 }
 0x758   : > { %v8267_v10 = vpop.f32.mrb[110].mxu1  ;;  %v6618_v11 = vpop.eup %6617  ;;  %6637 = vrcp.f32 %v4715_v54  ;;  %v4716_v16 = vadd.f32 1.0, %v6616_v4  ;;  %v4547_v12 = vmul.f32 1.442695, %v4400_v26  ;;  %v4407_v38 = vsub.f32 0.0, %v3994_v52 }
 0x759   : > { %v8270_v21 = vpop.f32.mrb[46].mxu0  ;;  %v6620_v24 = vpop.eup %6619  ;;  %6639 = vrcp.f32 %v4719_v5  ;;  %v4720_v37 = vadd.f32 1.0, %v6618_v11  ;;  %v4411_v49 = vsub.f32 0.0, %v4220_v2  ;;  %v4549_v54 = vmul.f32 1.442695, %v4401_v27 }
 0x75a   : > { %v8273_v36 = vpop.f32.mrb[111].mxu1  ;;  %v8275_v39 = vpop.f32.mrb[47].mxu0  ;;  %6641 = vrcp.f32 %v4716_v16  ;;  %v4722_v53 = vadd.f32 1.0, %v6620_v24  ;;  %v4557_v61 = vmul.f32 1.442695, %v4405_v46 }
 0x75b   : > { %v6622_v33 = vpop.eup %6621  ;;  %6643 = vrcp.f32 %v4720_v37  ;;  %v4561_v4 = vmul.f32 1.442695, %v4407_v38  ;;  %v3996_v37 = vadd.f32 %v8262_v0, %v8238_v17  ;;  %v4222_v0 = vadd.f32 %v8265_v9, %v8240_v28 }
 0x75c   : > { %v6624_v13 = vpop.eup %6623  ;;  %4925 = vst [vmem:[%s8280_s21] sm:$0xff] %v6622_v33  ;;  %6645 = vrcp.f32 %v4722_v53  ;;  %v8288_v6 = vpop.f32.mrb[112].mxu1 }
 0x75d   : > { %v6626_v32 = vpop.eup %6625  ;;  %4929 = vst [vmem:[%s8280_s21 + $0x20] sm:$0xff] %v6624_v13  ;;  %6647 = vpow2.f32 %v4527_v48  ;;  %v8290_v18 = vpop.f32.mrb[48].mxu0  ;;  %v4555_v48 = vmul.f32 1.442695, %v4404_v57  ;;  %v4408_v26 = vsub.f32 0.0, %v3996_v37 }
 0x75e   : > { %v6628_v43 = vpop.eup %6627  ;;  %4926 = vst [vmem:[%s8280_s21 + $0x8] sm:$0xff] %v6626_v32  ;;  %6649 = vpow2.f32 %v4521_v7  ;;  %v8293_v35 = vpop.f32.mrb[113].mxu1  ;;  %v4569_v7 = vmul.f32 1.442695, %v4411_v49 }
 0x75f   : > { %v6630_v62 = vpop.eup %6629  ;;  %4930 = vst [vmem:[%s8280_s21 + $0x28] sm:$0xff] %v6628_v43  ;;  %6651 = vpow2.f32 %v4529_v14  ;;  %v8296_v56 = vpop.f32.mrb[49].mxu0  ;;  %v4563_v38 = vmul.f32 1.442695, %v4408_v26 }
 0x760   : > { %v6632_v40 = vpop.eup %6631  ;;  %4932 = vst [vmem:[%s8280_s21 + $0x38] sm:$0xff] %v6630_v62  ;;  %v8298_v63 = vpop.f32.mrb[114].mxu1  ;;  %6653 = vpow2.f32 %v4533_v34  ;;  %v4224_v62 = vadd.f32 %v8270_v21, %v8235_v23 }
 0x761   : > { %v6634_v25 = vpop.eup %6633  ;;  %4936 = vst [vmem:[%s8280_s21 + $0x58] sm:$0xff] %v6632_v40  ;;  %v8301_v41 = vpop.f32.mrb[50].mxu0  ;;  %6655 = vpow2.f32 %v4541_v60  ;;  %v3998_v60 = vadd.f32 %v8267_v10, %v8233_v19  ;;  %v4008_v26 = vadd.f32 %v8298_v63, %v8233_v19 }
 0x762   : > { %v8303_v42 = vpop.f32.mrb[115].mxu1  ;;  %v6636_v45 = vpop.eup %6635  ;;  %4933 = vst [vmem:[%s8280_s21 + $0x40] sm:$0xff] %v6634_v25  ;;  %6657 = vpow2.f32 %v4535_v22 }
 0x763   : > { %v8306_v50 = vpop.f32.mrb[51].mxu0  ;;  %v6638_v51 = vpop.eup %6637  ;;  %4937 = vst [vmem:[%s8280_s21 + $0x60] sm:$0xff] %v6636_v45  ;;  %6659 = vpow2.f32 %v4543_v31  ;;  %v4412_v31 = vsub.f32 0.0, %v4222_v0  ;;  %v4000_v45 = vadd.f32 %v8273_v36, %v8238_v17  ;;  %v4004_v36 = vadd.f32 %v8288_v6, %v8233_v19 }
 0x764   : > { %v6640_v3 = vpop.eup %6639  ;;  %4939 = vst [vmem:[%s8280_s21 + $0x70] sm:$0xff] %v6638_v51  ;;  %6661 = vpow2.f32 %v4547_v12  ;;  %v8312_v8 = vpop.f32.mrb[116].mxu1  ;;  %v4232_v0 = vadd.f32 %v8296_v56, %v8240_v28  ;;  %v4234_v56 = vadd.f32 %v8301_v41, %v8235_v23 }
 0x765   : > { %v6642_v1 = vpop.eup %6641  ;;  %4943 = vst [vmem:[%s8280_s21 + $0x90] sm:$0xff] %v6640_v3  ;;  %6663 = vpow2.f32 %v4555_v48  ;;  %v8314_v11 = vpop.f32.mrb[52].mxu0  ;;  %v4226_v3 = vadd.f32 %v8275_v39, %v8240_v28  ;;  %v4571_v37 = vmul.f32 1.442695, %v4412_v31  ;;  %v4010_v31 = vadd.f32 %v8303_v42, %v8238_v17 }
 0x766   : > { %v6644_v5 = vpop.eup %6643  ;;  %4940 = vst [vmem:[%s8280_s21 + $0x78] sm:$0xff] %v6642_v1  ;;  %6665 = vpow2.f32 %v4549_v54  ;;  %v8317_v20 = vpop.f32.mrb[117].mxu1  ;;  %v4414_v54 = vsub.f32 0.0, %v3998_v60 }
 0x767   : > { %v6646_v16 = vpop.eup %6645  ;;  %4944 = vst [vmem:[%s8280_s21 + $0x98] sm:$0xff] %v6644_v5  ;;  %v8319_v15 = vpop.f32.mrb[53].mxu0  ;;  %6667 = vpow2.f32 %v4557_v61  ;;  %v4418_v5 = vsub.f32 0.0, %v4224_v62 }
 0x768   : > { %v6648_v24 = vpop.eup %6647  ;;  %4946 = vst [vmem:[%s8280_s21 + $0xa8] sm:$0xff] %v6646_v16  ;;  %v8324_v44 = vpop.f32.mrb[118].mxu1  ;;  %6669 = vpow2.f32 %v4561_v4 }
 0x769   : > { %v8326_v29 = vpop.f32.mrb[54].mxu0  ;;  %v6650_v33 = vpop.eup %6649  ;;  %v4726_v53 = vadd.f32 1.0, %v6648_v24  ;;  %6671 = vpow2.f32 %v4569_v7  ;;  %v4583_v60 = vmul.f32 1.442695, %v4418_v5  ;;  %v4432_v5 = vsub.f32 0.0, %v4234_v56 }
 0x76a   : > { %v8328_v58 = vpop.f32.mrb[119].mxu1  ;;  %v8330_v55 = vpop.f32.mrb[55].mxu0  ;;  %v4723_v14 = vadd.f32 1.0, %v6650_v33  ;;  %v4230_v33 = vadd.f32 %v8290_v18, %v8235_v23  ;;  %v4575_v18 = vmul.f32 1.442695, %v4414_v54 }
 0x76b   : > { %v6652_v13 = vpop.eup %6651  ;;  %6673 = vrcp.f32 %v4726_v53 }
 0x76c   : > { %v6654_v47 = vpop.eup %6653  ;;  %v4727_v30 = vadd.f32 1.0, %v6652_v13  ;;  %6675 = vrcp.f32 %v4723_v14  ;;  %v8338_v22 = vpop.f32.mrb[120].mxu1  ;;  %v4415_v13 = vsub.f32 0.0, %v4000_v45  ;;  %v4006_v14 = vadd.f32 %v8293_v35, %v8238_v17 }
 0x76d   : > { %v6656_v32 = vpop.eup %6655  ;;  %v4729_v34 = vadd.f32 1.0, %v6654_v47  ;;  %v8340_v27 = vpop.f32.mrb[56].mxu0 }
 0x76e   : > { %v6658_v52 = vpop.eup %6657  ;;  %6677 = vrcp.f32 %v4727_v30  ;;  %v4733_v43 = vadd.f32 1.0, %v6656_v32  ;;  %v8342_v46 = vpop.f32.mrb[121].mxu1  ;;  %v4419_v30 = vsub.f32 0.0, %v4226_v3  ;;  %v4577_v63 = vmul.f32 1.442695, %v4415_v13 }
 0x76f   : > { %v6660_v57 = vpop.eup %6659  ;;  %6679 = vrcp.f32 %v4729_v34  ;;  %v4730_v2 = vadd.f32 1.0, %v6658_v52  ;;  %v8344_v25 = vpop.f32.mrb[57].mxu0  ;;  %v4421_v34 = vsub.f32 0.0, %v4004_v36  ;;  %v4428_v3 = vsub.f32 0.0, %v4008_v26 }
 0x770   : > { %v6662_v9 = vpop.eup %6661  ;;  %6681 = vrcp.f32 %v4733_v43  ;;  %v4734_v40 = vadd.f32 1.0, %v6660_v57  ;;  %v8348_v21 = vpop.f32.mrb[122].mxu1  ;;  %v4425_v57 = vsub.f32 0.0, %v4230_v33  ;;  %v4585_v41 = vmul.f32 1.442695, %v4419_v30 }
 0x771   : > { %v6664_v12 = vpop.eup %6663  ;;  %6683 = vrcp.f32 %v4730_v2  ;;  %v4736_v10 = vadd.f32 1.0, %v6662_v9  ;;  %v8350_v48 = vpop.f32.mrb[58].mxu0  ;;  %v4589_v42 = vmul.f32 1.442695, %v4421_v34 }
 0x772   : > { %v6666_v49 = vpop.eup %6665  ;;  %6685 = vrcp.f32 %v4734_v40  ;;  %v4740_v51 = vadd.f32 1.0, %v6664_v12  ;;  %v8354_v61 = vpop.f32.mrb[123].mxu1  ;;  %v4422_v40 = vsub.f32 0.0, %v4006_v14 }
 0x773   : > { %v6668_v1 = vpop.eup %6667  ;;  %6687 = vrcp.f32 %v4736_v10  ;;  %v4737_v4 = vadd.f32 1.0, %v6666_v49  ;;  %v8358_v7 = vpop.f32.mrb[59].mxu0  ;;  %v4426_v49 = vsub.f32 0.0, %v4232_v0 }
 0x774   : > { %v6670_v16 = vpop.eup %6669  ;;  %6689 = vrcp.f32 %v4740_v51  ;;  %v4741_v24 = vadd.f32 1.0, %v6668_v1  ;;  %v8369_v52 = vpop.f32.mrb[124].mxu1 }
 0x775   : > { %v6672_v39 = vpop.eup %6671  ;;  %6691 = vrcp.f32 %v4737_v4  ;;  %v4743_v53 = vadd.f32 1.0, %v6670_v16  ;;  %v8371_v43 = vpop.f32.mrb[60].mxu0  ;;  %v4597_v4 = vmul.f32 1.442695, %v4425_v57  ;;  %v4591_v16 = vmul.f32 1.442695, %v4422_v40 }
 0x776   : > { %v6674_v47 = vpop.eup %6673  ;;  %6693 = vrcp.f32 %v4741_v24  ;;  %v4747_v6 = vadd.f32 1.0, %v6672_v39  ;;  %v8376_v2 = vpop.f32.mrb[125].mxu1  ;;  %v4429_v24 = vsub.f32 0.0, %v4010_v31  ;;  %v4599_v33 = vmul.f32 1.442695, %v4426_v49 }
 0x777   : > { %v6676_v32 = vpop.eup %6675  ;;  %4950 = vst [vmem:[%s8280_s21 + $0xc8] sm:$0xff] %v6674_v47  ;;  %6695 = vrcp.f32 %v4743_v53  ;;  %v8378_v62 = vpop.f32.mrb[61].mxu0  ;;  %v4603_v53 = vmul.f32 1.442695, %v4428_v3  ;;  %v4014_v31 = vadd.f32 %v8312_v8, %v8233_v19 }
 0x778   : > { %v6678_v35 = vpop.eup %6677  ;;  %4947 = vst [vmem:[%s8280_s21 + $0xb0] sm:$0xff] %v6676_v32  ;;  %6697 = vrcp.f32 %v4747_v6  ;;  %v8383_v12 = vpop.f32.mrb[126].mxu1  ;;  %v4611_v6 = vmul.f32 1.442695, %v4432_v5 }
 0x779   : > { %v6680_v9 = vpop.eup %6679  ;;  %4951 = vst [vmem:[%s8280_s21 + $0xd0] sm:$0xff] %v6678_v35  ;;  %6699 = vpow2.f32 %v4563_v38  ;;  %v8385_v10 = vpop.f32.mrb[62].mxu0 }
 0x77a   : > { %v6682_v45 = vpop.eup %6681  ;;  %4953 = vst [vmem:[%s8280_s21 + $0xe0] sm:$0xff] %v6680_v9  ;;  %6701 = vpow2.f32 %v4571_v37  ;;  %v8388_v51 = vpop.f32.mrb[127].mxu1 }
 0x77b   : > { %v8390_v54 = vpop.f32.mrb[63].mxu0  ;;  %v6684_v38 = vpop.eup %6683  ;;  %4957 = vst [vmem:[%s8280_s21 + $0x100] sm:$0xff] %v6682_v45  ;;  %6703 = vpow2.f32 %v4575_v18  ;;  %v4605_v18 = vmul.f32 1.442695, %v4429_v24  ;;  %v4435_v24 = vsub.f32 0.0, %v4014_v31  ;;  %v4242_v31 = vadd.f32 %v8319_v15, %v8240_v28 }
 0x77c   : > { %v6686_v1 = vpop.eup %6685  ;;  %4954 = vst [vmem:[%s8280_s21 + $0xe8] sm:$0xff] %v6684_v38  ;;  %6705 = vpow2.f32 %v4583_v60  ;;  %v8397_v13 = vpop.f32.mrb[128].mxu1  ;;  %v4236_v60 = vadd.f32 %v8306_v50, %v8240_v28 }
 0x77d   : > { %v6688_v36 = vpop.eup %6687  ;;  %4958 = vst [vmem:[%s8280_s21 + $0x108] sm:$0xff] %v6686_v1  ;;  %6707 = vpow2.f32 %v4577_v63  ;;  %v8399_v14 = vpop.f32.mrb[64].mxu0 }
 0x77e   : > { %v6690_v37 = vpop.eup %6689  ;;  %4960 = vst [vmem:[%s8280_s21 + $0x118] sm:$0xff] %v6688_v36  ;;  %6709 = vpow2.f32 %v4585_v41  ;;  %v8402_v30 = vpop.f32.mrb[129].mxu1  ;;  %v4433_v50 = vsub.f32 0.0, %v4236_v60 }
 0x77f   : > { %v6692_v39 = vpop.eup %6691  ;;  %4964 = vst [vmem:[%s8280_s21 + $0x138] sm:$0xff] %v6690_v37  ;;  %6711 = vpow2.f32 %v4589_v42  ;;  %v8404_v0 = vpop.f32.mrb[65].mxu0  ;;  %v4240_v42 = vadd.f32 %v8314_v11, %v8235_v23 }
 0x780   : > { %v6694_v47 = vpop.eup %6693  ;;  %4961 = vst [vmem:[%s8280_s21 + $0x120] sm:$0xff] %v6692_v39  ;;  %6713 = vpow2.f32 %v4597_v4  ;;  %v8407_v34 = vpop.f32.mrb[130].mxu1  ;;  %v8425_v4 = vadd.f32 %v8317_v20, %v8238_v17 }
 0x781   : > { %v6696_v32 = vpop.eup %6695  ;;  %4965 = vst [vmem:[%s8280_s21 + $0x140] sm:$0xff] %v6694_v47  ;;  %6715 = vpow2.f32 %v4591_v16  ;;  %v8409_v26 = vpop.f32.mrb[66].mxu0 }
 0x782   : > { %v6698_v35 = vpop.eup %6697  ;;  %4967 = vst [vmem:[%s8280_s21 + $0x150] sm:$0xff] %v6696_v32  ;;  %6717 = vpow2.f32 %v4599_v33  ;;  %v8414_v57 = vpop.f32.mrb[131].mxu1  ;;  %v4613_v32 = vmul.f32 1.442695, %v4433_v50 }
 0x783   : > { %v8416_v56 = vpop.f32.mrb[67].mxu0  ;;  %v6700_v9 = vpop.eup %6699  ;;  %4971 = vst [vmem:[%s8280_s21 + $0x170] sm:$0xff] %v6698_v35  ;;  %6719 = vpow2.f32 %v4603_v53 }
 0x784   : > { %v6702_v63 = vpop.eup %6701  ;;  %v4744_v40 = vadd.f32 1.0, %v6700_v9  ;;  %6721 = vpow2.f32 %v4611_v6  ;;  %v8427_v5 = vpop.f32.mrb[132].mxu1 }
 0x785   : > { %v6704_v45 = vpop.eup %6703  ;;  %v4748_v41 = vadd.f32 1.0, %v6702_v63  ;;  %6723 = vpow2.f32 %v4605_v18  ;;  %v8429_v8 = vpop.f32.mrb[68].mxu0  ;;  %v4439_v18 = vsub.f32 0.0, %v4240_v42 }
 0x786   : > { %v6706_v49 = vpop.eup %6705  ;;  %6725 = vrcp.f32 %v4744_v40  ;;  %v4750_v38 = vadd.f32 1.0, %v6704_v45  ;;  %v8431_v37 = vpop.f32.mrb[133].mxu1  ;;  %v4436_v40 = vsub.f32 0.0, %v8425_v4 }
 0x787   : > { %v6708_v3 = vpop.eup %6707  ;;  %6727 = vrcp.f32 %v4748_v41  ;;  %v4754_v1 = vadd.f32 1.0, %v6706_v49  ;;  %v8433_v33 = vpop.f32.mrb[69].mxu0  ;;  %v4617_v49 = vmul.f32 1.442695, %v4435_v24 }
 0x788   : > { %v6710_v36 = vpop.eup %6709  ;;  %6729 = vrcp.f32 %v4750_v38  ;;  %v4751_v16 = vadd.f32 1.0, %v6708_v3  ;;  %v8435_v53 = vpop.f32.mrb[134].mxu1  ;;  %v4018_v38 = vadd.f32 %v8324_v44, %v8233_v19  ;;  %v4244_v3 = vadd.f32 %v8326_v29, %v8235_v23 }
 0x789   : > { %v6712_v11 = vpop.eup %6711  ;;  %6731 = vrcp.f32 %v4754_v1  ;;  %v4755_v39 = vadd.f32 1.0, %v6710_v36  ;;  %v8437_v47 = vpop.f32.mrb[70].mxu0  ;;  %v8452_v1 = vadd.f32 %v8404_v0, %v8399_v14  ;;  %v4625_v36 = vmul.f32 1.442695, %v4439_v18 }
 0x78a   : > { %v6714_v20 = vpop.eup %6713  ;;  %6733 = vrcp.f32 %v4751_v16  ;;  %v4757_v6 = vadd.f32 1.0, %v6712_v11  ;;  %v8439_v35 = vpop.f32.mrb[135].mxu1  ;;  %v4020_v16 = vadd.f32 %v8328_v58, %v8238_v17  ;;  %v4440_v11 = vsub.f32 0.0, %v4242_v31 }
 0x78b   : > { %v8441_v60 = vpop.f32.mrb[71].mxu0  ;;  %v6716_v9 = vpop.eup %6715  ;;  %6735 = vrcp.f32 %v4755_v39  ;;  %v4761_v63 = vadd.f32 1.0, %v6714_v20  ;;  %v4246_v39 = vadd.f32 %v8330_v55, %v8240_v28  ;;  %v4442_v20 = vsub.f32 0.0, %v4018_v38 }
 0x78c   : > { %v6718_v45 = vpop.eup %6717  ;;  %6737 = vrcp.f32 %v4757_v6  ;;  %v4758_v41 = vadd.f32 1.0, %v6716_v9  ;;  %v8458_v29 = vpop.f32.mrb[136].mxu1  ;;  %v4024_v6 = vadd.f32 %v8338_v22, %v8233_v19  ;;  %v4446_v9 = vsub.f32 0.0, %v4244_v3 }
 0x78d   : > { %v6720_v50 = vpop.eup %6719  ;;  %6739 = vrcp.f32 %v4761_v63  ;;  %v4762_v42 = vadd.f32 1.0, %v6718_v45  ;;  %v8462_v18 = vpop.f32.mrb[137].mxu1  ;;  %v4250_v55 = vadd.f32 %v8340_v27, %v8235_v23  ;;  %v8469_v63 = vadd.f32 %v8416_v56, %v8409_v26 }
 0x78e   : > { %v6722_v4 = vpop.eup %6721  ;;  %6741 = vrcp.f32 %v4758_v41  ;;  %v4764_v15 = vadd.f32 1.0, %v6720_v50  ;;  %v8471_v31 = vpop.f32.mrb[138].mxu1  ;;  %v4619_v22 = vmul.f32 1.442695, %v4436_v40  ;;  %v4443_v41 = vsub.f32 0.0, %v4020_v16 }
 0x78f   : > { %v6724_v24 = vpop.eup %6723  ;;  %6743 = vrcp.f32 %v4762_v42  ;;  %v4768_v44 = vadd.f32 1.0, %v6722_v4  ;;  %v4026_v38 = vadd.f32 %v8342_v46, %v8238_v17  ;;  %v8476_v50 = vpop.f32.mrb[139].mxu1  ;;  %v4627_v27 = vmul.f32 1.442695, %v4440_v11 }
 0x790   : > { %v6726_v14 = vpop.eup %6725  ;;  %6745 = vrcp.f32 %v4764_v15  ;;  %v4765_v0 = vadd.f32 1.0, %v6724_v24  ;;  %v4447_v26 = vsub.f32 0.0, %v4246_v39  ;;  %v4252_v56 = vadd.f32 %v8344_v25, %v8240_v28 }
 0x791   : > { %v6728_v58 = vpop.eup %6727  ;;  %4968 = vst [vmem:[%s8280_s21 + $0x158] sm:$0xff] %v6726_v14  ;;  %6747 = vrcp.f32 %v4768_v44  ;;  %v4631_v40 = vmul.f32 1.442695, %v4442_v20  ;;  %v4449_v4 = vsub.f32 0.0, %v4024_v6  ;;  %v4639_v46 = vmul.f32 1.442695, %v4446_v9 }
 0x792   : > { %v6730_v45 = vpop.eup %6729  ;;  %4972 = vst [vmem:[%s8280_s21 + $0x178] sm:$0xff] %v6728_v58  ;;  %6749 = vrcp.f32 %v4765_v0  ;;  %v4453_v16 = vsub.f32 0.0, %v4250_v55  ;;  %v4633_v25 = vmul.f32 1.442695, %v4443_v41  ;;  %v4450_v44 = vsub.f32 0.0, %v4026_v38 }
 0x793   : > { %v6732_v42 = vpop.eup %6731  ;;  %4974 = vst [vmem:[%s8280_s21 + $0x188] sm:$0xff] %v6730_v45  ;;  %6751 = vpow2.f32 %v4613_v32  ;;  %v8485_v32 = vadd.f32 %v8433_v33, %v8429_v8  ;;  %v4454_v39 = vsub.f32 0.0, %v4252_v56  ;;  %v4645_v8 = vmul.f32 1.442695, %v4449_v4 }
 0x794   : > { %v6734_v3 = vpop.eup %6733  ;;  %4978 = vst [vmem:[%s8280_s21 + $0x1a8] sm:$0xff] %v6732_v42  ;;  %6753 = vpow2.f32 %v4617_v49  ;;  %v4641_v49 = vmul.f32 1.442695, %v4447_v26  ;;  %v8494_v33 = vadd.f32 %v8441_v60, %v8437_v47  ;;  %v4653_v6 = vmul.f32 1.442695, %v4453_v16 }
 0x795   : > { %v6736_v15 = vpop.eup %6735  ;;  %4975 = vst [vmem:[%s8280_s21 + $0x190] sm:$0xff] %v6734_v3  ;;  %6755 = vpow2.f32 %v4625_v36  ;;  %v8489_v36 = vpop.f32.mrb[140].mxu1  ;;  %v4647_v55 = vmul.f32 1.442695, %v4450_v44  ;;  %v4655_v47 = vmul.f32 1.442695, %v4454_v39  ;;  %v4028_v38 = vadd.f32 %v8348_v21, %v8233_v19 }
 0x796   : > { %v6738_v24 = vpop.eup %6737  ;;  %4979 = vst [vmem:[%s8280_s21 + $0x1b0] sm:$0xff] %v6736_v15  ;;  %6757 = vpow2.f32 %v4619_v22  ;;  %v8496_v0 = vpop.f32.mrb[141].mxu1  ;;  %v4254_v15 = vadd.f32 %v8350_v48, %v8235_v23  ;;  %v4030_v39 = vadd.f32 %v8354_v61, %v8238_v17 }
 0x797   : > { %v6740_v11 = vpop.eup %6739  ;;  %4981 = vst [vmem:[%s8280_s21 + $0x1c0] sm:$0xff] %v6738_v24  ;;  %6759 = vpow2.f32 %v4627_v27  ;;  %v8499_v58 = vpop.f32.mrb[142].mxu1 }
 0x798   : > { %v6742_v14 = vpop.eup %6741  ;;  %4985 = vst [vmem:[%s8280_s21 + $0x1e0] sm:$0xff] %v6740_v11  ;;  %6761 = vpow2.f32 %v4631_v40  ;;  %v8502_v45 = vpop.f32.mrb[143].mxu1 }
 0x799   : > { %v6744_v20 = vpop.eup %6743  ;;  %4982 = vst [vmem:[%s8280_s21 + $0x1c8] sm:$0xff] %v6742_v14  ;;  %6763 = vpow2.f32 %v4639_v46  ;;  %v3328_v46 = vsub.s32 2, %v7606_v59 }
 0x79a   : > { %v6746_v9 = vpop.eup %6745  ;;  %4986 = vst [vmem:[%s8280_s21 + $0x1e8] sm:$0xff] %v6744_v20  ;;  %6765 = vpow2.f32 %v4633_v25  ;;  %v4456_v25 = vsub.f32 0.0, %v4028_v38  ;;  %v4256_v20 = vadd.f32 %v8358_v7, %v8240_v28  ;;  %v4034_v38 = vadd.f32 %v8369_v52, %v8233_v19 }
 0x79b   : > { %v6748_v22 = vpop.eup %6747  ;;  %4988 = vst [vmem:[%s8280_s21 + $0x1f8] sm:$0xff] %v6746_v9  ;;  %6767 = vpow2.f32 %v4641_v49 }
 0x79c   : > { %v6750_v60 = vpop.eup %6749  ;;  %4992 = vst [vmem:[%s8280_s21 + $0x218] sm:$0xff] %v6748_v22  ;;  %6769 = vpow2.f32 %v4645_v8  ;;  %v8509_v3 = vpop.f32.mrb[144].mxu1  ;;  %v8527_v22 = vld [vmem:[%s8880_s26] sm:$0xff] }
 0x79d   : > { %v6752_v41 = vpop.eup %6751  ;;  %4989 = vst [vmem:[%s8280_s21 + $0x200] sm:$0xff] %v6750_v60  ;;  %6771 = vpow2.f32 %v4653_v6  ;;  %v8514_v16 = vpop.f32.mrb[145].mxu1 }
 0x79e   : > { %v6754_v42 = vpop.eup %6753  ;;  %v4769_v27 = vadd.f32 1.0, %v6752_v41  ;;  %6773 = vpow2.f32 %v4647_v55  ;;  %v8516_v44 = vpop.f32.mrb[146].mxu1  ;;  %v4460_v55 = vsub.f32 0.0, %v4254_v15  ;;  %v4659_v41 = vmul.f32 1.442695, %v4456_v25 }
 0x79f   : > { %v6756_v26 = vpop.eup %6755  ;;  %v4771_v56 = vadd.f32 1.0, %v6754_v42  ;;  %6775 = vpow2.f32 %v4655_v47  ;;  %v8520_v14 = vpop.f32.mrb[147].mxu1  ;;  %v8530_v47 = vrot.slane %v8527_v22, %v3328_v46  ;;  %v4036_v15 = vadd.f32 %v8376_v2, %v8238_v17 }
 0x7a0   : > { %v6758_v40 = vpop.eup %6757  ;;  %6777 = vrcp.f32 %v4769_v27  ;;  %v4775_v4 = vadd.f32 1.0, %v6756_v26  ;;  %v4457_v27 = vsub.f32 0.0, %v4030_v39  ;;  %v4260_v26 = vadd.f32 %v8371_v43, %v8235_v23 }
 0x7a1   : > { %v6760_v24 = vpop.eup %6759  ;;  %6779 = vrcp.f32 %v4771_v56  ;;  %v4772_v21 = vadd.f32 1.0, %v6758_v40  ;;  %v4667_v52 = vmul.f32 1.442695, %v4460_v55  ;;  %v4262_v25 = vadd.f32 %v8378_v62, %v8240_v28 }
 0x7a2   : > { %v6762_v11 = vpop.eup %6761  ;;  %6781 = vrcp.f32 %v4775_v4  ;;  %v4776_v49 = vadd.f32 1.0, %v6760_v24  ;;  %v4461_v4 = vsub.f32 0.0, %v4256_v20  ;;  %v4463_v39 = vsub.f32 0.0, %v4034_v38 }
 0x7a3   : > { %v6764_v8 = vpop.eup %6763  ;;  %6783 = vrcp.f32 %v4772_v21  ;;  %v4778_v48 = vadd.f32 1.0, %v6762_v11  ;;  %v4038_v2 = vadd.f32 %v8383_v12, %v8233_v19  ;;  %v4264_v62 = vadd.f32 %v8385_v10, %v8235_v23 }
 0x7a4   : > { %v6766_v6 = vpop.eup %6765  ;;  %6785 = vrcp.f32 %v4776_v49  ;;  %v4782_v9 = vadd.f32 1.0, %v6764_v8  ;;  %v8538_v46 = vpop.f32.mrb[148].mxu1  ;;  %v4040_v19 = vadd.f32 %v8388_v51, %v8238_v17  ;;  %v4669_v38 = vmul.f32 1.442695, %v4461_v4 }
 0x7a5   : > { %v6768_v61 = vpop.eup %6767  ;;  %6787 = vrcp.f32 %v4778_v48  ;;  %v4779_v60 = vadd.f32 1.0, %v6766_v6  ;;  %v8542_v11 = vpop.f32.mrb[149].mxu1  ;;  %v4467_v6 = vsub.f32 0.0, %v4260_v26  ;;  %v4266_v23 = vadd.f32 %v8390_v54, %v8240_v28 }
 0x7a6   : > { %v6770_v7 = vpop.eup %6769  ;;  %6789 = vrcp.f32 %v4782_v9  ;;  %v4783_v42 = vadd.f32 1.0, %v6768_v61  ;;  %v8546_v8 = vpop.f32.mrb[150].mxu1  ;;  %v4661_v61 = vmul.f32 1.442695, %v4457_v27  ;;  %v4470_v27 = vsub.f32 0.0, %v4038_v2 }
 0x7a7   : > { %v6772_v56 = vpop.eup %6771  ;;  %6791 = vrcp.f32 %v4779_v60  ;;  %v4785_v40 = vadd.f32 1.0, %v6770_v7  ;;  %v8550_v9 = vpop.f32.mrb[151].mxu1  ;;  %v4464_v60 = vsub.f32 0.0, %v4036_v15  ;;  %v4468_v7 = vsub.f32 0.0, %v4262_v25 }
 0x7a8   : > { %v6774_v24 = vpop.eup %6773  ;;  %6793 = vrcp.f32 %v4783_v42  ;;  %v4789_v21 = vadd.f32 1.0, %v6772_v56  ;;  %v4673_v42 = vmul.f32 1.442695, %v4463_v39  ;;  %v4077_v26 = vadd.f32 %v8397_v13, %v8530_v47 }
 0x7a9   : > { %v6776_v43 = vpop.eup %6775  ;;  %6795 = vrcp.f32 %v4785_v40  ;;  %v4786_v49 = vadd.f32 1.0, %v6774_v24  ;;  %v4681_v17 = vmul.f32 1.442695, %v4467_v6  ;;  %v4474_v51 = vsub.f32 0.0, %v4264_v62 }
 0x7aa   : > { %v6778_v48 = vpop.eup %6777  ;;  %6797 = vrcp.f32 %v4789_v21  ;;  %v4790_v20 = vadd.f32 1.0, %v6776_v43  ;;  %v3332_v40 = vsub.s32 3, %v7606_v59  ;;  %v4675_v28 = vmul.f32 1.442695, %v4464_v60 }
 0x7ab   : > { %v6780_v55 = vpop.eup %6779  ;;  %4993 = vst [vmem:[%s8280_s21 + $0x220] sm:$0xff] %v6778_v48  ;;  %6799 = vrcp.f32 %v4786_v49  ;;  %v4471_v54 = vsub.f32 0.0, %v4040_v19  ;;  %v4683_v24 = vmul.f32 1.442695, %v4468_v7  ;;  %v4475_v13 = vsub.f32 0.0, %v4266_v23 }
 0x7ac   : > { %v6782_v12 = vpop.eup %6781  ;;  %4995 = vst [vmem:[%s8280_s21 + $0x230] sm:$0xff] %v6780_v55  ;;  %6801 = vrcp.f32 %v4790_v20  ;;  %v4687_v43 = vmul.f32 1.442695, %v4470_v27  ;;  %v4367_v49 = vsub.f32 0.0, %v4077_v26  ;;  %v3344_v39 = vsub.s32 6, %v7606_v59 }
 0x7ad   : > { %v6784_v10 = vpop.eup %6783  ;;  %4999 = vst [vmem:[%s8280_s21 + $0x250] sm:$0xff] %v6782_v12  ;;  %6803 = vpow2.f32 %v4659_v41  ;;  %v4136_v41 = vpop.f32.mrb[152].mxu1  ;;  %v4695_v20 = vmul.f32 1.442695, %v4474_v51  ;;  %v8574_v6 = vrot.slane %v8527_v22, %v3332_v40  ;;  %v4689_v59 = vmul.f32 1.442695, %v4471_v54 }
 0x7ae   : > { %v6786_v56 = vpop.eup %6785  ;;  %4996 = vst [vmem:[%s8280_s21 + $0x238] sm:$0xff] %v6784_v10  ;;  %6805 = vpow2.f32 %v4667_v52  ;;  %v8566_v21 = vadd.f32 %v4136_v41, %v8530_v47  ;;  %v8568_v52 = vpop.f32.mrb[153].mxu1  ;;  %v4697_v19 = vmul.f32 1.442695, %v4475_v13  ;;  %v8585_v7 = vrot.slane %v8527_v22, %v3344_v39 }
 0x7af   : > { %v6788_v4 = vpop.eup %6787  ;;  %5000 = vst [vmem:[%s8280_s21 + $0x258] sm:$0xff] %v6786_v56  ;;  %6807 = vpow2.f32 %v4661_v61  ;;  %v4140_v2 = vpop.f32.mrb[154].mxu1  ;;  %v4079_v10 = vadd.f32 %v8402_v30, %v8574_v6 }
 0x7b0   : > { %v6790_v15 = vpop.eup %6789  ;;  %5002 = vst [vmem:[%s8280_s21 + $0x268] sm:$0xff] %v6788_v4  ;;  %6809 = vpow2.f32 %v4669_v38  ;;  %v8577_v62 = vadd.f32 %v4140_v2, %v8530_v47  ;;  %v8579_v55 = vpop.f32.mrb[155].mxu1  ;;  %v4481_v38 = vmul.f32 1.442695, %v4367_v49  ;;  %v4303_v4 = vadd.f32 %v8452_v1, %v8585_v7 }
 0x7b1   : > { %v6792_v25 = vpop.eup %6791  ;;  %5006 = vst [vmem:[%s8280_s21 + $0x288] sm:$0xff] %v6790_v15  ;;  %6811 = vpow2.f32 %v4673_v42  ;;  %v4368_v41 = vsub.f32 0.0, %v4079_v10  ;;  %v4083_v49 = vadd.f32 %v8414_v57, %v8574_v6 }
 0x7b2   : > { %v6794_v48 = vpop.eup %6793  ;;  %5003 = vst [vmem:[%s8280_s21 + $0x270] sm:$0xff] %v6792_v25  ;;  %6813 = vpow2.f32 %v4681_v17 }
 0x7b3   : > { %v6796_v61 = vpop.eup %6795  ;;  %5007 = vst [vmem:[%s8280_s21 + $0x290] sm:$0xff] %v6794_v48  ;;  %6815 = vpow2.f32 %v4675_v28 }
 0x7b4   : > { %v6798_v60 = vpop.eup %6797  ;;  %5009 = vst [vmem:[%s8280_s21 + $0x2a0] sm:$0xff] %v6796_v61  ;;  %6817 = vpow2.f32 %v4683_v24  ;;  %v4146_v27 = vpop.f32.mrb[156].mxu1 }
 0x7b5   : > { %v6800_v12 = vpop.eup %6799  ;;  %5013 = vst [vmem:[%s8280_s21 + $0x2c0] sm:$0xff] %v6798_v60  ;;  %6819 = vpow2.f32 %v4687_v43  ;;  %v8592_v17 = vadd.f32 %v4146_v27, %v8530_v47  ;;  %v8594_v51 = vpop.f32.mrb[157].mxu1  ;;  %v4081_v43 = vadd.f32 %v8407_v34, %v8530_v47  ;;  %v4483_v60 = vmul.f32 1.442695, %v4368_v41 }
 0x7b6   : > { %v6802_v23 = vpop.eup %6801  ;;  %5010 = vst [vmem:[%s8280_s21 + $0x2a8] sm:$0xff] %v6800_v12  ;;  %6821 = vpow2.f32 %v4695_v20  ;;  %v4150_v28 = vpop.f32.mrb[158].mxu1  ;;  %v4371_v20 = vsub.f32 0.0, %v4303_v4  ;;  %v4087_v27 = vadd.f32 %v8427_v5, %v8530_v47 }
 0x7b7   : > { %v6804_v42 = vpop.eup %6803  ;;  %5014 = vst [vmem:[%s8280_s21 + $0x2c8] sm:$0xff] %v6802_v23  ;;  %6823 = vpow2.f32 %v4689_v59  ;;  %v8599_v15 = vadd.f32 %v4150_v28, %v8530_v47  ;;  %v8601_v24 = vpop.f32.mrb[159].mxu1  ;;  %v4375_v23 = vsub.f32 0.0, %v4083_v49 }
 0x7b8   : > { %v6806_v26 = vpop.eup %6805  ;;  %v4792_v56 = vadd.f32 1.0, %v6804_v42  ;;  %6825 = vpow2.f32 %v4697_v19  ;;  %v4306_v19 = vadd.f32 %v8469_v63, %v8585_v7  ;;  %v4489_v63 = vmul.f32 1.442695, %v4371_v20 }
 0x7b9   : > { %v6808_v22 = vpop.eup %6807  ;;  %v4796_v40 = vadd.f32 1.0, %v6806_v26  ;;  %6827 = vpow2.f32 %v4481_v38  ;;  %v4374_v38 = vsub.f32 0.0, %v4081_v43  ;;  %v4089_v26 = vadd.f32 %v8431_v37, %v8574_v6 }
 0x7ba   : > { %v6810_v30 = vpop.eup %6809  ;;  %6829 = vrcp.f32 %v4792_v56  ;;  %v4793_v54 = vadd.f32 1.0, %v6808_v22  ;;  %v4378_v41 = vsub.f32 0.0, %v4306_v19  ;;  %v4091_v43 = vadd.f32 %v8435_v53, %v8530_v47 }
 0x7bb   : > { %v6812_v13 = vpop.eup %6811  ;;  %6831 = vrcp.f32 %v4796_v40  ;;  %v4797_v25 = vadd.f32 1.0, %v6810_v30  ;;  %v4497_v19 = vmul.f32 1.442695, %v4375_v23 }
 0x7bc   : > { %v6814_v1 = vpop.eup %6813  ;;  %6833 = vrcp.f32 %v4793_v54  ;;  %v4799_v39 = vadd.f32 1.0, %v6812_v13  ;;  %v5793_v57 = vpop.f32.mrb[160].mxu1  ;;  %v4311_v13 = vadd.f32 %v8485_v32, %v8585_v7  ;;  %v4495_v32 = vmul.f32 1.442695, %v4374_v38 }
 0x7bd   : > { %v6816_v2 = vpop.eup %6815  ;;  %6835 = vrcp.f32 %v4797_v25  ;;  %v4803_v48 = vadd.f32 1.0, %v6814_v1  ;;  %v5794_v56 = vpop.f32.mrb[161].mxu1  ;;  %v4099_v38 = vadd.f32 %v8462_v18, %v8574_v6 }
 0x7be   : > { %v6818_v61 = vpop.eup %6817  ;;  %6837 = vrcp.f32 %v4799_v39  ;;  %v4800_v59 = vadd.f32 1.0, %v6816_v2  ;;  %v8613_v4 = vadd.f32 %v5794_v56, %v5793_v57  ;;  %v5796_v28 = vpop.f32.mrb[162].mxu1  ;;  %v4381_v2 = vsub.f32 0.0, %v4087_v27 }
 0x7bf   : > { %v6820_v12 = vpop.eup %6819  ;;  %6839 = vrcp.f32 %v4803_v48  ;;  %v4804_v34 = vadd.f32 1.0, %v6818_v61  ;;  %v5797_v5 = vpop.f32.mrb[163].mxu1  ;;  %v4093_v48 = vadd.f32 %v8439_v35, %v8574_v6  ;;  %v4382_v61 = vsub.f32 0.0, %v4089_v26 }
 0x7c0   : > { %v6822_v10 = vpop.eup %6821  ;;  %6841 = vrcp.f32 %v4800_v59  ;;  %v4806_v42 = vadd.f32 1.0, %v6820_v12  ;;  %v8619_v49 = vadd.f32 %v5797_v5, %v5796_v28  ;;  %v4314_v59 = vadd.f32 %v8494_v33, %v8585_v7 }
 0x7c1   : > { %v6824_v22 = vpop.eup %6823  ;;  %6843 = vrcp.f32 %v4804_v34  ;;  %v4810_v40 = vadd.f32 1.0, %v6822_v10  ;;  %v4385_v12 = vsub.f32 0.0, %v4311_v13  ;;  %v4097_v34 = vadd.f32 %v8458_v29, %v8530_v47 }
 0x7c2   : > { %v6826_v30 = vpop.eup %6825  ;;  %6845 = vrcp.f32 %v4806_v42  ;;  %v4807_v54 = vadd.f32 1.0, %v6824_v22  ;;  %v4503_v35 = vmul.f32 1.442695, %v4378_v41  ;;  %v4388_v10 = vsub.f32 0.0, %v4091_v43 }
 0x7c3   : > { %v6828_v25 = vpop.eup %6827  ;;  %6847 = vrcp.f32 %v4810_v40  ;;  %v4811_v37 = vadd.f32 1.0, %v6826_v30  ;;  %v4509_v27 = vmul.f32 1.442695, %v4381_v2  ;;  %v4389_v23 = vsub.f32 0.0, %v4093_v48 }
 0x7c4   : > { %v6830_v1 = vpop.eup %6829  ;;  %6849 = vrcp.f32 %v4807_v54  ;;  %v4703_v39 = vadd.f32 1.0, %v6828_v25  ;;  %v5799_v42 = vpop.f32.mrb[164].mxu1  ;;  %v4511_v29 = vmul.f32 1.442695, %v4382_v61  ;;  %v4392_v22 = vsub.f32 0.0, %v4314_v59 }
 0x7c5   : > { %v6832_v20 = vpop.eup %6831  ;;  %5016 = vst [vmem:[%s8280_s21 + $0x2d8] sm:$0xff] %v6830_v1  ;;  %6851 = vrcp.f32 %v4811_v37  ;;  %v5800_v26 = vpop.f32.mrb[165].mxu1  ;;  %v4517_v18 = vmul.f32 1.442695, %v4385_v12  ;;  %v4395_v30 = vsub.f32 0.0, %v4097_v34  ;;  %v4396_v13 = vsub.f32 0.0, %v4099_v38 }
 0x7c6   : > { %v6834_v53 = vpop.eup %6833  ;;  %5020 = vst [vmem:[%s8280_s21 + $0x2f8] sm:$0xff] %v6832_v20  ;;  %6853 = vrcp.f32 %v4703_v39  ;;  %v5802_v40 = vpop.f32.mrb[166].mxu1  ;;  %v4523_v41 = vmul.f32 1.442695, %v4388_v10  ;;  %v4525_v37 = vmul.f32 1.442695, %v4389_v23  ;;  %v4103_v12 = vadd.f32 %v8476_v50, %v8574_v6 }
 0x7c7   : > { %v6836_v57 = vpop.eup %6835  ;;  %5017 = vst [vmem:[%s8280_s21 + $0x2e0] sm:$0xff] %v6834_v53  ;;  %6855 = vpow2.f32 %v4483_v60  ;;  %v8634_v60 = vadd.f32 %v5800_v26, %v5799_v42  ;;  %v4531_v1 = vmul.f32 1.442695, %v4392_v22  ;;  %v4537_v2 = vmul.f32 1.442695, %v4395_v30 }
 0x7c8   : > { %v6838_v33 = vpop.eup %6837  ;;  %5021 = vst [vmem:[%s8280_s21 + $0x300] sm:$0xff] %v6836_v57  ;;  %6857 = vpow2.f32 %v4489_v63  ;;  %v5803_v63 = vpop.f32.mrb[167].mxu1  ;;  %v4539_v20 = vmul.f32 1.442695, %v4396_v13  ;;  %v4403_v22 = vsub.f32 0.0, %v4103_v12 }
 0x7c9   : > { %v6840_v56 = vpop.eup %6839  ;;  %5023 = vst [vmem:[%s8280_s21 + $0x310] sm:$0xff] %v6838_v33  ;;  %6859 = vpow2.f32 %v4495_v32  ;;  %v8638_v5 = vadd.f32 %v5803_v63, %v5802_v40  ;;  %v4101_v32 = vadd.f32 %v8471_v31, %v8530_v47 }
 0x7ca   : > { %v6842_v28 = vpop.eup %6841  ;;  %5027 = vst [vmem:[%s8280_s21 + $0x330] sm:$0xff] %v6840_v56  ;;  %6861 = vpow2.f32 %v4497_v19  ;;  %v4107_v56 = vadd.f32 %v8489_v36, %v8530_v47  ;;  %v4111_v36 = vadd.f32 %v8499_v58, %v8530_v47  ;;  %v4117_v58 = vadd.f32 %v8509_v3, %v8530_v47 }
 0x7cb   : > { %v6844_v54 = vpop.eup %6843  ;;  %5024 = vst [vmem:[%s8280_s21 + $0x318] sm:$0xff] %v6842_v28  ;;  %6863 = vpow2.f32 %v4503_v35  ;;  %v4402_v33 = vsub.f32 0.0, %v4101_v32 }
 0x7cc   : > { %v6846_v25 = vpop.eup %6845  ;;  %5028 = vst [vmem:[%s8280_s21 + $0x338] sm:$0xff] %v6844_v54  ;;  %6865 = vpow2.f32 %v4509_v27  ;;  %v5805_v61 = vpop.f32.mrb[168].mxu1 }
 0x7cd   : > { %v6848_v43 = vpop.eup %6847  ;;  %5030 = vst [vmem:[%s8280_s21 + $0x348] sm:$0xff] %v6846_v25  ;;  %6867 = vpow2.f32 %v4511_v29  ;;  %v5806_v53 = vpop.f32.mrb[169].mxu1  ;;  %v4551_v54 = vmul.f32 1.442695, %v4402_v33 }
 0x7ce   : > { %v6850_v39 = vpop.eup %6849  ;;  %5034 = vst [vmem:[%s8280_s21 + $0x368] sm:$0xff] %v6848_v43  ;;  %6869 = vpow2.f32 %v4517_v18  ;;  %v8650_v34 = vadd.f32 %v5806_v53, %v5805_v61  ;;  %v5808_v57 = vpop.f32.mrb[170].mxu1  ;;  %v4109_v18 = vadd.f32 %v8496_v0, %v8574_v6 }
 0x7cf   : > { %v6852_v48 = vpop.eup %6851  ;;  %5031 = vst [vmem:[%s8280_s21 + $0x350] sm:$0xff] %v6850_v39  ;;  %6871 = vpow2.f32 %v4523_v41  ;;  %v5809_v38 = vpop.f32.mrb[171].mxu1 }
 0x7d0   : > { %v6854_v59 = vpop.eup %6853  ;;  %5035 = vst [vmem:[%s8280_s21 + $0x370] sm:$0xff] %v6852_v48  ;;  %6873 = vpow2.f32 %v4525_v37  ;;  %v8652_v27 = vadd.f32 %v5809_v38, %v5808_v57  ;;  %v4409_v37 = vsub.f32 0.0, %v4107_v56  ;;  %v4410_v61 = vsub.f32 0.0, %v4109_v18 }
 0x7d1   : > { %v6856_v19 = vpop.eup %6855  ;;  %4927 = vst [vmem:[%s8280_s21 + $0x10] sm:$0xff] %v6854_v59  ;;  %6875 = vpow2.f32 %v4531_v1  ;;  %v4113_v59 = vadd.f32 %v8502_v45, %v8574_v6  ;;  %v4416_v38 = vsub.f32 0.0, %v4111_v36 }
 0x7d2   : > { %v6858_v35 = vpop.eup %6857  ;;  %v4704_v10 = vadd.f32 1.0, %v6856_v19  ;;  %6877 = vpow2.f32 %v4537_v2  ;;  %v4553_v2 = vmul.f32 1.442695, %v4403_v22  ;;  %v4565_v33 = vmul.f32 1.442695, %v4409_v37 }
 0x7d3   : > { %v6860_v42 = vpop.eup %6859  ;;  %v4707_v31 = vadd.f32 1.0, %v6858_v35  ;;  %6879 = vpow2.f32 %v4539_v20  ;;  %v4417_v56 = vsub.f32 0.0, %v4113_v59  ;;  %v4423_v22 = vsub.f32 0.0, %v4117_v58 }
 0x7d4   : > { %v6862_v23 = vpop.eup %6861  ;;  %6881 = vrcp.f32 %v4704_v10  ;;  %v4710_v26 = vadd.f32 1.0, %v6860_v42  ;;  %v5811_v41 = vpop.f32.mrb[172].mxu1  ;;  %v4119_v42 = vadd.f32 %v8514_v16, %v8574_v6  ;;  %v4567_v16 = vmul.f32 1.442695, %v4410_v61 }
 0x7d5   : > { %v6864_v50 = vpop.eup %6863  ;;  %6883 = vrcp.f32 %v4707_v31  ;;  %v4711_v29 = vadd.f32 1.0, %v6862_v23  ;;  %v5812_v43 = vpop.f32.mrb[173].mxu1  ;;  %v4121_v23 = vadd.f32 %v8516_v44, %v8530_v47  ;;  %v4579_v44 = vmul.f32 1.442695, %v4416_v38 }
 0x7d6   : > { %v6866_v40 = vpop.eup %6865  ;;  %6885 = vrcp.f32 %v4710_v26  ;;  %v4714_v28 = vadd.f32 1.0, %v6864_v50  ;;  %v8660_v48 = vadd.f32 %v5812_v43, %v5811_v41  ;;  %v5814_v0 = vpop.f32.mrb[174].mxu1  ;;  %v4123_v50 = vadd.f32 %v8520_v14, %v8574_v6 }
 0x7d7   : > { %v6868_v30 = vpop.eup %6867  ;;  %6887 = vrcp.f32 %v4711_v29  ;;  %v4717_v63 = vadd.f32 1.0, %v6866_v40  ;;  %v5815_v53 = vpop.f32.mrb[175].mxu1  ;;  %v4127_v40 = vadd.f32 %v8538_v46, %v8530_v47  ;;  %v4581_v43 = vmul.f32 1.442695, %v4417_v56 }
 0x7d8   : > { %v6870_v13 = vpop.eup %6869  ;;  %6889 = vrcp.f32 %v4714_v28  ;;  %v4718_v25 = vadd.f32 1.0, %v6868_v30  ;;  %v8666_v57 = vadd.f32 %v5815_v53, %v5814_v0  ;;  %v4424_v30 = vsub.f32 0.0, %v4119_v42 }
 0x7d9   : > { %v6872_v1 = vpop.eup %6871  ;;  %6891 = vrcp.f32 %v4717_v63  ;;  %v4721_v39 = vadd.f32 1.0, %v6870_v13  ;;  %v4129_v63 = vadd.f32 %v8542_v11, %v8574_v6  ;;  %v4430_v13 = vsub.f32 0.0, %v4121_v23 }
 0x7da   : > { %v6874_v20 = vpop.eup %6873  ;;  %6893 = vrcp.f32 %v4718_v25  ;;  %v4724_v32 = vadd.f32 1.0, %v6872_v1  ;;  %v4131_v25 = vadd.f32 %v8546_v8, %v8530_v47  ;;  %v4431_v1 = vsub.f32 0.0, %v4123_v50 }
 0x7db   : > { %v6876_v19 = vpop.eup %6875  ;;  %6895 = vrcp.f32 %v4721_v39  ;;  %v4725_v12 = vadd.f32 1.0, %v6874_v20  ;;  %v4437_v0 = vsub.f32 0.0, %v4127_v40  ;;  %v4595_v8 = vmul.f32 1.442695, %v4424_v30 }
 0x7dc   : > { %v6878_v35 = vpop.eup %6877  ;;  %6897 = vrcp.f32 %v4724_v32  ;;  %v4728_v10 = vadd.f32 1.0, %v6876_v19  ;;  %v5817_v28 = vpop.f32.mrb[176].mxu1  ;;  %v4438_v32 = vsub.f32 0.0, %v4129_v63  ;;  %v4607_v61 = vmul.f32 1.442695, %v4430_v13 }
 0x7dd   : > { %v6880_v31 = vpop.eup %6879  ;;  %6899 = vrcp.f32 %v4725_v12  ;;  %v4731_v45 = vadd.f32 1.0, %v6878_v35  ;;  %v5818_v14 = vpop.f32.mrb[177].mxu1  ;;  %v4444_v59 = vsub.f32 0.0, %v4131_v25  ;;  %v4609_v19 = vmul.f32 1.442695, %v4431_v1 }
 0x7de   : > { %v6882_v26 = vpop.eup %6881  ;;  %6901 = vrcp.f32 %v4728_v10  ;;  %v4732_v3 = vadd.f32 1.0, %v6880_v31  ;;  %v8683_v46 = vadd.f32 %v5818_v14, %v5817_v28  ;;  %v5820_v37 = vpop.f32.mrb[178].mxu1  ;;  %v4621_v58 = vmul.f32 1.442695, %v4437_v0 }
 0x7df   : > { %v6884_v29 = vpop.eup %6883  ;;  %4928 = vst [vmem:[%s8280_s21 + $0x18] sm:$0xff] %v6882_v26  ;;  %6903 = vrcp.f32 %v4731_v45  ;;  %v5821_v11 = vpop.f32.mrb[179].mxu1  ;;  %v4623_v38 = vmul.f32 1.442695, %v4438_v32  ;;  %v4635_v45 = vmul.f32 1.442695, %v4444_v59 }
 0x7e0   : > { %v6886_v18 = vpop.eup %6885  ;;  %4931 = vst [vmem:[%s8280_s21 + $0x30] sm:$0xff] %v6884_v29  ;;  %6905 = vrcp.f32 %v4732_v3  ;;  %v8687_v20 = vadd.f32 %v5821_v11, %v5820_v37  ;;  %v4451_v1 = vsub.f32 0.0, %v8566_v21 }
 0x7e1   : > { %v6888_v41 = vpop.eup %6887  ;;  %4934 = vst [vmem:[%s8280_s21 + $0x48] sm:$0xff] %v6886_v18  ;;  %6907 = vpow2.f32 %v4551_v54  ;;  %v4593_v54 = vmul.f32 1.442695, %v4423_v22  ;;  %v4133_v22 = vadd.f32 %v8550_v9, %v8574_v6 }
 0x7e2   : > { %v6890_v36 = vpop.eup %6889  ;;  %4935 = vst [vmem:[%s8280_s21 + $0x50] sm:$0xff] %v6888_v41  ;;  %6909 = vpow2.f32 %v4553_v2 }
 0x7e3   : > { %v6892_v39 = vpop.eup %6891  ;;  %4938 = vst [vmem:[%s8280_s21 + $0x68] sm:$0xff] %v6890_v36  ;;  %6911 = vpow2.f32 %v4565_v33  ;;  %v4445_v13 = vsub.f32 0.0, %v4133_v22  ;;  %v4139_v36 = vadd.f32 %v8568_v52, %v8574_v6  ;;  %v4149_v52 = vadd.f32 %v8594_v51, %v8574_v6 }
 0x7e4   : > { %v6894_v47 = vpop.eup %6893  ;;  %4941 = vst [vmem:[%s8280_s21 + $0x80] sm:$0xff] %v6892_v39  ;;  %6913 = vpow2.f32 %v4567_v16  ;;  %v5823_v35 = vpop.f32.mrb[180].mxu1  ;;  %v4465_v51 = vsub.f32 0.0, %v8592_v17  ;;  %v4327_v17 = vadd.f32 %v8634_v60, %v8585_v7 }
 0x7e5   : > { %v6896_v2 = vpop.eup %6895  ;;  %4942 = vst [vmem:[%s8280_s21 + $0x88] sm:$0xff] %v6894_v47  ;;  %6915 = vpow2.f32 %v4579_v44  ;;  %v5824_v42 = vpop.f32.mrb[181].mxu1 }
 0x7e6   : > { %v6898_v53 = vpop.eup %6897  ;;  %4945 = vst [vmem:[%s8280_s21 + $0xa0] sm:$0xff] %v6896_v2  ;;  %6917 = vpow2.f32 %v4581_v43  ;;  %v8695_v33 = vadd.f32 %v5824_v42, %v5823_v35  ;;  %v5826_v23 = vpop.f32.mrb[182].mxu1  ;;  %v4153_v35 = vadd.f32 %v8601_v24, %v8574_v6  ;;  %v4319_v42 = vadd.f32 %v8613_v4, %v8585_v7 }
 0x7e7   : > { %v6900_v12 = vpop.eup %6899  ;;  %4948 = vst [vmem:[%s8280_s21 + $0xb8] sm:$0xff] %v6898_v53  ;;  %6919 = vpow2.f32 %v4593_v54  ;;  %v5827_v3 = vpop.f32.mrb[183].mxu1  ;;  %v4143_v54 = vadd.f32 %v8579_v55, %v8574_v6  ;;  %v4649_v53 = vmul.f32 1.442695, %v4451_v1  ;;  %v4472_v24 = vsub.f32 0.0, %v8599_v15 }
 0x7e8   : > { %v6902_v10 = vpop.eup %6901  ;;  %4949 = vst [vmem:[%s8280_s21 + $0xc0] sm:$0xff] %v6900_v12  ;;  %6921 = vpow2.f32 %v4595_v8  ;;  %v8699_v50 = vadd.f32 %v5827_v3, %v5826_v23  ;;  %v4637_v8 = vmul.f32 1.442695, %v4445_v13  ;;  %v4322_v23 = vadd.f32 %v8619_v49, %v8585_v7 }
 0x7e9   : > { %v6904_v31 = vpop.eup %6903  ;;  %4952 = vst [vmem:[%s8280_s21 + $0xd8] sm:$0xff] %v6902_v10  ;;  %6923 = vpow2.f32 %v4607_v61  ;;  %v4452_v61 = vsub.f32 0.0, %v4139_v36  ;;  %v4399_v22 = vsub.f32 0.0, %v4319_v42  ;;  %v4351_v42 = vadd.f32 %v8683_v46, %v8585_v7 }
 0x7ea   : > { %v6906_v26 = vpop.eup %6905  ;;  %4955 = vst [vmem:[%s8280_s21 + $0xf0] sm:$0xff] %v6904_v31  ;;  %6925 = vpow2.f32 %v4609_v19  ;;  %v4458_v19 = vsub.f32 0.0, %v8577_v62  ;;  %v4406_v60 = vsub.f32 0.0, %v4322_v23  ;;  %v4362_v46 = vadd.f32 %v8699_v50, %v8585_v7 }
 0x7eb   : > { %v6908_v56 = vpop.eup %6907  ;;  %4956 = vst [vmem:[%s8280_s21 + $0xf8] sm:$0xff] %v6906_v26  ;;  %6927 = vpow2.f32 %v4621_v58  ;;  %v4459_v58 = vsub.f32 0.0, %v4143_v54  ;;  %v4651_v62 = vmul.f32 1.442695, %v4452_v61 }
 0x7ec   : > { %v6910_v29 = vpop.eup %6909  ;;  %v4738_v16 = vadd.f32 1.0, %v6908_v56  ;;  %6929 = vpow2.f32 %v4623_v38  ;;  %v4663_v6 = vmul.f32 1.442695, %v4458_v19  ;;  %v4473_v56 = vsub.f32 0.0, %v4153_v35 }
 0x7ed   : > { %v6912_v40 = vpop.eup %6911  ;;  %v4739_v28 = vadd.f32 1.0, %v6910_v29  ;;  %6931 = vpow2.f32 %v4635_v45  ;;  %v4466_v45 = vsub.f32 0.0, %v4149_v52  ;;  %v4665_v3 = vmul.f32 1.442695, %v4459_v58 }
 0x7ee   : > { %v6914_v18 = vpop.eup %6913  ;;  %6933 = vrcp.f32 %v4738_v16  ;;  %v4745_v44 = vadd.f32 1.0, %v6912_v40  ;;  %v4330_v29 = vadd.f32 %v8638_v5, %v8585_v7  ;;  %v4677_v16 = vmul.f32 1.442695, %v4465_v51 }
 0x7ef   : > { %v6916_v30 = vpop.eup %6915  ;;  %6935 = vrcp.f32 %v4739_v28  ;;  %v4746_v63 = vadd.f32 1.0, %v6914_v18  ;;  %v4679_v15 = vmul.f32 1.442695, %v4466_v45  ;;  %v4691_v18 = vmul.f32 1.442695, %v4472_v24 }
 0x7f0   : > { %v6918_v14 = vpop.eup %6917  ;;  %6937 = vrcp.f32 %v4745_v44  ;;  %v4752_v41 = vadd.f32 1.0, %v6916_v30  ;;  %v4413_v44 = vsub.f32 0.0, %v4327_v17  ;;  %v4693_v30 = vmul.f32 1.442695, %v4473_v56 }
 0x7f1   : > { %v6920_v25 = vpop.eup %6919  ;;  %6939 = vrcp.f32 %v4746_v63  ;;  %v4753_v37 = vadd.f32 1.0, %v6918_v14  ;;  %v4420_v63 = vsub.f32 0.0, %v4330_v29  ;;  %v4335_v52 = vadd.f32 %v8650_v34, %v8585_v7 }
 0x7f2   : > { %v6922_v9 = vpop.eup %6921  ;;  %6941 = vrcp.f32 %v4752_v41  ;;  %v4759_v43 = vadd.f32 1.0, %v6920_v25  ;;  %v4545_v41 = vmul.f32 1.442695, %v4399_v22  ;;  %v4559_v25 = vmul.f32 1.442695, %v4406_v60 }
 0x7f3   : > { %v6924_v11 = vpop.eup %6923  ;;  %6943 = vrcp.f32 %v4753_v37  ;;  %v4760_v39 = vadd.f32 1.0, %v6922_v9  ;;  %v4573_v36 = vmul.f32 1.442695, %v4413_v44  ;;  %v4427_v51 = vsub.f32 0.0, %v4335_v52 }
 0x7f4   : > { %v6926_v0 = vpop.eup %6925  ;;  %6945 = vrcp.f32 %v4759_v43  ;;  %v4766_v47 = vadd.f32 1.0, %v6924_v11  ;;  %v4587_v43 = vmul.f32 1.442695, %v4420_v63  ;;  %v4455_v56 = vsub.f32 0.0, %v4351_v42 }
 0x7f5   : > { %v6928_v32 = vpop.eup %6927  ;;  %6947 = vrcp.f32 %v4760_v39  ;;  %v4767_v2 = vadd.f32 1.0, %v6926_v0  ;;  %v4476_v60 = vsub.f32 0.0, %v4362_v46 }
 0x7f6   : > { %v6930_v59 = vpop.eup %6929  ;;  %6949 = vrcp.f32 %v4766_v47  ;;  %v4773_v21 = vadd.f32 1.0, %v6928_v32 }
 0x7f7   : > { %v6932_v12 = vpop.eup %6931  ;;  %6951 = vrcp.f32 %v4767_v2  ;;  %v4774_v55 = vadd.f32 1.0, %v6930_v59 }
 0x7f8   : > { %v6934_v10 = vpop.eup %6933  ;;  %6953 = vrcp.f32 %v4773_v21  ;;  %v4780_v38 = vadd.f32 1.0, %v6932_v12 }
 0x7f9   : > { %v6936_v31 = vpop.eup %6935  ;;  %4962 = vst [vmem:[%s8280_s21 + $0x128] sm:$0xff] %v6934_v10  ;;  %6955 = vrcp.f32 %v4774_v55  ;;  %v4343_v55 = vadd.f32 %v8660_v48, %v8585_v7  ;;  %v4346_v10 = vadd.f32 %v8666_v57, %v8585_v7  ;;  %v4354_v48 = vadd.f32 %v8687_v20, %v8585_v7 }
 0x7fa   : > { %v6938_v26 = vpop.eup %6937  ;;  %4963 = vst [vmem:[%s8280_s21 + $0x130] sm:$0xff] %v6936_v31  ;;  %6957 = vrcp.f32 %v4780_v38  ;;  %v4359_v57 = vadd.f32 %v8695_v33, %v8585_v7  ;;  %v4601_v20 = vmul.f32 1.442695, %v4427_v51 }
 0x7fb   : > { %v6940_v4 = vpop.eup %6939  ;;  %4969 = vst [vmem:[%s8280_s21 + $0x160] sm:$0xff] %v6938_v26  ;;  %6959 = vpow2.f32 %v4637_v8  ;;  %v4441_v26 = vsub.f32 0.0, %v4343_v55  ;;  %v4448_v17 = vsub.f32 0.0, %v4346_v10  ;;  %v4462_v33 = vsub.f32 0.0, %v4354_v48 }
 0x7fc   : > { %v6942_v49 = vpop.eup %6941  ;;  %4970 = vst [vmem:[%s8280_s21 + $0x168] sm:$0xff] %v6940_v4  ;;  %6961 = vpow2.f32 %v4649_v53  ;;  %v4338_v53 = vadd.f32 %v8652_v27, %v8585_v7 }
 0x7fd   : > { %v6944_v40 = vpop.eup %6943  ;;  %4976 = vst [vmem:[%s8280_s21 + $0x198] sm:$0xff] %v6942_v49  ;;  %6963 = vpow2.f32 %v4651_v62  ;;  %v4643_v50 = vmul.f32 1.442695, %v4448_v17 }
 0x7fe   : > { %v6946_v28 = vpop.eup %6945  ;;  %4977 = vst [vmem:[%s8280_s21 + $0x1a0] sm:$0xff] %v6944_v40  ;;  %6965 = vpow2.f32 %v4663_v6  ;;  %v4434_v62 = vsub.f32 0.0, %v4338_v53  ;;  %v4629_v40 = vmul.f32 1.442695, %v4441_v26 }
 0x7ff   : > { %v6948_v5 = vpop.eup %6947  ;;  %4983 = vst [vmem:[%s8280_s21 + $0x1d0] sm:$0xff] %v6946_v28  ;;  %6967 = vpow2.f32 %v4665_v3 }
 0x800   : > { %v6950_v14 = vpop.eup %6949  ;;  %4984 = vst [vmem:[%s8280_s21 + $0x1d8] sm:$0xff] %v6948_v5  ;;  %6969 = vpow2.f32 %v4677_v16  ;;  %v4615_v16 = vmul.f32 1.442695, %v4434_v62  ;;  %v4671_v5 = vmul.f32 1.442695, %v4462_v33 }
 0x801   : > { %v6952_v13 = vpop.eup %6951  ;;  %4990 = vst [vmem:[%s8280_s21 + $0x208] sm:$0xff] %v6950_v14  ;;  %6971 = vpow2.f32 %v4679_v15  ;;  %v4469_v15 = vsub.f32 0.0, %v4359_v57 }
 0x802   : > { %v6954_v37 = vpop.eup %6953  ;;  %4991 = vst [vmem:[%s8280_s21 + $0x210] sm:$0xff] %v6952_v13  ;;  %6973 = vpow2.f32 %v4691_v18  ;;  %v4657_v18 = vmul.f32 1.442695, %v4455_v56 }
 0x803   : > { %v6956_v9 = vpop.eup %6955  ;;  %4997 = vst [vmem:[%s8280_s21 + $0x240] sm:$0xff] %v6954_v37  ;;  %6975 = vpow2.f32 %v4693_v30  ;;  %v4685_v63 = vmul.f32 1.442695, %v4469_v15 }
 0x804   : > { %v6958_v1 = vpop.eup %6957  ;;  %4998 = vst [vmem:[%s8280_s21 + $0x248] sm:$0xff] %v6956_v9  ;;  %6977 = vpow2.f32 %v4545_v41  ;;  %v4699_v41 = vmul.f32 1.442695, %v4476_v60 }
 0x805   : > { %v6960_v11 = vpop.eup %6959  ;;  %5004 = vst [vmem:[%s8280_s21 + $0x278] sm:$0xff] %v6958_v1  ;;  %6979 = vpow2.f32 %v4559_v25 }
 0x806   : > { %v6962_v39 = vpop.eup %6961  ;;  %v4781_v54 = vadd.f32 1.0, %v6960_v11  ;;  %6981 = vpow2.f32 %v4573_v36 }
 0x807   : > { %v6964_v0 = vpop.eup %6963  ;;  %v4787_v47 = vadd.f32 1.0, %v6962_v39  ;;  %6983 = vpow2.f32 %v4587_v43 }
 0x808   : > { %v6966_v8 = vpop.eup %6965  ;;  %6985 = vrcp.f32 %v4781_v54  ;;  %v4788_v32 = vadd.f32 1.0, %v6964_v0 }
 0x809   : > { %v6968_v2 = vpop.eup %6967  ;;  %6987 = vrcp.f32 %v4787_v47  ;;  %v4794_v61 = vadd.f32 1.0, %v6966_v8 }
 0x80a   : > { %v6970_v59 = vpop.eup %6969  ;;  %6989 = vrcp.f32 %v4788_v32  ;;  %v4795_v21 = vadd.f32 1.0, %v6968_v2 }
 0x80b   : > { %v6972_v19 = vpop.eup %6971  ;;  %6991 = vrcp.f32 %v4794_v61  ;;  %v4801_v12 = vadd.f32 1.0, %v6970_v59 }
 0x80c   : > { %v6974_v58 = vpop.eup %6973  ;;  %6993 = vrcp.f32 %v4795_v21  ;;  %v4802_v35 = vadd.f32 1.0, %v6972_v19 }
 0x80d   : > { %v6976_v38 = vpop.eup %6975  ;;  %6995 = vrcp.f32 %v4801_v12  ;;  %v4808_v34 = vadd.f32 1.0, %v6974_v58 }
 0x80e   : > { %v6978_v27 = vpop.eup %6977  ;;  %6997 = vrcp.f32 %v4802_v35  ;;  %v4809_v31 = vadd.f32 1.0, %v6976_v38 }
 0x80f   : > { %v6980_v45 = vpop.eup %6979  ;;  %6999 = vrcp.f32 %v4808_v34  ;;  %v4735_v23 = vadd.f32 1.0, %v6978_v27 }
 0x810   : > { %v6982_v6 = vpop.eup %6981  ;;  %7001 = vrcp.f32 %v4809_v31  ;;  %v4742_v24 = vadd.f32 1.0, %v6980_v45 }
 0x811   : > { %v6984_v4 = vpop.eup %6983  ;;  %7003 = vrcp.f32 %v4735_v23  ;;  %v4749_v3 = vadd.f32 1.0, %v6982_v6 }
 0x812   : > { %v6986_v29 = vpop.eup %6985  ;;  %7005 = vrcp.f32 %v4742_v24  ;;  %v4756_v49 = vadd.f32 1.0, %v6984_v4 }
 0x813   : > { %v6988_v22 = vpop.eup %6987  ;;  %5005 = vst [vmem:[%s8280_s21 + $0x280] sm:$0xff] %v6986_v29  ;;  %7007 = vrcp.f32 %v4749_v3 }
 0x814   : > { %v6990_v7 = vpop.eup %6989  ;;  %5011 = vst [vmem:[%s8280_s21 + $0x2b0] sm:$0xff] %v6988_v22  ;;  %7009 = vrcp.f32 %v4756_v49 }
 0x815   : > { %v6992_v28 = vpop.eup %6991  ;;  %5012 = vst [vmem:[%s8280_s21 + $0x2b8] sm:$0xff] %v6990_v7  ;;  %7011 = vpow2.f32 %v4601_v20 }
 0x816   : > { %v6994_v44 = vpop.eup %6993  ;;  %5018 = vst [vmem:[%s8280_s21 + $0x2e8] sm:$0xff] %v6992_v28  ;;  %7013 = vpow2.f32 %v4615_v16 }
 0x817   : > { %v6996_v30 = vpop.eup %6995  ;;  %5019 = vst [vmem:[%s8280_s21 + $0x2f0] sm:$0xff] %v6994_v44  ;;  %7015 = vpow2.f32 %v4629_v40 }
 0x818   : > { %v6998_v14 = vpop.eup %6997  ;;  %5025 = vst [vmem:[%s8280_s21 + $0x320] sm:$0xff] %v6996_v30  ;;  %7017 = vpow2.f32 %v4643_v50 }
 0x819   : > { %v7000_v13 = vpop.eup %6999  ;;  %5026 = vst [vmem:[%s8280_s21 + $0x328] sm:$0xff] %v6998_v14  ;;  %7019 = vpow2.f32 %v4657_v18 }
 0x81a   : > { %v7002_v25 = vpop.eup %7001  ;;  %5032 = vst [vmem:[%s8280_s21 + $0x358] sm:$0xff] %v7000_v13  ;;  %7021 = vpow2.f32 %v4671_v5 }
 0x81b   : > { %v7004_v37 = vpop.eup %7003  ;;  %5033 = vst [vmem:[%s8280_s21 + $0x360] sm:$0xff] %v7002_v25  ;;  %7023 = vpow2.f32 %v4685_v63 }
 0x81c   : > { %v7006_v36 = vpop.eup %7005  ;;  %4959 = vst [vmem:[%s8280_s21 + $0x110] sm:$0xff] %v7004_v37  ;;  %7025 = vpow2.f32 %v4699_v41 }
 0x81d   : > { %v7008_v9 = vpop.eup %7007  ;;  %4966 = vst [vmem:[%s8280_s21 + $0x148] sm:$0xff] %v7006_v36 }
 0x81e   : > { %v7010_v43 = vpop.eup %7009  ;;  %4973 = vst [vmem:[%s8280_s21 + $0x180] sm:$0xff] %v7008_v9 }
 0x81f   : > { %v7012_v1 = vpop.eup %7011  ;;  %4980 = vst [vmem:[%s8280_s21 + $0x1b8] sm:$0xff] %v7010_v43 }
 0x820   : > { %v7014_v11 = vpop.eup %7013  ;;  %v4763_v39 = vadd.f32 1.0, %v7012_v1 }
 0x821   : > { %v7016_v54 = vpop.eup %7015  ;;  %v4770_v0 = vadd.f32 1.0, %v7014_v11 }
 0x822   : > { %v7018_v47 = vpop.eup %7017  ;;  %7027 = vrcp.f32 %v4763_v39  ;;  %v4777_v8 = vadd.f32 1.0, %v7016_v54 }
 0x823   : > { %v7020_v32 = vpop.eup %7019  ;;  %7029 = vrcp.f32 %v4770_v0  ;;  %v4784_v2 = vadd.f32 1.0, %v7018_v47 }
 0x824   : > { %v7022_v61 = vpop.eup %7021  ;;  %7031 = vrcp.f32 %v4777_v8  ;;  %v4791_v52 = vadd.f32 1.0, %v7020_v32 }
 0x825   : > { %v7024_v59 = vpop.eup %7023  ;;  %7033 = vrcp.f32 %v4784_v2  ;;  %v4798_v21 = vadd.f32 1.0, %v7022_v61 }
 0x826   : > { %v7026_v53 = vpop.eup %7025  ;;  %7035 = vrcp.f32 %v4791_v52  ;;  %v4805_v19 = vadd.f32 1.0, %v7024_v59 }
 0x827   : > { %7037 = vrcp.f32 %v4798_v21  ;;  %v4812_v12 = vadd.f32 1.0, %v7026_v53 }
 0x828   : > { %7039 = vrcp.f32 %v4805_v19 }
 0x829   : > { %7041 = vrcp.f32 %v4812_v12 }
 0x82c   : > { %v7028_v55 = vpop.eup %7027 }
 0x82d   : > { %v7030_v58 = vpop.eup %7029  ;;  %4987 = vst [vmem:[%s8280_s21 + $0x1f0] sm:$0xff] %v7028_v55 }
 0x82e   : > { %v7032_v35 = vpop.eup %7031  ;;  %4994 = vst [vmem:[%s8280_s21 + $0x228] sm:$0xff] %v7030_v58 }
 0x82f   : > { %v7034_v10 = vpop.eup %7033  ;;  %5001 = vst [vmem:[%s8280_s21 + $0x260] sm:$0xff] %v7032_v35 }
 0x830   : > { %v7036_v38 = vpop.eup %7035  ;;  %5008 = vst [vmem:[%s8280_s21 + $0x298] sm:$0xff] %v7034_v10 }
 0x831   : > { %v7038_v34 = vpop.eup %7037  ;;  %5015 = vst [vmem:[%s8280_s21 + $0x2d0] sm:$0xff] %v7036_v38 }
 0x832   : > { %v7040_v51 = vpop.eup %7039  ;;  %5022 = vst [vmem:[%s8280_s21 + $0x308] sm:$0xff] %v7038_v34 }
 0x833   : > { %v7042_v42 = vpop.eup %7041  ;;  %5029 = vst [vmem:[%s8280_s21 + $0x340] sm:$0xff] %v7040_v51 }
 0x834   : > { %5036 = vst [vmem:[%s8280_s21 + $0x378] sm:$0xff] %v7042_v42 }
 0x835   : > { %7143 = shalt.err (!%p7140_p13)
}
 0x836   : > { %s7144_s21 = scalar_lea.hbm %s8775_s29, 14336  ;;  %s7148_s12 = scalar_lea.hbm %s8881_s16, 28672 }
 0x837   : > { %p7145_p6 = scmp.ne.s32.totalorder %s8775_s29, %s7144_s21  ;;  %p7149_p7 = scmp.lt.u32.totalorder %s8775_s29, %s8881_s16 }
 0x838   : > { %p7150_p8 = scmp.lt.u32.totalorder %s7148_s12, %s7144_s21  ;;  %p7152_p0 = scmp.lt.u32.totalorder %s7144_s21, %s8775_s29 }
 0x839   : > { %p7146_p10 = pnand %p7145_p6, %p8882_p1 }
 0x83a   : > { %p7151_p11 = por %p7150_p8, %p7149_p7 }
 0x83b   : > { %p7147_p4 = pneg %p7146_p10 }
 0x83c   : > { %p7153_p3 = por %p7152_p0, %p7151_p11 }
 0x83e   : > { %p7154_p5 = pnand %p7153_p3, %p7147_p4 }
 0x840   : > { %7157 = shalt.err (!%p7154_p5)
}
 0x841   : > { %s7212_s9 = smov 896   ;;  %s7213_s11 = smov 56  }
 0x842   : > { %6040 = dma.vmem_to_hbm [thread:$0]  (%p8882_p1), %s8778_s2, 14336, %s8775_s29, %s5134_s25, %s7212_s9, %s7212_s9, %s7213_s11  }
 0x843 PF: > { %s8883_s27 = sld [smem:[#allocation12_spill]]  ;;  %s8884_s18 = sld [smem:[#allocation13_spill]] }
 0x844   : > { %p8886_p12 = scmp.ge.s32.totalorder %s7200_s24, 2 }
 0x849   : > { %s5181_s30 = sand.u32 1, %s8883_s27   ;;  %p8885_p9 = scmp.ne.s32.totalorder %s8884_s18, 0 }
 0x84a   : > { %s5182_s21 = scalar_lea.sflag [#allocation4], %s5181_s30 }
 0x84b   : > { %p6054_p2 = pnand %p8886_p12, %p8885_p9 }
 0x84d   : > { %7183 = dma.done.wait (!%p6054_p2), %s5182_s21, 14336  }
 0x84e   : > { %7185 = vsyncadd (!%p6054_p2), %s5182_s21, 4294952960  ;;  %s8887_s28 = sld [smem:[#allocation14_spill]]  ;;  %p31_p13 = scmp.ge.s32.totalorder %s7412_s14, 4  }
 0x84f   : > { %s8888_s21 = smov %s7192_s22  ;;  %s8889_s22 = smov %s7196_s23 }
 0x850   : > { %s8891_s24 = smov %s7412_s14  ;;  %33 = sbr.rel (!%p31_p13) target bundleno = 15 (0xf), region = 156 }
 0x854   : > { %s8890_s23 = smov %s8887_s28 }
 0x857   :  { %5203 = vsyncpa [#allocation3], 1 }
 0x858   :  { %5205 = vsyncpa [#allocation3 + $0x1], 1 }
 0x859   :  { %5206 = vsyncpa [#allocation6], 1 }
 0x85a   :  { %5207 = vsyncpa [#allocation4], 1 }
 0x85b   :  { %5209 = vsyncpa [#allocation4 + $0x1], 1 }

</bundles_post_ra>
